<compile_context>
chip_gen: v6e
topology: v6e:2x2x1
jax: 0.10.0
libtpu: 0.0.40
codegen_flags: <defaults>
</compile_context>

<pallas_src>
import functools
import numpy as np
import jax
import jax.numpy as jnp
from jax import lax
from jax.experimental import pallas as pl
from jax.experimental.pallas import tpu as pltpu

EPS = 1e-5  # PyTorch LayerNorm default eps


# -----------------------------------------------------------------------------
# Pallas kernel: one full SwinTransformerLayer for a (ws, W, C) row of windows
# -----------------------------------------------------------------------------
def _layer_norm(x, gamma, beta):
    mu = jnp.mean(x, axis=-1, keepdims=True)
    var = jnp.mean((x - mu) ** 2, axis=-1, keepdims=True)
    return (x - mu) * lax.rsqrt(var + EPS) * gamma + beta


def _swin_layer_kernel(*refs, num_heads, window_size, has_mask):
    if has_mask:
        (x_ref, bias_ref, mask_ref, g1_ref, b1_ref, wqkv_ref, bqkv_ref,
         wproj_ref, bproj_ref, g2_ref, b2_ref, w1_ref, bb1_ref, w2_ref,
         bb2_ref, o_ref) = refs
    else:
        (x_ref, bias_ref, g1_ref, b1_ref, wqkv_ref, bqkv_ref,
         wproj_ref, bproj_ref, g2_ref, b2_ref, w1_ref, bb1_ref, w2_ref,
         bb2_ref, o_ref) = refs
        mask_ref = None

    ws = window_size
    NH = num_heads
    x_row = x_ref[...]                                # (ws, W, C) f32, shifted pre-norm tokens
    _, W, C = x_row.shape
    Wn = W // ws                                      # windows in this row
    N = ws * ws
    hd = C // NH
    T = Wn * N                                        # tokens in this block
    WH = Wn * NH                                      # batched (window, head) pairs

    # ---- window partition (leading-dim shuffle in VMEM, no host HBM pass) ----
    xw = x_row.reshape(ws, Wn, ws, C).transpose(1, 0, 2, 3).reshape(T, C)

    # ---- norm1 + qkv (attention scale pre-folded into q cols of wqkv/bqkv) ----
    xn = _layer_norm(xw, g1_ref[0], b1_ref[0])
    qkv = jnp.dot(xn.astype(jnp.bfloat16), wqkv_ref[...],
                  preferred_element_type=jnp.float32) + bqkv_ref[0]       # (T, 3C) f32

    # ---- split into (window*head)-batched q/k/v without a per-head loop -----
    # Only leading splits, sublane-tile (hd) splits and minor-most transposes.
    qkv = qkv.reshape(Wn, N, 3 * C)                   # (Wn, N, 3C)
    qkv = jnp.swapaxes(qkv, -1, -2)                   # (Wn, 3C, N)
    qkv = qkv.reshape(Wn, 3 * NH, hd, N)              # (Wn, 3*NH, hd, N)

    def _take(sec):                                   # -> (WH, N, hd) bf16
        z = qkv[:, sec * NH:(sec + 1) * NH].reshape(WH, hd, N)
        return jnp.swapaxes(z, -1, -2).astype(jnp.bfloat16)

    q, k, v = _take(0), _take(1), _take(2)

    # ---- batched multi-head window attention ----
    s = jnp.einsum('bnd,bmd->bnm', q, k,
                   preferred_element_type=jnp.float32)                    # (WH, N, N)
    s = s.reshape(Wn, NH, N, N) + bias_ref[...][None]                     # rel-pos bias (f32)
    if has_mask:
        s = s + mask_ref[...][:, None]                                    # shift mask (f32)
    s = s - jnp.max(s, axis=-1, keepdims=True)
    p = jnp.exp(s)
    p = p * pl.reciprocal(jnp.sum(p, axis=-1, keepdims=True), approx=True)
    p = p.reshape(WH, N, N).astype(jnp.bfloat16)
    o = jnp.einsum('bnm,bmd->bnd', p, v,
                   preferred_element_type=jnp.float32)                    # (WH, N, hd)

    # merge heads back into lanes (head-major columns, matches PyTorch):
    o = jnp.swapaxes(o, -1, -2)                       # (WH, hd, N)
    o = o.reshape(Wn, C, N)                           # (Wn, NH*hd, N)
    attn = jnp.swapaxes(o, -1, -2).reshape(T, C)      # (T, C)

    # ---- output projection + residual (partition / roll are bijections) ----
    y = xw + (jnp.dot(attn.astype(jnp.bfloat16), wproj_ref[...],
                      preferred_element_type=jnp.float32) + bproj_ref[0])

    # ---- norm2 + MLP(SiLU) + residual, fused in the same block ----
    yn = _layer_norm(y, g2_ref[0], b2_ref[0])
    h = jnp.dot(yn.astype(jnp.bfloat16), w1_ref[...],
                preferred_element_type=jnp.float32) + bb1_ref[0]
    h = h * jax.nn.sigmoid(h)                         # SiLU (sigmoid on the EUP)
    y = y + (jnp.dot(h.astype(jnp.bfloat16), w2_ref[...],
                     preferred_element_type=jnp.float32) + bb2_ref[0])

    # ---- window reverse back to the NHWC row layout and store ----
    o_ref[...] = y.reshape(Wn, ws, ws, C).transpose(1, 0, 2, 3).reshape(ws, W, C)


# -----------------------------------------------------------------------------
# Host-side helpers
# -----------------------------------------------------------------------------
def window_partition_jax(x, ws):
    B, H, W, C = x.shape
    x = x.reshape(B, H // ws, ws, W // ws, ws, C)
    x = x.transpose(0, 1, 3, 2, 4, 5)
    return x.reshape(-1, ws, ws, C)


def window_reverse_jax(windows, ws, H, W):
    B = windows.shape[0] // (H * W // ws // ws)
    x = windows.reshape(B, H // ws, W // ws, ws, ws, -1)
    x = x.transpose(0, 1, 3, 2, 4, 5)
    return x.reshape(B, H, W, -1)


def relative_position_index_np(ws):
    coords_h = np.arange(ws)
    coords_w = np.arange(ws)
    coords = np.stack(np.meshgrid(coords_h, coords_w, indexing="ij"))     # (2, ws, ws)
    coords_flat = coords.reshape(2, -1)
    rel = coords_flat[:, :, None] - coords_flat[:, None, :]               # (2, N, N)
    rel = rel.transpose(1, 2, 0).astype(np.int64)
    rel[:, :, 0] += ws - 1
    rel[:, :, 1] += ws - 1
    rel[:, :, 0] *= 2 * ws - 1
    return rel.sum(-1)                                                    # (N, N)


def create_mask_np(H, W, ws, shift):
    img_mask = np.zeros((1, H, W, 1), np.float32)
    h_slices = (slice(0, -ws), slice(-ws, -shift), slice(-shift, None))
    w_slices = (slice(0, -ws), slice(-ws, -shift), slice(-shift, None))
    cnt = 0
    for hs in h_slices:
        for wsl in w_slices:
            img_mask[:, hs, wsl, :] = cnt
            cnt += 1
    x = img_mask.reshape(1, H // ws, ws, W // ws, ws, 1)
    x = x.transpose(0, 1, 3, 2, 4, 5).reshape(-1, ws * ws)                # (nW, N)
    attn_mask = x[:, None, :] - x[:, :, None]                             # (nW, N, N)
    attn_mask = np.where(attn_mask != 0, np.float32(-100.0), np.float32(0.0))
    return attn_mask


def init_params(key, dim, num_heads, ws, mlp_ratio):
    hidden = int(dim * mlp_ratio)
    ks = jax.random.split(key, 12)
    n = lambda k, shape, s=0.02: (s * jax.random.normal(k, shape)).astype(jnp.float32)
    return dict(
        g1=1.0 + n(ks[0], (dim,)), b1=n(ks[1], (dim,)),
        wqkv=n(ks[2], (dim, 3 * dim)), bqkv=n(ks[3], (3 * dim,)),
        wproj=n(ks[4], (dim, dim)), bproj=n(ks[5], (dim,)),
        rel_table=n(ks[6], ((2 * ws - 1) * (2 * ws - 1), num_heads)),
        g2=1.0 + n(ks[7], (dim,)), b2=n(ks[8], (dim,)),
        w1=n(ks[9], (dim, hidden)), bb1=n(ks[10], (hidden,)),
        w2=n(ks[11], (hidden, dim)), bb2=jnp.zeros((dim,), jnp.float32),
    )


# -----------------------------------------------------------------------------
# Forward pass: pad -> NHWC -> (roll) -> fused Pallas layer kernel -> (roll back)
# -----------------------------------------------------------------------------
def swin_layer_forward(x_nchw, params, *, num_heads, window_size, shift_size):
    ws = window_size
    B, C, H_, W_ = x_nchw.shape
    pad_r = (ws - W_ % ws) % ws
    pad_b = (ws - H_ % ws) % ws
    x = x_nchw
    if pad_r or pad_b:
        x = jnp.pad(x, ((0, 0), (0, 0), (0, pad_b), (0, pad_r)))
    B, C, H, W = x.shape
    N = ws * ws
    Wn = W // ws
    nrows = H // ws
    nW = nrows * Wn
    hd = C // num_heads
    scale = hd ** (-0.5)
    hidden = params["w1"].shape[1]

    # NCHW -> NHWC (one pass), optional cyclic shift (one pass), then a *free*
    # reshape to rows of windows.  Window partition/reverse happen inside the
    # kernel, not as extra host HBM passes.
    x_nhwc = x.transpose(0, 2, 3, 1)                                      # (B, H, W, C)
    if shift_size > 0:
        x_nhwc = jnp.roll(x_nhwc, (-shift_size, -shift_size), axis=(1, 2))
    x_rows = x_nhwc.reshape(B * H, W, C)

    # Fold the attention scale into the q third of wqkv / bqkv.
    wqkv = params["wqkv"].at[:, :C].multiply(scale).astype(jnp.bfloat16)
    bqkv = params["bqkv"].at[:C].multiply(scale).reshape(1, 3 * C)

    # Relative-position bias, f32 (exact), VMEM-resident (constant index_map).
    rel_idx = jnp.asarray(relative_position_index_np(ws).reshape(-1))
    bias = params["rel_table"][rel_idx].reshape(N, N, num_heads).transpose(2, 0, 1)

    n_blocks = B * nrows                  # one row of windows per grid step (>= 4 here)

    def cspec(shape):                     # constant (resident) block
        return pl.BlockSpec(shape, lambda i: (0,) * len(shape))

    in_specs = [
        pl.BlockSpec((ws, W, C), lambda i: (i, 0, 0)),                    # x row
        cspec((num_heads, N, N)),                                         # rel-pos bias
    ]
    inputs = [x_rows, bias]
    if shift_size > 0:
        mask = jnp.asarray(create_mask_np(H, W, ws, shift_size))          # (nW, N, N) f32
        in_specs.append(pl.BlockSpec((Wn, N, N), lambda i: (i % nrows, 0, 0)))
        inputs.append(mask)

    in_specs += [
        cspec((1, C)), cspec((1, C)),                 # g1, b1
        cspec((C, 3 * C)), cspec((1, 3 * C)),         # wqkv, bqkv
        cspec((C, C)), cspec((1, C)),                 # wproj, bproj
        cspec((1, C)), cspec((1, C)),                 # g2, b2
        cspec((C, hidden)), cspec((1, hidden)),       # w1, bb1
        cspec((hidden, C)), cspec((1, C)),            # w2, bb2
    ]
    inputs += [
        params["g1"].reshape(1, C), params["b1"].reshape(1, C),
        wqkv, bqkv,
        params["wproj"].astype(jnp.bfloat16), params["bproj"].reshape(1, C),
        params["g2"].reshape(1, C), params["b2"].reshape(1, C),
        params["w1"].astype(jnp.bfloat16), params["bb1"].reshape(1, hidden),
        params["w2"].astype(jnp.bfloat16), params["bb2"].reshape(1, C),
    ]

    # Explicit VMEM budget (v7x: 64 MiB physical / 32 MiB default scoped).
    blk_bytes = ws * W * C * 4
    weight_bytes = (3 * C * C + C * C + 2 * C * hidden) * 2 + num_heads * N * N * 4
    mask_blk_bytes = (Wn * N * N * 4) if shift_size > 0 else 0
    # conservative: everything (incl. constant-index_map weights) double-buffered
    need = 2 * (2 * blk_bytes + weight_bytes + mask_blk_bytes) + (1 << 20)
    vmem_limit = int(min(64 * 2 ** 20, max(32 * 2 ** 20, 2 * need)))

    tokens = B * H * W
    ce = pl.CostEstimate(
        flops=int(tokens * (2 * C * 3 * C + 4 * N * C + 2 * C * C + 4 * C * hidden)),
        transcendentals=int(tokens * (num_heads * N + hidden)),
        bytes_accessed=int(2 * tokens * C * 4
                           + n_blocks * (weight_bytes + mask_blk_bytes)),
    )

    out_rows = pl.pallas_call(
        functools.partial(_swin_layer_kernel, num_heads=num_heads,
                          window_size=ws, has_mask=shift_size > 0),
        out_shape=jax.ShapeDtypeStruct((B * H, W, C), jnp.float32),
        grid=(n_blocks,),
        in_specs=in_specs,
        out_specs=pl.BlockSpec((ws, W, C), lambda i: (i, 0, 0)),
        compiler_params=pltpu.CompilerParams(
            dimension_semantics=("parallel",),
            vmem_limit_bytes=vmem_limit),
        cost_estimate=ce,
    )(*inputs)

    out_nhwc = out_rows.reshape(B, H, W, C)
    if shift_size > 0:
        out_nhwc = jnp.roll(out_nhwc, (shift_size, shift_size), axis=(1, 2))
    out = out_nhwc.transpose(0, 3, 1, 2)                                  # NCHW
    return out[:, :, :H_, :W_]


# -----------------------------------------------------------------------------
# Pure-JAX reference (mirrors the PyTorch forward) for a sanity check
# -----------------------------------------------------------------------------
def reference_forward(x_nchw, params, *, num_heads, window_size, shift_size):
    ws = window_size
    B, C, H_, W_ = x_nchw.shape
    pad_r = (ws - W_ % ws) % ws
    pad_b = (ws - H_ % ws) % ws
    x = jnp.pad(x_nchw, ((0, 0), (0, 0), (0, pad_b), (0, pad_r)))
    B, C, H, W = x.shape
    N = ws * ws
    nW = (H // ws) * (W // ws)
    hd = C // num_heads
    scale = hd ** (-0.5)

    def ln(v, g, b):
        mu = jnp.mean(v, -1, keepdims=True)
        var = jnp.mean((v - mu) ** 2, -1, keepdims=True)
        return (v - mu) * lax.rsqrt(var + EPS) * g + b

    x_tok = x.transpose(0, 2, 3, 1).reshape(B, H * W, C)
    shortcut = x_tok
    xn = ln(x_tok, params["g1"], params["b1"]).reshape(B, H, W, C)
    if shift_size > 0:
        xn = jnp.roll(xn, (-shift_size, -shift_size), axis=(1, 2))
    xw = window_partition_jax(xn, ws).reshape(-1, N, C)

    qkv = xw @ params["wqkv"] + params["bqkv"]
    qkv = qkv.reshape(-1, N, 3, num_heads, hd).transpose(2, 0, 3, 1, 4)
    q, k, v = qkv[0] * scale, qkv[1], qkv[2]
    attn = q @ k.transpose(0, 1, 3, 2)

    rel_idx = jnp.asarray(relative_position_index_np(ws).reshape(-1))
    rel_bias = params["rel_table"][rel_idx].reshape(N, N, num_heads).transpose(2, 0, 1)
    attn = attn + rel_bias[None]
    if shift_size > 0:
        mask = jnp.asarray(create_mask_np(H, W, ws, shift_size))
        attn = attn.reshape(-1, nW, num_heads, N, N) + mask[None, :, None]
        attn = attn.reshape(-1, num_heads, N, N)
    attn = jax.nn.softmax(attn, axis=-1)
    out = (attn @ v).transpose(0, 2, 1, 3).reshape(-1, N, C)
    out = out @ params["wproj"] + params["bproj"]
    sx = window_reverse_jax(out.reshape(-1, ws, ws, C), ws, H, W)
    if shift_size > 0:
        sx = jnp.roll(sx, (shift_size, shift_size), axis=(1, 2))
    x_tok = shortcut + sx.reshape(B, H * W, C)

    xn2 = ln(x_tok, params["g2"], params["b2"])
    h = jax.nn.silu(xn2 @ params["w1"] + params["bb1"])
    x_tok = x_tok + (h @ params["w2"] + params["bb2"])
    out = x_tok.transpose(0, 2, 1).reshape(B, C, H, W)
    return out[:, :, :H_, :W_]


# -----------------------------------------------------------------------------
if __name__ == "__main__":
    key = jax.random.PRNGKey(0)
    mlp_ratio = 4.0
    configs = [
        dict(B=2, C=32, H=14, W=14, num_heads=4, window_size=8, shift_size=0),  # padded path
        dict(B=2, C=32, H=16, W=16, num_heads=4, window_size=8, shift_size=4),  # shifted + mask
    ]
    for cfg in configs:
        kx, kp, key = jax.random.split(key, 3)
        x = jax.random.normal(kx, (cfg["B"], cfg["C"], cfg["H"], cfg["W"]), dtype=jnp.float32)
        params = init_params(kp, cfg["C"], cfg["num_heads"], cfg["window_size"], mlp_ratio)

        out = swin_layer_forward(x, params, num_heads=cfg["num_heads"],
                                 window_size=cfg["window_size"],
                                 shift_size=cfg["shift_size"])
        out = jax.block_until_ready(out)

        ref = reference_forward(x, params, num_heads=cfg["num_heads"],
                                window_size=cfg["window_size"],
                                shift_size=cfg["shift_size"])
        ref = jax.block_until_ready(ref)

        assert out.shape == x.shape, (out.shape, x.shape)
        # bf16 matmul operands + approx reciprocal vs f32 reference.
        np.testing.assert_allclose(np.asarray(out), np.asarray(ref), rtol=2e-2, atol=2e-2)
    print("KERNEL_OK")
</pallas_src>

<mosaic_0001>
module attributes {stable_mosaic.version = 11 : i64} {
  func.func @_swin_layer_kernel(%arg0: i32, %arg1: memref<8x16x32xf32, #tpu.memory_space<vmem>>, %arg2: memref<4x64x64xf32, #tpu.memory_space<vmem>>, %arg3: memref<1x32xf32, #tpu.memory_space<vmem>>, %arg4: memref<1x32xf32, #tpu.memory_space<vmem>>, %arg5: memref<32x96xbf16, #tpu.memory_space<vmem>>, %arg6: memref<1x96xf32, #tpu.memory_space<vmem>>, %arg7: memref<32x32xbf16, #tpu.memory_space<vmem>>, %arg8: memref<1x32xf32, #tpu.memory_space<vmem>>, %arg9: memref<1x32xf32, #tpu.memory_space<vmem>>, %arg10: memref<1x32xf32, #tpu.memory_space<vmem>>, %arg11: memref<32x128xbf16, #tpu.memory_space<vmem>>, %arg12: memref<1x128xf32, #tpu.memory_space<vmem>>, %arg13: memref<128x32xbf16, #tpu.memory_space<vmem>>, %arg14: memref<1x32xf32, #tpu.memory_space<vmem>>, %arg15: memref<8x16x32xf32, #tpu.memory_space<vmem>>) attributes {dimension_semantics = [#tpu.dimension_semantics<parallel>], iteration_bounds = array<i64: 4>, scalar_prefetch = 0 : i64, scratch_operands = 0 : i64, tpu.core_type = #tpu.core_type<tc>, window_params = [{transform_indices = @transform_0, window_bounds = array<i64: 8, 16, 32>}, {pipeline_mode = #tpu.pipeline_mode<synchronous>, transform_indices = @transform_1, window_bounds = array<i64: 4, 64, 64>}, {pipeline_mode = #tpu.pipeline_mode<synchronous>, transform_indices = @transform_2, window_bounds = array<i64: 1, 32>}, {pipeline_mode = #tpu.pipeline_mode<synchronous>, transform_indices = @transform_3, window_bounds = array<i64: 1, 32>}, {pipeline_mode = #tpu.pipeline_mode<synchronous>, transform_indices = @transform_4, window_bounds = array<i64: 32, 96>}, {pipeline_mode = #tpu.pipeline_mode<synchronous>, transform_indices = @transform_5, window_bounds = array<i64: 1, 96>}, {pipeline_mode = #tpu.pipeline_mode<synchronous>, transform_indices = @transform_6, window_bounds = array<i64: 32, 32>}, {pipeline_mode = #tpu.pipeline_mode<synchronous>, transform_indices = @transform_7, window_bounds = array<i64: 1, 32>}, {pipeline_mode = #tpu.pipeline_mode<synchronous>, transform_indices = @transform_8, window_bounds = array<i64: 1, 32>}, {pipeline_mode = #tpu.pipeline_mode<synchronous>, transform_indices = @transform_9, window_bounds = array<i64: 1, 32>}, {pipeline_mode = #tpu.pipeline_mode<synchronous>, transform_indices = @transform_10, window_bounds = array<i64: 32, 128>}, {pipeline_mode = #tpu.pipeline_mode<synchronous>, transform_indices = @transform_11, window_bounds = array<i64: 1, 128>}, {pipeline_mode = #tpu.pipeline_mode<synchronous>, transform_indices = @transform_12, window_bounds = array<i64: 128, 32>}, {pipeline_mode = #tpu.pipeline_mode<synchronous>, transform_indices = @transform_13, window_bounds = array<i64: 1, 32>}, {transform_indices = @transform_14, window_bounds = array<i64: 8, 16, 32>}]} {
    %c0 = arith.constant 0 : index
    %c0_0 = arith.constant 0 : index
    %c0_1 = arith.constant 0 : index
    %0 = vector.load %arg1[%c0, %c0_0, %c0_1] : memref<8x16x32xf32, #tpu.memory_space<vmem>>, vector<8x16x32xf32>
    %1 = vector.shape_cast %0 : vector<8x16x32xf32> to vector<8x2x8x32xf32>
    %2 = tpu.transpose %1, [1, 0, 2, 3] : vector<8x2x8x32xf32> -> vector<2x8x8x32xf32>
    %3 = vector.shape_cast %2 : vector<2x8x8x32xf32> to vector<128x32xf32>
    %c0_2 = arith.constant 0 : index
    %c0_3 = arith.constant 0 : index
    %4 = vector.load %arg3[%c0_2, %c0_3] : memref<1x32xf32, #tpu.memory_space<vmem>>, vector<1x32xf32>
    %5 = vector.shape_cast %4 : vector<1x32xf32> to vector<32xf32>
    %c0_4 = arith.constant 0 : index
    %c0_5 = arith.constant 0 : index
    %6 = vector.load %arg4[%c0_4, %c0_5] : memref<1x32xf32, #tpu.memory_space<vmem>>, vector<1x32xf32>
    %7 = vector.shape_cast %6 : vector<1x32xf32> to vector<32xf32>
    %cst = arith.constant dense<0.000000e+00> : vector<128xf32>
    %8 = vector.multi_reduction <add>, %3, %cst [1] : vector<128x32xf32> to vector<128xf32>
    %9 = vector.shape_cast %8 : vector<128xf32> to vector<128x1xf32>
    %cst_6 = arith.constant 3.200000e+01 : f32
    %10 = vector.broadcast %cst_6 : f32 to vector<128x1xf32>
    %11 = arith.divf %9, %10 : vector<128x1xf32>
    %12 = vector.broadcast %11 : vector<128x1xf32> to vector<128x32xf32>
    %13 = arith.subf %3, %12 : vector<128x32xf32>
    %14 = arith.mulf %13, %13 : vector<128x32xf32>
    %cst_7 = arith.constant dense<0.000000e+00> : vector<128xf32>
    %15 = vector.multi_reduction <add>, %14, %cst_7 [1] : vector<128x32xf32> to vector<128xf32>
    %16 = vector.shape_cast %15 : vector<128xf32> to vector<128x1xf32>
    %cst_8 = arith.constant 3.200000e+01 : f32
    %17 = vector.broadcast %cst_8 : f32 to vector<128x1xf32>
    %18 = arith.divf %16, %17 : vector<128x1xf32>
    %19 = vector.broadcast %11 : vector<128x1xf32> to vector<128x32xf32>
    %20 = arith.subf %3, %19 : vector<128x32xf32>
    %cst_9 = arith.constant 9.99999974E-6 : f32
    %21 = vector.broadcast %cst_9 : f32 to vector<128x1xf32>
    %22 = arith.addf %18, %21 : vector<128x1xf32>
    %23 = math.rsqrt %22 : vector<128x1xf32>
    %24 = vector.broadcast %23 : vector<128x1xf32> to vector<128x32xf32>
    %25 = arith.mulf %20, %24 : vector<128x32xf32>
    %26 = vector.shape_cast %5 : vector<32xf32> to vector<1x32xf32>
    %27 = vector.broadcast %26 : vector<1x32xf32> to vector<128x32xf32>
    %28 = arith.mulf %25, %27 : vector<128x32xf32>
    %29 = vector.shape_cast %7 : vector<32xf32> to vector<1x32xf32>
    %30 = vector.broadcast %29 : vector<1x32xf32> to vector<128x32xf32>
    %31 = arith.addf %28, %30 : vector<128x32xf32>
    %32 = arith.truncf %31 : vector<128x32xf32> to vector<128x32xbf16>
    %c0_10 = arith.constant 0 : index
    %c0_11 = arith.constant 0 : index
    %33 = vector.load %arg5[%c0_10, %c0_11] : memref<32x96xbf16, #tpu.memory_space<vmem>>, vector<32x96xbf16>
    %cst_12 = arith.constant dense<0.000000e+00> : vector<128x96xf32>
    %34 = tpu.matmul %32, %33, %cst_12 {dimension_numbers = #tpu.dot_dimension_numbers<[1], [0], [0], [1], [0, 0, 1, 1], [], []>} : vector<128x32xbf16>, vector<32x96xbf16>, vector<128x96xf32> -> vector<128x96xf32>
    %c0_13 = arith.constant 0 : index
    %c0_14 = arith.constant 0 : index
    %35 = vector.load %arg6[%c0_13, %c0_14] : memref<1x96xf32, #tpu.memory_space<vmem>>, vector<1x96xf32>
    %36 = vector.shape_cast %35 : vector<1x96xf32> to vector<96xf32>
    %37 = vector.shape_cast %36 : vector<96xf32> to vector<1x96xf32>
    %38 = vector.broadcast %37 : vector<1x96xf32> to vector<128x96xf32>
    %39 = arith.addf %34, %38 : vector<128x96xf32>
    %40 = vector.shape_cast %39 : vector<128x96xf32> to vector<2x64x96xf32>
    %41 = tpu.transpose %40, [0, 2, 1] : vector<2x64x96xf32> -> vector<2x96x64xf32>
    %42 = vector.shape_cast %41 : vector<2x96x64xf32> to vector<2x12x8x64xf32>
    %43 = vector.extract_strided_slice %42 {offsets = [0, 0, 0, 0], sizes = [2, 4, 8, 64], strides = [1, 1, 1, 1]} : vector<2x12x8x64xf32> to vector<2x4x8x64xf32>
    %44 = vector.shape_cast %43 : vector<2x4x8x64xf32> to vector<8x8x64xf32>
    %45 = tpu.transpose %44, [0, 2, 1] : vector<8x8x64xf32> -> vector<8x64x8xf32>
    %46 = arith.truncf %45 : vector<8x64x8xf32> to vector<8x64x8xbf16>
    %47 = vector.extract_strided_slice %42 {offsets = [0, 4, 0, 0], sizes = [2, 4, 8, 64], strides = [1, 1, 1, 1]} : vector<2x12x8x64xf32> to vector<2x4x8x64xf32>
    %48 = vector.shape_cast %47 : vector<2x4x8x64xf32> to vector<8x8x64xf32>
    %49 = tpu.transpose %48, [0, 2, 1] : vector<8x8x64xf32> -> vector<8x64x8xf32>
    %50 = arith.truncf %49 : vector<8x64x8xf32> to vector<8x64x8xbf16>
    %51 = vector.extract_strided_slice %42 {offsets = [0, 8, 0, 0], sizes = [2, 4, 8, 64], strides = [1, 1, 1, 1]} : vector<2x12x8x64xf32> to vector<2x4x8x64xf32>
    %52 = vector.shape_cast %51 : vector<2x4x8x64xf32> to vector<8x8x64xf32>
    %53 = tpu.transpose %52, [0, 2, 1] : vector<8x8x64xf32> -> vector<8x64x8xf32>
    %54 = arith.truncf %53 : vector<8x64x8xf32> to vector<8x64x8xbf16>
    "tpu.trace_start"() <{level = 10 : i32, message = "bnd,bmd->bnm"}> : () -> ()
    %cst_15 = arith.constant dense<0.000000e+00> : vector<8x64x64xf32>
    %55 = tpu.matmul %46, %50, %cst_15 {dimension_numbers = #tpu.dot_dimension_numbers<[2], [2], [1], [1], [0, 0, 0, 1, 1, 1], [0], [0]>} : vector<8x64x8xbf16>, vector<8x64x8xbf16>, vector<8x64x64xf32> -> vector<8x64x64xf32>
    "tpu.trace_stop"() : () -> ()
    %56 = vector.shape_cast %55 : vector<8x64x64xf32> to vector<2x4x64x64xf32>
    %c0_16 = arith.constant 0 : index
    %c0_17 = arith.constant 0 : index
    %c0_18 = arith.constant 0 : index
    %57 = vector.load %arg2[%c0_16, %c0_17, %c0_18] : memref<4x64x64xf32, #tpu.memory_space<vmem>>, vector<4x64x64xf32>
    %58 = vector.shape_cast %57 : vector<4x64x64xf32> to vector<1x4x64x64xf32>
    %59 = vector.broadcast %58 : vector<1x4x64x64xf32> to vector<2x4x64x64xf32>
    %60 = arith.addf %56, %59 : vector<2x4x64x64xf32>
    %cst_19 = arith.constant dense<0xFF800000> : vector<2x4x64xf32>
    %61 = vector.multi_reduction <maximumf>, %60, %cst_19 [3] : vector<2x4x64x64xf32> to vector<2x4x64xf32>
    %62 = vector.shape_cast %61 : vector<2x4x64xf32> to vector<2x4x64x1xf32>
    %63 = vector.broadcast %62 : vector<2x4x64x1xf32> to vector<2x4x64x64xf32>
    %64 = arith.subf %60, %63 : vector<2x4x64x64xf32>
    %65 = math.exp %64 : vector<2x4x64x64xf32>
    %cst_20 = arith.constant dense<0.000000e+00> : vector<2x4x64xf32>
    %66 = vector.multi_reduction <add>, %65, %cst_20 [3] : vector<2x4x64x64xf32> to vector<2x4x64xf32>
    %67 = vector.shape_cast %66 : vector<2x4x64xf32> to vector<2x4x64x1xf32>
    %68 = tpu.reciprocal %67 {approx = true} : vector<2x4x64x1xf32> -> vector<2x4x64x1xf32>
    %69 = vector.broadcast %68 : vector<2x4x64x1xf32> to vector<2x4x64x64xf32>
    %70 = arith.mulf %65, %69 : vector<2x4x64x64xf32>
    %71 = vector.shape_cast %70 : vector<2x4x64x64xf32> to vector<8x64x64xf32>
    %72 = arith.truncf %71 : vector<8x64x64xf32> to vector<8x64x64xbf16>
    "tpu.trace_start"() <{level = 10 : i32, message = "bnm,bmd->bnd"}> : () -> ()
    %cst_21 = arith.constant dense<0.000000e+00> : vector<8x64x8xf32>
    %73 = tpu.matmul %72, %54, %cst_21 {dimension_numbers = #tpu.dot_dimension_numbers<[2], [1], [1], [2], [0, 0, 0, 1, 1, 2], [0], [0]>} : vector<8x64x64xbf16>, vector<8x64x8xbf16>, vector<8x64x8xf32> -> vector<8x64x8xf32>
    "tpu.trace_stop"() : () -> ()
    %74 = tpu.transpose %73, [0, 2, 1] : vector<8x64x8xf32> -> vector<8x8x64xf32>
    %75 = vector.shape_cast %74 : vector<8x8x64xf32> to vector<2x32x64xf32>
    %76 = tpu.transpose %75, [0, 2, 1] : vector<2x32x64xf32> -> vector<2x64x32xf32>
    %77 = vector.shape_cast %76 : vector<2x64x32xf32> to vector<128x32xf32>
    %78 = arith.truncf %77 : vector<128x32xf32> to vector<128x32xbf16>
    %c0_22 = arith.constant 0 : index
    %c0_23 = arith.constant 0 : index
    %79 = vector.load %arg7[%c0_22, %c0_23] : memref<32x32xbf16, #tpu.memory_space<vmem>>, vector<32x32xbf16>
    %cst_24 = arith.constant dense<0.000000e+00> : vector<128x32xf32>
    %80 = tpu.matmul %78, %79, %cst_24 {dimension_numbers = #tpu.dot_dimension_numbers<[1], [0], [0], [1], [0, 0, 1, 1], [], []>} : vector<128x32xbf16>, vector<32x32xbf16>, vector<128x32xf32> -> vector<128x32xf32>
    %c0_25 = arith.constant 0 : index
    %c0_26 = arith.constant 0 : index
    %81 = vector.load %arg8[%c0_25, %c0_26] : memref<1x32xf32, #tpu.memory_space<vmem>>, vector<1x32xf32>
    %82 = vector.shape_cast %81 : vector<1x32xf32> to vector<32xf32>
    %83 = vector.shape_cast %82 : vector<32xf32> to vector<1x32xf32>
    %84 = vector.broadcast %83 : vector<1x32xf32> to vector<128x32xf32>
    %85 = arith.addf %80, %84 : vector<128x32xf32>
    %86 = arith.addf %3, %85 : vector<128x32xf32>
    %c0_27 = arith.constant 0 : index
    %c0_28 = arith.constant 0 : index
    %87 = vector.load %arg9[%c0_27, %c0_28] : memref<1x32xf32, #tpu.memory_space<vmem>>, vector<1x32xf32>
    %88 = vector.shape_cast %87 : vector<1x32xf32> to vector<32xf32>
    %c0_29 = arith.constant 0 : index
    %c0_30 = arith.constant 0 : index
    %89 = vector.load %arg10[%c0_29, %c0_30] : memref<1x32xf32, #tpu.memory_space<vmem>>, vector<1x32xf32>
    %90 = vector.shape_cast %89 : vector<1x32xf32> to vector<32xf32>
    %cst_31 = arith.constant dense<0.000000e+00> : vector<128xf32>
    %91 = vector.multi_reduction <add>, %86, %cst_31 [1] : vector<128x32xf32> to vector<128xf32>
    %92 = vector.shape_cast %91 : vector<128xf32> to vector<128x1xf32>
    %cst_32 = arith.constant 3.200000e+01 : f32
    %93 = vector.broadcast %cst_32 : f32 to vector<128x1xf32>
    %94 = arith.divf %92, %93 : vector<128x1xf32>
    %95 = vector.broadcast %94 : vector<128x1xf32> to vector<128x32xf32>
    %96 = arith.subf %86, %95 : vector<128x32xf32>
    %97 = arith.mulf %96, %96 : vector<128x32xf32>
    %cst_33 = arith.constant dense<0.000000e+00> : vector<128xf32>
    %98 = vector.multi_reduction <add>, %97, %cst_33 [1] : vector<128x32xf32> to vector<128xf32>
    %99 = vector.shape_cast %98 : vector<128xf32> to vector<128x1xf32>
    %cst_34 = arith.constant 3.200000e+01 : f32
    %100 = vector.broadcast %cst_34 : f32 to vector<128x1xf32>
    %101 = arith.divf %99, %100 : vector<128x1xf32>
    %102 = vector.broadcast %94 : vector<128x1xf32> to vector<128x32xf32>
    %103 = arith.subf %86, %102 : vector<128x32xf32>
    %cst_35 = arith.constant 9.99999974E-6 : f32
    %104 = vector.broadcast %cst_35 : f32 to vector<128x1xf32>
    %105 = arith.addf %101, %104 : vector<128x1xf32>
    %106 = math.rsqrt %105 : vector<128x1xf32>
    %107 = vector.broadcast %106 : vector<128x1xf32> to vector<128x32xf32>
    %108 = arith.mulf %103, %107 : vector<128x32xf32>
    %109 = vector.shape_cast %88 : vector<32xf32> to vector<1x32xf32>
    %110 = vector.broadcast %109 : vector<1x32xf32> to vector<128x32xf32>
    %111 = arith.mulf %108, %110 : vector<128x32xf32>
    %112 = vector.shape_cast %90 : vector<32xf32> to vector<1x32xf32>
    %113 = vector.broadcast %112 : vector<1x32xf32> to vector<128x32xf32>
    %114 = arith.addf %111, %113 : vector<128x32xf32>
    %115 = arith.truncf %114 : vector<128x32xf32> to vector<128x32xbf16>
    %c0_36 = arith.constant 0 : index
    %c0_37 = arith.constant 0 : index
    %116 = vector.load %arg11[%c0_36, %c0_37] : memref<32x128xbf16, #tpu.memory_space<vmem>>, vector<32x128xbf16>
    %cst_38 = arith.constant dense<0.000000e+00> : vector<128x128xf32>
    %117 = tpu.matmul %115, %116, %cst_38 {dimension_numbers = #tpu.dot_dimension_numbers<[1], [0], [0], [1], [0, 0, 1, 1], [], []>} : vector<128x32xbf16>, vector<32x128xbf16>, vector<128x128xf32> -> vector<128x128xf32>
    %c0_39 = arith.constant 0 : index
    %c0_40 = arith.constant 0 : index
    %118 = vector.load %arg12[%c0_39, %c0_40] : memref<1x128xf32, #tpu.memory_space<vmem>>, vector<1x128xf32>
    %119 = vector.shape_cast %118 : vector<1x128xf32> to vector<128xf32>
    %120 = vector.shape_cast %119 : vector<128xf32> to vector<1x128xf32>
    %121 = vector.broadcast %120 : vector<1x128xf32> to vector<128x128xf32>
    %122 = arith.addf %117, %121 : vector<128x128xf32>
    %123 = arith.negf %122 : vector<128x128xf32>
    %124 = math.exp %123 : vector<128x128xf32>
    %cst_41 = arith.constant 1.000000e+00 : f32
    %125 = vector.broadcast %cst_41 : f32 to vector<128x128xf32>
    %126 = arith.addf %125, %124 : vector<128x128xf32>
    %127 = arith.divf %125, %126 : vector<128x128xf32>
    %128 = arith.mulf %122, %127 : vector<128x128xf32>
    %129 = arith.truncf %128 : vector<128x128xf32> to vector<128x128xbf16>
    %c0_42 = arith.constant 0 : index
    %c0_43 = arith.constant 0 : index
    %130 = vector.load %arg13[%c0_42, %c0_43] : memref<128x32xbf16, #tpu.memory_space<vmem>>, vector<128x32xbf16>
    %cst_44 = arith.constant dense<0.000000e+00> : vector<128x32xf32>
    %131 = tpu.matmul %129, %130, %cst_44 {dimension_numbers = #tpu.dot_dimension_numbers<[1], [0], [0], [1], [0, 0, 1, 1], [], []>} : vector<128x128xbf16>, vector<128x32xbf16>, vector<128x32xf32> -> vector<128x32xf32>
    %c0_45 = arith.constant 0 : index
    %c0_46 = arith.constant 0 : index
    %132 = vector.load %arg14[%c0_45, %c0_46] : memref<1x32xf32, #tpu.memory_space<vmem>>, vector<1x32xf32>
    %133 = vector.shape_cast %132 : vector<1x32xf32> to vector<32xf32>
    %134 = vector.shape_cast %133 : vector<32xf32> to vector<1x32xf32>
    %135 = vector.broadcast %134 : vector<1x32xf32> to vector<128x32xf32>
    %136 = arith.addf %131, %135 : vector<128x32xf32>
    %137 = arith.addf %86, %136 : vector<128x32xf32>
    %138 = vector.shape_cast %137 : vector<128x32xf32> to vector<2x8x8x32xf32>
    %139 = tpu.transpose %138, [1, 0, 2, 3] : vector<2x8x8x32xf32> -> vector<8x2x8x32xf32>
    %140 = vector.shape_cast %139 : vector<8x2x8x32xf32> to vector<8x16x32xf32>
    %c0_47 = arith.constant 0 : index
    %c0_48 = arith.constant 0 : index
    %c0_49 = arith.constant 0 : index
    %141 = vector.load %arg15[%c0_47, %c0_48, %c0_49] : memref<8x16x32xf32, #tpu.memory_space<vmem>>, vector<8x16x32xf32>
    tpu.vector_store %arg15[%c0_47, %c0_48, %c0_49], %140 {strides = array<i32>} : memref<8x16x32xf32, #tpu.memory_space<vmem>>, vector<8x16x32xf32>,
    return
  }
  func.func @transform_0(%arg0: i32) -> (i32, i32, i32) {
    %c0_i32 = arith.constant 0 : i32
    %c0_i32_0 = arith.constant 0 : i32
    %c0_i32_1 = arith.constant 0 : i32
    return %arg0, %c0_i32, %c0_i32_0 : i32, i32, i32
  }
  func.func @transform_1(%arg0: i32) -> (i32, i32, i32) {
    %c0_i32 = arith.constant 0 : i32
    %c0_i32_0 = arith.constant 0 : i32
    %c0_i32_1 = arith.constant 0 : i32
    %c0_i32_2 = arith.constant 0 : i32
    return %c0_i32, %c0_i32_0, %c0_i32_1 : i32, i32, i32
  }
  func.func @transform_2(%arg0: i32) -> (i32, i32) {
    %c0_i32 = arith.constant 0 : i32
    %c0_i32_0 = arith.constant 0 : i32
    %c0_i32_1 = arith.constant 0 : i32
    return %c0_i32, %c0_i32_0 : i32, i32
  }
  func.func @transform_3(%arg0: i32) -> (i32, i32) {
    %c0_i32 = arith.constant 0 : i32
    %c0_i32_0 = arith.constant 0 : i32
    %c0_i32_1 = arith.constant 0 : i32
    return %c0_i32, %c0_i32_0 : i32, i32
  }
  func.func @transform_4(%arg0: i32) -> (i32, i32) {
    %c0_i32 = arith.constant 0 : i32
    %c0_i32_0 = arith.constant 0 : i32
    %c0_i32_1 = arith.constant 0 : i32
    return %c0_i32, %c0_i32_0 : i32, i32
  }
  func.func @transform_5(%arg0: i32) -> (i32, i32) {
    %c0_i32 = arith.constant 0 : i32
    %c0_i32_0 = arith.constant 0 : i32
    %c0_i32_1 = arith.constant 0 : i32
    return %c0_i32, %c0_i32_0 : i32, i32
  }
  func.func @transform_6(%arg0: i32) -> (i32, i32) {
    %c0_i32 = arith.constant 0 : i32
    %c0_i32_0 = arith.constant 0 : i32
    %c0_i32_1 = arith.constant 0 : i32
    return %c0_i32, %c0_i32_0 : i32, i32
  }
  func.func @transform_7(%arg0: i32) -> (i32, i32) {
    %c0_i32 = arith.constant 0 : i32
    %c0_i32_0 = arith.constant 0 : i32
    %c0_i32_1 = arith.constant 0 : i32
    return %c0_i32, %c0_i32_0 : i32, i32
  }
  func.func @transform_8(%arg0: i32) -> (i32, i32) {
    %c0_i32 = arith.constant 0 : i32
    %c0_i32_0 = arith.constant 0 : i32
    %c0_i32_1 = arith.constant 0 : i32
    return %c0_i32, %c0_i32_0 : i32, i32
  }
  func.func @transform_9(%arg0: i32) -> (i32, i32) {
    %c0_i32 = arith.constant 0 : i32
    %c0_i32_0 = arith.constant 0 : i32
    %c0_i32_1 = arith.constant 0 : i32
    return %c0_i32, %c0_i32_0 : i32, i32
  }
  func.func @transform_10(%arg0: i32) -> (i32, i32) {
    %c0_i32 = arith.constant 0 : i32
    %c0_i32_0 = arith.constant 0 : i32
    %c0_i32_1 = arith.constant 0 : i32
    return %c0_i32, %c0_i32_0 : i32, i32
  }
  func.func @transform_11(%arg0: i32) -> (i32, i32) {
    %c0_i32 = arith.constant 0 : i32
    %c0_i32_0 = arith.constant 0 : i32
    %c0_i32_1 = arith.constant 0 : i32
    return %c0_i32, %c0_i32_0 : i32, i32
  }
  func.func @transform_12(%arg0: i32) -> (i32, i32) {
    %c0_i32 = arith.constant 0 : i32
    %c0_i32_0 = arith.constant 0 : i32
    %c0_i32_1 = arith.constant 0 : i32
    return %c0_i32, %c0_i32_0 : i32, i32
  }
  func.func @transform_13(%arg0: i32) -> (i32, i32) {
    %c0_i32 = arith.constant 0 : i32
    %c0_i32_0 = arith.constant 0 : i32
    %c0_i32_1 = arith.constant 0 : i32
    return %c0_i32, %c0_i32_0 : i32, i32
  }
  func.func @transform_14(%arg0: i32) -> (i32, i32, i32) {
    %c0_i32 = arith.constant 0 : i32
    %c0_i32_0 = arith.constant 0 : i32
    %c0_i32_1 = arith.constant 0 : i32
    return %arg0, %c0_i32, %c0_i32_0 : i32, i32, i32
  }
}

</mosaic_0001>

<bundles_post_ra>
// kernel: tpu_custom_call.1
= control target key start
LH: loop header
LB: loop body
LE: loop exit
PB: predicated region body
PF: predicated region fallthrough
CT: control target
= control target key end

     0   :  { %s9579_s0 = inlined_call_operand.hbm [shape: f32[32,16,32], index: 0, kind: input, shape index: {}]   ;;  %s9580_s1 = inlined_call_operand.hbm [shape: f32[4,64,64], index: 1, kind: input, shape index: {}]   ;;  %s9581_s2 = inlined_call_operand.vmem [shape: f32[1,32], index: 2, kind: input, shape index: {}]   ;;  %s9582_s3 = inlined_call_operand.vmem [shape: f32[1,32], index: 3, kind: input, shape index: {}]   ;;  %s9583_s4 = inlined_call_operand.vmem [shape: bf16[32,96], index: 4, kind: input, shape index: {}]   ;;  %s9584_s5 = inlined_call_operand.vmem [shape: f32[1,96], index: 5, kind: input, shape index: {}]   ;;  %s9585_s6 = inlined_call_operand.vmem [shape: bf16[32,32], index: 6, kind: input, shape index: {}]   ;;  %s9586_s7 = inlined_call_operand.vmem [shape: f32[1,32], index: 7, kind: input, shape index: {}]   ;;  %s9587_s8 = inlined_call_operand.vmem [shape: f32[1,32], index: 8, kind: input, shape index: {}]   ;;  %s9588_s9 = inlined_call_operand.vmem [shape: f32[1,32], index: 9, kind: input, shape index: {}]   ;;  %s9589_s10 = inlined_call_operand.vmem [shape: bf16[32,128], index: 10, kind: input, shape index: {}]   ;;  %s9590_s11 = inlined_call_operand.vmem [shape: f32[1,128], index: 11, kind: input, shape index: {}]   ;;  %s9591_s12 = inlined_call_operand.vmem [shape: bf16[128,32], index: 12, kind: input, shape index: {}]   ;;  %s9592_s13 = inlined_call_operand.vmem [shape: f32[1,32], index: 13, kind: input, shape index: {}]   ;;  %s9593_s14 = inlined_call_operand.hbm [shape: f32[32,16,32], index: 14, kind: output, shape index: {}]  }
   0x1   :  { %9669 = sst [smem:[#allocation58_spill]] %s9580_s1 }
   0x2   :  { %9670 = sst [smem:[#allocation59_spill]] %s9590_s11 }
   0x3   :  { %9671 = sst [smem:[#allocation60_spill]] %s9591_s12 }
   0x4   :  { %9672 = sst [smem:[#allocation61_spill]] %s9592_s13 }
   0x5   :  { %9673 = sst [smem:[#allocation62_spill]] %s9593_s14 }
   0x6   :  { %19 = vsyncpa [#allocation3], 0 }
   0x7   :  { %21 = vsyncpa [#allocation3 + $0x1], 0 }
   0x8   :  { %22 = vsyncpa [#allocation6], 0 }
   0x9   :  { %23 = vsyncpa [#allocation4], 0 }
   0xa   :  { %25 = vsyncpa [#allocation4 + $0x1], 0  ;;  %s7379_s29 = smov 0   ;;  %s7381_s30 = smov 0  }
   0xb   :  { %s7383_s15 = smov 0   ;;  %s7385_s16 = smov 0  }
   0xc LB: > { %9674 = sst [smem:[#allocation11_spill]] %s7283_s29  ;;  %s7400_s17 = sadd.s32 4294967295, %s7295_s16   ;;  %s7295_s16 = sphi %s7385_s16, %s9825_s16   ;;  %s7291_s15 = sphi %s7383_s15, %s9828_s15   ;;  %s7287_s30 = sphi %s7381_s30, %s9827_s30   ;;  %s7283_s29 = sphi %s7379_s29, %s9826_s29  }
   0xd   : > { %s5331_s18 = sadd.s32 4294967294, %s7295_s16   ;;  %p51_p0 = scmp.ne.s32.totalorder %s7287_s30, %s7283_s29 }
   0xe   : > { %p9601_p1 = scmp.eq.s32.totalorder %s7400_s17, 0  ;;  %p354_p3 = scmp.eq.s32.totalorder %s5331_s18, 3 }
   0xf   : > { %p5332_p5 = scmp.ge.s32.totalorder %s7295_s16, 1  ;;  %p361_p7 = scmp.lt.s32.totalorder %s7295_s16, 5 }
  0x10   : > { %p7409_p4 = por %p9601_p1, %p51_p0  ;;  %p7414_p6 = por %p354_p3, %p51_p0 }
  0x11   : > { %p7419_p8 = pnand %p5332_p5, %p361_p7  ;;  %s7297_s22 = smov [#allocation5]  }
  0x12   : > { %s9675_s19 = scalar_select %p7409_p4, 1, 0 }
  0x13   : > { %s9676_s20 = scalar_select %p7414_p6, 1, 0 }
  0x14   : > { %s9678_s21 = scalar_select %p7419_p8, 1, 0 }
  0x15   : > { %9677 = sst [smem:[#allocation12_spill]] %s9676_s20  ;;  %s373_s23 = sshll.u32 %s7297_s22, 4  ;;  %s374_s23 = int_to_ptr.vmem [resolvable:$true] %s373_s23 }
  0x16   : > { %p6041_p9 = pneg %p7419_p8  ;;  %s7432_s25 = sadd.s32 1, %s7295_s16  }
  0x17   : > { %9680 = sst [smem:[#allocation13_spill]] %s7432_s25  ;;  %s38_s26 = sadd.s32 1, %s7291_s15 }
  0x18   : > { %p7427_p10 = pnand %p6041_p9, %p9601_p1  ;;  %s35_s27 = ssub.s32 %s7295_s16, %s7432_s25 }
  0x19   : > { %s7184_s28 = scalar_lea.vmem %s374_s23, 4096  ;;  %p7192_p3 = scmp.lt.s32.totalorder %s374_s23, %s374_s23 }
  0x1a   : > { %p7175_p11 = pneg %p7427_p10  ;;  %p7185_p12 = scmp.ne.s32.totalorder %s374_s23, %s7184_s28 }
  0x1b   : > { %p7193_p5 = scmp.lt.s32.totalorder %s7184_s28, %s7184_s28 }
  0x1c   : > { %p7187_p13 = pnand %p7185_p12, %p7175_p11 }
  0x1d   : > { %p7194_p7 = por %p7193_p5, %p7192_p3 }
  0x1e   : > { %p7188_p0 = pneg %p7187_p13 }
  0x20   : > { %p7195_p2 = pnand %p7194_p7, %p7188_p0 }
  0x22   : > { %7198 = shalt.err (!%p7195_p2)
}
  0x23   : > { %s9600_s18 = smov 128   ;;  %s9602_s22 = smov 8  }
  0x24   : > { %s9681_s1 = sld [smem:[#allocation58_spill]]  ;;  %p36_p2 = scmp.eq.s32.totalorder %s35_s27, 0 }
  0x25   : > { %p45_p9 = scmp.ne.s32.totalorder %s7291_s15, %s7287_s30  ;;  %p46_p11 = scmp.eq.s32.totalorder %s7295_s16, 0 }
  0x26   : > { %p6054_p12 = scmp.lt.s32.totalorder %s7295_s16, 4  ;;  %p9682_p0 = scmp.eq.s32.totalorder %s7400_s17, 3 }
  0x27   : > { %s7452_s20 = scalar_select %p36_p2, %s7291_s15, %s38_s26  }
  0x28   : > { %p47_p13 = por %p46_p11, %p45_p9  ;;  %p7456_p3 = por %p9682_p0, %p45_p9 }
  0x29   : > { %s423_s24 = sand.u32 1, %s7291_s15   ;;  %s5476_s14 = sshll.u32 %s7295_s16, 11 }
  0x2a   : > { %6044 = dma.hbm_to_vmem [thread:$0]  (!%p7427_p10), %s9681_s1, 4096, %s374_s23, [#allocation6], %s9600_s18, %s9600_s18, %s9602_s22  }
  0x2b   : > { %s9683_s29 = scalar_select %p7456_p3, 1, 0 }
  0x2c   : > { %s5335_s13 = sshll.u32 %s423_s24, 7  ;;  %s7465_s25 = scalar_lea.hbm %s9579_s0, %s5476_s14 }
  0x2d   : > { %s427_s23 = scalar_lea.vmem [#allocation2], %s5335_s13  ;;  %p7467_p10 = pnand %p6054_p12, %p47_p13 }
  0x2e   : > { %s435_s26 = sshll.u32 %s427_s23, 4  ;;  %s7473_s28 = scalar_lea.sflag [#allocation3], %s423_s24  ;;  %s7471_s26 = int_to_ptr.vmem [resolvable:$true] %s435_s26 }
  0x2f   : > { %s7199_s18 = scalar_lea.hbm %s7465_s25, 2048  ;;  %p7201_p7 = pneg %p7467_p10 }
  0x30   : > { %p7200_p5 = scmp.ne.s32.totalorder %s7465_s25, %s7199_s18  ;;  %s7204_s13 = scalar_lea.hbm %s9579_s0, 8192 }
  0x31   : > { %p7205_p11 = scmp.lt.s32.totalorder %s7465_s25, %s9579_s0  ;;  %p7206_p12 = scmp.lt.s32.totalorder %s7204_s13, %s7199_s18 }
  0x32   : > { %p7202_p2 = pnand %p7201_p7, %p7200_p5 }
  0x33   : > { %p7207_p13 = por %p7206_p12, %p7205_p11 }
  0x34   : > { %p7203_p9 = pneg %p7202_p2 }
  0x36   : > { %p7208_p0 = pnand %p7207_p13, %p7203_p9 }
  0x38   : > { %7211 = shalt.err (!%p7208_p0)
}
  0x39   : > { %s7212_s24 = scalar_lea.vmem %s7471_s26, 2048  ;;  %s7300_s22 = smov [#allocation2]  }
  0x3a   : > { %p7213_p1 = scmp.ne.s32.totalorder %s7471_s26, %s7212_s24  ;;  %s7217_s1 = sshll.u32 %s7300_s22, 4  ;;  %s7218_s1 = int_to_ptr.vmem [resolvable:$false] %s7217_s1 }
  0x3b   : > { %s7219_s11 = scalar_lea.vmem %s7218_s1, 4096  ;;  %p7220_p2 = scmp.lt.s32.totalorder %s7471_s26, %s7218_s1 }
  0x3c   : > { %p7215_p6 = pnand %p7213_p1, %p7201_p7  ;;  %p7221_p3 = scmp.lt.s32.totalorder %s7219_s11, %s7212_s24 }
  0x3e   : > { %p7216_p5 = pneg %p7215_p6  ;;  %p7222_p4 = por %p7221_p3, %p7220_p2 }
  0x40   : > { %p7223_p8 = pnand %p7222_p4, %p7216_p5 }
  0x42   : > { %7226 = shalt.err (!%p7223_p8)
}
  0x43   : > { %s9685_s18 = smov 8   ;;  %s9686_s12 = smov 128  }
  0x44   : > { %6048 = dma.hbm_to_vmem [thread:$0]  (!%p7467_p10), %s7465_s25, 2048, %s7471_s26, %s7473_s28, %s9686_s12, %s9686_s12, %s9685_s18  }
  0x45   : > { %p9687_p1 = scmp.ne.s32.totalorder %s9678_s21, 0 }
  0x47   : > { %447 = sbr.rel (%p9687_p1) target bundleno = 3200 (0xc80), region = 76 }
  0x4c   : > { %s7500_s22 = sand.u32 1, %s7287_s30   ;;  %p9688_p4 = scmp.ne.s32.totalorder %s9675_s19, 0 }
  0x4d   : > { %s5340_s1 = sshll.u32 %s7500_s22, 7  ;;  %s450_s13 = scalar_lea.sflag [#allocation3], %s7500_s22 }
  0x4e   : > { %s7506_s27 = scalar_lea.vmem [#allocation2], %s5340_s1 }
  0x4f   : > { %7270 = dma.done.wait (%p9688_p4), %s450_s13, 2048  }
  0x50   : > { %7272 = vsyncadd (%p9688_p4), %s450_s13, 4294965248  ;;  %p9689_p6 = scmp.eq.s32.totalorder %s7400_s17, 0 }
  0x52   : > { %7274 = dma.done.wait (%p9689_p6), [#allocation6], 4096   ;;  %p9690_p8 = pmov %p9689_p6 }
  0x53   : > { %vm523_vm0 = vcmask 261120   ;;  %v505_v0 = vld [vmem:[%s7506_s27] sm:$0xff]  ;;  %v507_v2 = vld [vmem:[%s7506_s27 + $0x10] sm:$0xff]  ;;  %v7545_v16 = vld [vmem:[%s7506_s27 + $0x8] sm:$0xff]  ;;  %vm1857_vm1 = vcmask 64512   ;;  %vm2666_vm2 = vcmask 523264  }
  0x54   : > { %7276 = vsyncadd (%p9690_p8), [#allocation6], 4294963200  ;;  %v509_v1 = vld [vmem:[%s7506_s27 + $0x20] sm:$0xff]  ;;  %v524_v3 = vsel %vm523_vm0, %v505_v0, 0.0  ;;  %v511_v5 = vld [vmem:[%s7506_s27 + $0x30] sm:$0xff]  ;;  %v527_v8 = vsel %vm523_vm0, %v507_v2, 0.0 }
  0x55   : > { %v530_v4 = vsel %vm523_vm0, %v509_v1, 0.0  ;;  %525 = vadd.xlane.f32.xlu0 %v524_v3  ;;  %v7523_v6 = vld [vmem:[%s7506_s27 + $0x40] sm:$0xff]  ;;  %v7526_v7 = vld [vmem:[%s7506_s27 + $0x50] sm:$0xff]  ;;  %v533_v9 = vsel %vm523_vm0, %v511_v5, 0.0  ;;  %v7548_v17 = vld [vmem:[%s7506_s27 + $0x18] sm:$0xff]  ;;  %v548_v18 = vsel %vm523_vm0, %v7545_v16, 0.0 }
  0x56   : > { %531 = vadd.xlane.f32.xlu1 %v530_v4  ;;  %v7531_v10 = vld [vmem:[%s7506_s27 + $0x60] sm:$0xff]  ;;  %v7534_v11 = vld [vmem:[%s7506_s27 + $0x70] sm:$0xff]  ;;  %v536_v12 = vsel %vm523_vm0, %v7523_v6, 0.0  ;;  %v539_v13 = vsel %vm523_vm0, %v7526_v7, 0.0  ;;  %v551_v19 = vsel %vm523_vm0, %v7548_v17, 0.0  ;;  %v7555_v20 = vld [vmem:[%s7506_s27 + $0x28] sm:$0xff] }
  0x57   : > { %v542_v14 = vsel %vm523_vm0, %v7531_v10, 0.0  ;;  %v545_v15 = vsel %vm523_vm0, %v7534_v11, 0.0  ;;  %v7558_v21 = vld [vmem:[%s7506_s27 + $0x38] sm:$0xff]  ;;  %v554_v22 = vsel %vm523_vm0, %v7555_v20, 0.0  ;;  %v7565_v24 = vld [vmem:[%s7506_s27 + $0x48] sm:$0xff]  ;;  %s9817_s21 = sld [smem:[#allocation60_spill]] }
  0x58   : > { %v557_v23 = vsel %vm523_vm0, %v7558_v21, 0.0  ;;  %v7568_v25 = vld [vmem:[%s7506_s27 + $0x58] sm:$0xff]  ;;  %v560_v26 = vsel %vm523_vm0, %v7565_v24, 0.0  ;;  %v7575_v28 = vld [vmem:[%s7506_s27 + $0x68] sm:$0xff]  ;;  %s9818_s14 = sld [smem:[#allocation59_spill]]  ;;  %s9467_s18 = scalar_lea.vmem [#allocation7], %s5340_s1 }
  0x59   : > { %528 = vadd.xlane.f32.xlu0 %v527_v8  ;;  %v563_v27 = vsel %vm523_vm0, %v7568_v25, 0.0  ;;  %v7578_v29 = vld [vmem:[%s7506_s27 + $0x78] sm:$0xff]  ;;  %v566_v30 = vsel %vm523_vm0, %v7575_v28, 0.0  ;;  %s9819_s11 = sld [smem:[#allocation61_spill]]  ;;  %s5478_s1 = sshll.u32 %s7400_s17, 11 }
  0x5a   : > { %534 = vadd.xlane.f32.xlu1 %v533_v9  ;;  %v569_v31 = vsel %vm523_vm0, %v7578_v29, 0.0  ;;  %s5248_s12 = sshll.u32 %s9467_s18, 4  ;;  %s9820_s25 = sld [smem:[#allocation62_spill]]  ;;  %s9532_s12 = int_to_ptr.vmem [resolvable:$true] %s5248_s12 }
  0x5b   : > { %s5234_s17 = scalar_lea.sflag [#allocation4], %s7500_s22  ;;  %p9821_p10 = scmp.ne.s32.totalorder %s9683_s29, 0 }
  0x5c   : > { %s7301_s28 = smov [#allocation7]  }
  0x5d   : > { %537 = vadd.xlane.f32.xlu0 %v536_v12 }
  0x5e   : > { %540 = vadd.xlane.f32.xlu1 %v539_v13 }
  0x60   : > { %s9530_s26 = scalar_lea.hbm %s9820_s25, %s5478_s1 }
  0x61   : > { %543 = vadd.xlane.f32.xlu0 %v542_v14 }
  0x62   : > { %546 = vadd.xlane.f32.xlu1 %v545_v15 }
  0x65   : > { %549 = vadd.xlane.f32.xlu0 %v548_v18 }
  0x66   : > { %552 = vadd.xlane.f32.xlu1 %v551_v19 }
  0x69   : > { %555 = vadd.xlane.f32.xlu0 %v554_v22 }
  0x6a   : > { %558 = vadd.xlane.f32.xlu1 %v557_v23 }
  0x6d   : > { %561 = vadd.xlane.f32.xlu0 %v560_v26 }
  0x6e   : > { %564 = vadd.xlane.f32.xlu1 %v563_v27 }
  0x71   : > { %567 = vadd.xlane.f32.xlu0 %v566_v30 }
  0x72   : > { %570 = vadd.xlane.f32.xlu1 %v569_v31 }
  0xde   : > { %v526_v32 = vpop.xlane.xlu0 %525 }
  0xdf   : > { %v532_v33 = vpop.xlane.xlu1 %531  ;;  %v573_v34 = vmul.f32 0.03125, %v526_v32 }
  0xe0   : > { %v575_v35 = vmul.f32 0.03125, %v532_v33 }
  0xe1   : > { %v7584_v36 = vsub.f32 %v505_v0, %v573_v34 }
  0xe2   : > { %v7586_v37 = vsub.f32 %v509_v1, %v575_v35  ;;  %v529_v38 = vpop.xlane.xlu0 %528 }
  0xe3   : > { %v535_v39 = vpop.xlane.xlu1 %534  ;;  %v574_v40 = vmul.f32 0.03125, %v529_v38  ;;  %v605_v42 = vmul.f32 %v7584_v36, %v7584_v36 }
  0xe4   : > { %v576_v41 = vmul.f32 0.03125, %v535_v39  ;;  %v607_v43 = vmul.f32 %v7586_v37, %v7586_v37 }
  0xe5   : > { %v7592_v44 = vsub.f32 %v507_v2, %v574_v40  ;;  %v621_v46 = vsel %vm523_vm0, %v605_v42, 0.0 }
  0xe6   : > { %v7594_v45 = vsub.f32 %v511_v5, %v576_v41  ;;  %622 = vadd.xlane.f32.xlu0 %v621_v46  ;;  %v538_v47 = vpop.xlane.xlu0 %537  ;;  %v627_v49 = vsel %vm523_vm0, %v607_v43, 0.0 }
  0xe7   : > { %v541_v48 = vpop.xlane.xlu1 %540  ;;  %v577_v50 = vmul.f32 0.03125, %v538_v47  ;;  %v606_v52 = vmul.f32 %v7592_v44, %v7592_v44 }
  0xe8   : > { %v578_v51 = vmul.f32 0.03125, %v541_v48  ;;  %v608_v53 = vmul.f32 %v7594_v45, %v7594_v45 }
  0xe9   : > { %v7603_v54 = vsub.f32 %v7523_v6, %v577_v50  ;;  %v624_v56 = vsel %vm523_vm0, %v606_v52, 0.0 }
  0xea   : > { %v7606_v55 = vsub.f32 %v7526_v7, %v578_v51  ;;  %628 = vadd.xlane.f32.xlu0 %v627_v49  ;;  %625 = vadd.xlane.f32.xlu1 %v624_v56  ;;  %v544_v57 = vpop.xlane.xlu0 %543  ;;  %v630_v59 = vsel %vm523_vm0, %v608_v53, 0.0  ;;  %v6760_v53 = vld [vmem:[%s9583_s4] sm:$0xff]  }
  0xeb   : > { %v547_v58 = vpop.xlane.xlu1 %546  ;;  %v579_v60 = vmul.f32 0.03125, %v544_v57  ;;  %v609_v62 = vmul.f32 %v7603_v54, %v7603_v54 }
  0xec   : > { %v580_v61 = vmul.f32 0.03125, %v547_v58  ;;  %v610_v63 = vmul.f32 %v7606_v55, %v7606_v55 }
  0xed   : > { %v7615_v0 = vsub.f32 %v7531_v10, %v579_v60  ;;  %v633_v2 = vsel %vm523_vm0, %v609_v62, 0.0 }
  0xee   : > { %v7618_v1 = vsub.f32 %v7534_v11, %v580_v61  ;;  %631 = vadd.xlane.f32.xlu1 %v630_v59  ;;  %634 = vadd.xlane.f32.xlu0 %v633_v2  ;;  %v550_v3 = vpop.xlane.xlu0 %549  ;;  %v636_v5 = vsel %vm523_vm0, %v610_v63, 0.0 }
  0xef   : > { %v553_v4 = vpop.xlane.xlu1 %552  ;;  %v581_v6 = vmul.f32 0.03125, %v550_v3  ;;  %v611_v8 = vmul.f32 %v7615_v0, %v7615_v0 }
  0xf0   : > { %v582_v7 = vmul.f32 0.03125, %v553_v4  ;;  %v612_v9 = vmul.f32 %v7618_v1, %v7618_v1 }
  0xf1   : > { %v7627_v10 = vsub.f32 %v7545_v16, %v581_v6  ;;  %v639_v12 = vsel %vm523_vm0, %v611_v8, 0.0 }
  0xf2   : > { %v7630_v11 = vsub.f32 %v7548_v17, %v582_v7  ;;  %637 = vadd.xlane.f32.xlu1 %v636_v5  ;;  %640 = vadd.xlane.f32.xlu0 %v639_v12  ;;  %v556_v13 = vpop.xlane.xlu0 %555  ;;  %v642_v15 = vsel %vm523_vm0, %v612_v9, 0.0 }
  0xf3   : > { %v559_v14 = vpop.xlane.xlu1 %558  ;;  %v583_v18 = vmul.f32 0.03125, %v556_v13  ;;  %v613_v22 = vmul.f32 %v7627_v10, %v7627_v10 }
  0xf4   : > { %v584_v19 = vmul.f32 0.03125, %v559_v14  ;;  %v614_v16 = vmul.f32 %v7630_v11, %v7630_v11 }
  0xf5   : > { %v7639_v23 = vsub.f32 %v7555_v20, %v583_v18  ;;  %v645_v26 = vsel %vm523_vm0, %v613_v22, 0.0 }
  0xf6   : > { %v7642_v17 = vsub.f32 %v7558_v21, %v584_v19  ;;  %643 = vadd.xlane.f32.xlu1 %v642_v15  ;;  %646 = vadd.xlane.f32.xlu0 %v645_v26  ;;  %v562_v27 = vpop.xlane.xlu0 %561  ;;  %v648_v31 = vsel %vm523_vm0, %v614_v16, 0.0 }
  0xf7   : > { %v565_v30 = vpop.xlane.xlu1 %564  ;;  %v585_v32 = vmul.f32 0.03125, %v562_v27  ;;  %v615_v34 = vmul.f32 %v7639_v23, %v7639_v23 }
  0xf8   : > { %v586_v33 = vmul.f32 0.03125, %v565_v30  ;;  %v616_v20 = vmul.f32 %v7642_v17, %v7642_v17 }
  0xf9   : > { %v7651_v35 = vsub.f32 %v7565_v24, %v585_v32  ;;  %v651_v38 = vsel %vm523_vm0, %v615_v34, 0.0  ;;  %v7685_v32 = vld [vmem:[%s9581_s2] ss:$0 sm:$0xff] }
  0xfa   : > { %v7654_v21 = vsub.f32 %v7568_v25, %v586_v33  ;;  %649 = vadd.xlane.f32.xlu1 %v648_v31  ;;  %652 = vadd.xlane.f32.xlu0 %v651_v38  ;;  %v568_v39 = vpop.xlane.xlu0 %567  ;;  %v654_v41 = vsel %vm523_vm0, %v616_v20, 0.0 }
  0xfb   : > { %v571_v40 = vpop.xlane.xlu1 %570  ;;  %v587_v42 = vmul.f32 0.03125, %v568_v39  ;;  %v617_v46 = vmul.f32 %v7651_v35, %v7651_v35 }
  0xfc   : > { %v588_v43 = vmul.f32 0.03125, %v571_v40  ;;  %v618_v24 = vmul.f32 %v7654_v21, %v7654_v21 }
  0xfd   : > { %v7663_v47 = vsub.f32 %v7575_v28, %v587_v42  ;;  %v657_v48 = vsel %vm523_vm0, %v617_v46, 0.0 }
  0xfe   : > { %v7666_v25 = vsub.f32 %v7578_v29, %v588_v43  ;;  %655 = vadd.xlane.f32.xlu1 %v654_v41  ;;  %658 = vadd.xlane.f32.xlu0 %v657_v48  ;;  %v660_v49 = vsel %vm523_vm0, %v618_v24, 0.0  ;;  %v6759_v29 = vld [vmem:[%s9583_s4 + $0x8] sm:$0xff]   ;;  %v7692_v24 = vld [vmem:[%s9582_s3] ss:$0 sm:$0xff] }
  0xff   : > { %v619_v50 = vmul.f32 %v7663_v47, %v7663_v47  ;;  %5653 = vmatprep.subr.bf16.mxu0 %v6759_v29 }
 0x100   : > { %v620_v51 = vmul.f32 %v7666_v25, %v7666_v25  ;;  %5654 = vmatpush3.bf16.msra.mxu0 %v6759_v29 }
 0x101   : > { %v663_v52 = vsel %vm523_vm0, %v619_v50, 0.0  ;;  %5655 = vmatprep.subr.bf16.mxu0 %v6760_v53 }
 0x102   : > { %661 = vadd.xlane.f32.xlu1 %v660_v49  ;;  %664 = vadd.xlane.f32.xlu0 %v663_v52  ;;  %v666_v28 = vsel %vm523_vm0, %v620_v51, 0.0 }
 0x104   : > { %5656 = vmatpush3.bf16.msra.mxu0 %v6760_v53 }
 0x106   : > { %667 = vadd.xlane.f32.xlu1 %v666_v28 }
 0x16f   : > { %v623_v56 = vpop.xlane.xlu0 %622 }
 0x170   : > { %v669_v57 = vmul.f32 0.03125, %v623_v56 }
 0x172   : > { %v685_v58 = vadd.f32 1e-05, %v669_v57 }
 0x173   : > { %v626_v59 = vpop.xlane.xlu1 %625  ;;  %v629_v60 = vpop.xlane.xlu0 %628 }
 0x174   : > { %6773 = vrsqrt.f32 %v685_v58  ;;  %v670_v61 = vmul.f32 0.03125, %v626_v59  ;;  %v671_v62 = vmul.f32 0.03125, %v629_v60 }
 0x176   : > { %v686_v63 = vadd.f32 1e-05, %v670_v61  ;;  %v687_v2 = vadd.f32 1e-05, %v671_v62 }
 0x177   : > { %v632_v3 = vpop.xlane.xlu1 %631  ;;  %v635_v4 = vpop.xlane.xlu0 %634 }
 0x178   : > { %6775 = vrsqrt.f32 %v686_v63  ;;  %v672_v5 = vmul.f32 0.03125, %v632_v3  ;;  %v673_v6 = vmul.f32 0.03125, %v635_v4 }
 0x179   : > { %6777 = vrsqrt.f32 %v687_v2 }
 0x17a   : > { %v688_v7 = vadd.f32 1e-05, %v672_v5  ;;  %v689_v8 = vadd.f32 1e-05, %v673_v6 }
 0x17b   : > { %v638_v9 = vpop.xlane.xlu1 %637  ;;  %v641_v12 = vpop.xlane.xlu0 %640 }
 0x17c   : > { %6779 = vrsqrt.f32 %v688_v7  ;;  %v674_v13 = vmul.f32 0.03125, %v638_v9  ;;  %v675_v14 = vmul.f32 0.03125, %v641_v12 }
 0x17d   : > { %6781 = vrsqrt.f32 %v689_v8 }
 0x17e   : > { %v690_v15 = vadd.f32 1e-05, %v674_v13  ;;  %v691_v18 = vadd.f32 1e-05, %v675_v14 }
 0x17f   : > { %v644_v19 = vpop.xlane.xlu1 %643  ;;  %v647_v22 = vpop.xlane.xlu0 %646 }
 0x180   : > { %6783 = vrsqrt.f32 %v690_v15  ;;  %v676_v16 = vmul.f32 0.03125, %v644_v19  ;;  %v677_v26 = vmul.f32 0.03125, %v647_v22 }
 0x181   : > { %v6774_v27 = vpop.eup %6773  ;;  %6785 = vrsqrt.f32 %v691_v18 }
 0x182   : > { %v692_v30 = vadd.f32 1e-05, %v676_v16  ;;  %v693_v31 = vadd.f32 1e-05, %v677_v26  ;;  %v717_v33 = vmul.f32 %v6774_v27, %v7584_v36 }
 0x183   : > { %v650_v34 = vpop.xlane.xlu1 %649  ;;  %v653_v20 = vpop.xlane.xlu0 %652 }
 0x184   : > { %6787 = vrsqrt.f32 %v692_v30  ;;  %v678_v38 = vmul.f32 0.03125, %v650_v34  ;;  %v679_v39 = vmul.f32 0.03125, %v653_v20  ;;  %v739_v41 = vmul.f32 %v7685_v32, %v717_v33 }
 0x185   : > { %v6776_v40 = vpop.eup %6775  ;;  %6789 = vrsqrt.f32 %v693_v31 }
 0x186   : > { %v6778_v42 = vpop.eup %6777  ;;  %v694_v43 = vadd.f32 1e-05, %v678_v38  ;;  %v695_v46 = vadd.f32 1e-05, %v679_v39  ;;  %v718_v48 = vmul.f32 %v6776_v40, %v7592_v44  ;;  %v761_v53 = vadd.f32 %v7692_v24, %v739_v41 }
 0x187   : > { %v656_v36 = vpop.xlane.xlu1 %655  ;;  %v659_v49 = vpop.xlane.xlu0 %658  ;;  %v719_v50 = vmul.f32 %v6778_v42, %v7586_v37 }
 0x188   : > { %6791 = vrsqrt.f32 %v694_v43  ;;  %v680_v51 = vmul.f32 0.03125, %v656_v36  ;;  %v681_v52 = vmul.f32 0.03125, %v659_v49  ;;  %v740_v28 = vmul.f32 %v7685_v32, %v718_v48 }
 0x189   : > { %v6780_v29 = vpop.eup %6779  ;;  %6793 = vrsqrt.f32 %v695_v46  ;;  %v741_v37 = vmul.f32 %v7685_v32, %v719_v50 }
 0x18a   : > { %v6782_v56 = vpop.eup %6781  ;;  %v696_v57 = vadd.f32 1e-05, %v680_v51  ;;  %v697_v58 = vadd.f32 1e-05, %v681_v52  ;;  %v762_v59 = vadd.f32 %v7692_v24, %v740_v28  ;;  %v720_v44 = vmul.f32 %v6780_v29, %v7594_v45 }
 0x18b   : > { %v662_v60 = vpop.xlane.xlu1 %661  ;;  %v665_v61 = vpop.xlane.xlu0 %664  ;;  %v721_v62 = vmul.f32 %v6782_v56, %v7603_v54  ;;  %v763_v54 = vadd.f32 %v7692_v24, %v741_v37 }
 0x18c   : > { %6795 = vrsqrt.f32 %v696_v57  ;;  %v682_v63 = vmul.f32 0.03125, %v662_v60  ;;  %v683_v2 = vmul.f32 0.03125, %v665_v61  ;;  %v777_v3 = vpack.c.bf16 %v762_v59, %v761_v53 }
 0x18d   : > { %v6784_v4 = vpop.eup %6783  ;;  %6797 = vrsqrt.f32 %v697_v58  ;;  %v742_v5 = vmul.f32 %v7685_v32, %v720_v44  ;;  %v743_v6 = vmul.f32 %v7685_v32, %v721_v62 }
 0x18e   : > { %v6786_v7 = vpop.eup %6785  ;;  %v698_v8 = vadd.f32 1e-05, %v682_v63  ;;  %v699_v9 = vadd.f32 1e-05, %v683_v2  ;;  %5657 = vmatprep.mubr.msk.bf16.mxu0 %vm523_vm0, %v777_v3  ;;  %v722_v45 = vmul.f32 %v6784_v4, %v7606_v55 }
 0x18f   : > { %v668_v12 = vpop.xlane.xlu1 %667  ;;  %v764_v13 = vadd.f32 %v7692_v24, %v742_v5  ;;  %v723_v14 = vmul.f32 %v6786_v7, %v7615_v0  ;;  %v765_v16 = vadd.f32 %v7692_v24, %v743_v6 }
 0x190   : > { %6799 = vrsqrt.f32 %v698_v8  ;;  %v684_v15 = vmul.f32 0.03125, %v668_v12  ;;  %v744_v18 = vmul.f32 %v7685_v32, %v722_v45 }
 0x191   : > { %v6788_v19 = vpop.eup %6787  ;;  %6801 = vrsqrt.f32 %v699_v9  ;;  %v778_v22 = vpack.c.bf16 %v764_v13, %v763_v54  ;;  %v745_v31 = vmul.f32 %v7685_v32, %v723_v14 }
 0x192   : > { %v6790_v26 = vpop.eup %6789  ;;  %v700_v27 = vadd.f32 1e-05, %v684_v15  ;;  %v766_v55 = vadd.f32 %v7692_v24, %v744_v18  ;;  %v724_v30 = vmul.f32 %v6788_v19, %v7618_v1 }
 0x193   : > { %5658 = vmatmul.mubr.msk.bf16.vlgmr.msra.gmra.mxu0 %vm523_vm0, %v778_v22  ;;  %v725_v0 = vmul.f32 %v6790_v26, %v7627_v10  ;;  %v767_v39 = vadd.f32 %v7692_v24, %v745_v31 }
 0x194   : > { %6803 = vrsqrt.f32 %v700_v27  ;;  %v779_v33 = vpack.c.bf16 %v766_v55, %v765_v16  ;;  %v746_v34 = vmul.f32 %v7685_v32, %v724_v30 }
 0x195   : > { %v6792_v20 = vpop.eup %6791  ;;  %v747_v41 = vmul.f32 %v7685_v32, %v725_v0 }
 0x196   : > { %v6794_v38 = vpop.eup %6793  ;;  %5661 = vmatprep.mubr.msk.bf16.mxu0 %vm523_vm0, %v779_v33  ;;  %v768_v40 = vadd.f32 %v7692_v24, %v746_v34  ;;  %v726_v1 = vmul.f32 %v6792_v20, %v7630_v11 }
 0x197   : > { %v727_v42 = vmul.f32 %v6794_v38, %v7639_v23  ;;  %v769_v36 = vadd.f32 %v7692_v24, %v747_v41 }
 0x198   : > { %v780_v43 = vpack.c.bf16 %v768_v40, %v767_v39  ;;  %v748_v10 = vmul.f32 %v7685_v32, %v726_v1 }
 0x199   : > { %v6796_v46 = vpop.eup %6795  ;;  %v749_v51 = vmul.f32 %v7685_v32, %v727_v42 }
 0x19a   : > { %v6798_v48 = vpop.eup %6797  ;;  %v770_v49 = vadd.f32 %v7692_v24, %v748_v10  ;;  %v728_v50 = vmul.f32 %v6796_v46, %v7642_v17 }
 0x19b   : > { %5662 = vmatmul.mubr.msk.bf16.gmra.mxu0 %vm523_vm0, %v780_v43  ;;  %v729_v11 = vmul.f32 %v6798_v48, %v7651_v35  ;;  %v771_v53 = vadd.f32 %v7692_v24, %v749_v51 }
 0x19c   : > { %v781_v52 = vpack.c.bf16 %v770_v49, %v769_v36  ;;  %v750_v23 = vmul.f32 %v7685_v32, %v728_v50 }
 0x19d   : > { %v6800_v28 = vpop.eup %6799  ;;  %v751_v17 = vmul.f32 %v7685_v32, %v729_v11 }
 0x19e   : > { %v6802_v29 = vpop.eup %6801  ;;  %5665 = vmatprep.mubr.msk.bf16.mxu0 %vm523_vm0, %v781_v52  ;;  %v772_v56 = vadd.f32 %v7692_v24, %v750_v23  ;;  %v730_v57 = vmul.f32 %v6800_v28, %v7654_v21 }
 0x19f   : > { %v731_v58 = vmul.f32 %v6802_v29, %v7663_v47  ;;  %v773_v60 = vadd.f32 %v7692_v24, %v751_v17 }
 0x1a0   : > { %v782_v59 = vpack.c.bf16 %v772_v56, %v771_v53  ;;  %v752_v35 = vmul.f32 %v7685_v32, %v730_v57 }
 0x1a1   : > { %v6804_v44 = vpop.eup %6803  ;;  %v753_v62 = vmul.f32 %v7685_v32, %v731_v58 }
 0x1a2   : > { %v774_v61 = vadd.f32 %v7692_v24, %v752_v35  ;;  %v732_v37 = vmul.f32 %v6804_v44, %v7666_v25 }
 0x1a3   : > { %5666 = vmatmul.mubr.msk.bf16.gmra.mxu0 %vm523_vm0, %v782_v59  ;;  %v775_v47 = vadd.f32 %v7692_v24, %v753_v62 }
 0x1a4   : > { %v783_v63 = vpack.c.bf16 %v774_v61, %v773_v60  ;;  %v754_v21 = vmul.f32 %v7685_v32, %v732_v37  ;;  %v5345_v32 = vld [vmem:[%s9584_s5] ss:$0 sm:$0xff] }
 0x1a6   : > { %5669 = vmatprep.mubr.msk.bf16.mxu0 %vm523_vm0, %v783_v63  ;;  %v776_v2 = vadd.f32 %v7692_v24, %v754_v21 }
 0x1a8   : > { %v784_v3 = vpack.c.bf16 %v776_v2, %v775_v47 }
 0x1ab   : > { %5670 = vmatmul.mubr.msk.bf16.gmra.mxu0 %vm523_vm0, %v784_v3 }
 0x253   : > { %v5659_v4 = vpop.f32.mrf.mxu0 }
 0x254   : > { %v875_v30 = vadd.f32 %v5659_v4, %v5345_v32 }
 0x255   : > { %v866_v5 = vpop.f32.mrf.mxu0 }
 0x256   : > { %v867_v13 = vadd.f32 %v5345_v32, %v866_v5 }
 0x257   : > { %v5660_v6 = vpop.f32.mrf.mxu0 }
 0x258   : > { %v878_v34 = vadd.f32 %v5660_v6, %v5345_v32 }
 0x259   : > { %v869_v25 = vpop.f32.mrf.mxu0 }
 0x25a   : > { %v870_v19 = vadd.f32 %v5345_v32, %v869_v25 }
 0x25b   : > { %v5663_v7 = vpop.f32.mrf.mxu0 }
 0x25c   : > { %v891_v46 = vadd.f32 %v5663_v7, %v5345_v32 }
 0x25d   : > { %v882_v8 = vpop.f32.mrf.mxu0 }
 0x25e   : > { %v883_v40 = vadd.f32 %v5345_v32, %v882_v8 }
 0x25f   : > { %v5664_v9 = vpop.f32.mrf.mxu0 }
 0x260   : > { %v894_v49 = vadd.f32 %v5664_v9, %v5345_v32 }
 0x261   : > { %v885_v45 = vpop.f32.mrf.mxu0 }
 0x262   : > { %v886_v42 = vadd.f32 %v5345_v32, %v885_v45 }
 0x263   : > { %v5667_v12 = vpop.f32.mrf.mxu0 }
 0x264   : > { %v907_v26 = vadd.f32 %v5667_v12, %v5345_v32 }
 0x265   : > { %v898_v54 = vpop.f32.mrf.mxu0 }
 0x266   : > { %v899_v14 = vadd.f32 %v5345_v32, %v898_v54  ;;  %v6099_v31 = vpack.i.bf16 %v907_v26, %v875_v30 }
 0x267   : > { %v5668_v24 = vpop.f32.mrf.mxu0 }
 0x268   : > { %v6095_v15 = vpack.i.bf16 %v899_v14, %v867_v13  ;;  %v910_v0 = vadd.f32 %v5668_v24, %v5345_v32 }
 0x269   : > { %v901_v18 = vpop.f32.mrf.mxu0 }
 0x26a   : > { %v902_v22 = vadd.f32 %v5345_v32, %v901_v18  ;;  %6096 = vxpose.xlu0.b32.start [1/8] (short) (narrow) %v6095_v15, 96  ;;  %v6101_v20 = vpack.i.bf16 %v910_v0, %v878_v34 }
 0x26b   : > { %v5671_v16 = vpop.f32.mrf.mxu0 }
 0x26c   : > { %v6097_v27 = vpack.i.bf16 %v902_v22, %v870_v19  ;;  %v923_v43 = vadd.f32 %v5671_v16, %v5345_v32 }
 0x26d   : > { %v914_v55 = vpop.f32.mrf.mxu0 }
 0x26e   : > { %6098 = vxpose.xlu0.b32.cont [2/8] (short) (narrow) %v6097_v27, 96  ;;  %v915_v38 = vadd.f32 %v5345_v32, %v914_v55  ;;  %v6107_v48 = vpack.i.bf16 %v923_v43, %v891_v46 }
 0x26f   : > { %v5672_v33 = vpop.f32.mrf.mxu0 }
 0x270   : > { %v6103_v1 = vpack.i.bf16 %v915_v38, %v883_v40  ;;  %v926_v36 = vadd.f32 %v5672_v33, %v5345_v32 }
 0x271   : > { %v917_v39 = vpop.f32.mrf.mxu0 }
 0x272   : > { %6100 = vxpose.xlu0.b32.cont [3/8] (short) (narrow) %v6099_v31, 96  ;;  %v918_v41 = vadd.f32 %v5345_v32, %v917_v39  ;;  %v6109_v50 = vpack.i.bf16 %v926_v36, %v894_v49 }
 0x274   : > { %v6105_v10 = vpack.i.bf16 %v918_v41, %v886_v42 }
 0x276   : > { %6102 = vxpose.xlu0.b32.cont [4/8] (short) (narrow) %v6101_v20, 96 }
 0x27a   : > { %6104 = vxpose.xlu0.b32.cont [5/8] (short) (narrow) %v6103_v1, 96 }
 0x27e   : > { %6106 = vxpose.xlu0.b32.cont [6/8] (short) (narrow) %v6105_v10, 96 }
 0x282   : > { %6108 = vxpose.xlu0.b32.cont [7/8] (short) (narrow) %v6107_v48, 96 }
 0x286   : > { %6110 = vxpose.xlu0.b32.end [8/8] (short) (narrow) %v6109_v50, 96 }
 0x2e6   : > { %v6111_v51 = vpop.trf.xlu0 }
 0x2e7   : > { %v6112_v23 = vunpack.i.l.bf16 %v6111_v51  ;;  %v6115_v6 = vunpack.i.h.bf16 %v6111_v51 }
 0x2ea   : > { %v6116_v11 = vpop.trf.xlu0 }
 0x2eb   : > { %v6117_v52 = vunpack.i.l.bf16 %v6116_v11  ;;  %v6120_v4 = vunpack.i.h.bf16 %v6116_v11 }
 0x2ed   : > { %v6171_v28 = vpack.i.bf16 %v6117_v52, %v6112_v23  ;;  %v6297_v25 = vpack.i.bf16 %v6120_v4, %v6115_v6 }
 0x2ee   : > { %v6121_v29 = vpop.trf.xlu0 }
 0x2ef   : > { %6172 = vxpose.xlu0.b32.start.end [1/1] (short) (narrow) %v6171_v28, 64  ;;  %v6122_v37 = vunpack.i.l.bf16 %v6121_v29  ;;  %v6125_v8 = vunpack.i.h.bf16 %v6121_v29 }
 0x2f2   : > { %v6126_v53 = vpop.trf.xlu0 }
 0x2f3   : > { %v6127_v60 = vunpack.i.l.bf16 %v6126_v53  ;;  %v6130_v7 = vunpack.i.h.bf16 %v6126_v53 }
 0x2f5   : > { %v6213_v62 = vpack.i.bf16 %v6127_v60, %v6122_v37  ;;  %v6381_v9 = vpack.i.bf16 %v6130_v7, %v6125_v8 }
 0x2f6   : > { %v6131_v56 = vpop.trf.xlu0 }
 0x2f7   : > { %v6132_v58 = vunpack.i.l.bf16 %v6131_v56  ;;  %v6135_v12 = vunpack.i.h.bf16 %v6131_v56 }
 0x2fa   : > { %v6136_v57 = vpop.trf.xlu0 }
 0x2fb   : > { %v6137_v17 = vunpack.i.l.bf16 %v6136_v57  ;;  %v6140_v45 = vunpack.i.h.bf16 %v6136_v57 }
 0x2fd   : > { %v6255_v59 = vpack.i.bf16 %v6137_v17, %v6132_v58  ;;  %v6423_v32 = vpack.i.bf16 %v6140_v45, %v6135_v12 }
 0x2fe   : > { %v6141_v35 = vpop.trf.xlu0 }
 0x2ff   : > { %6256 = vxpose.xlu1.b32.start.end [1/1] (short) (narrow) %v6255_v59, 64  ;;  %v6142_v47 = vunpack.i.l.bf16 %v6141_v35  ;;  %v6145_v10 = vunpack.i.h.bf16 %v6141_v35 }
 0x302   : > { %v6146_v44 = vpop.trf.xlu0 }
 0x303   : > { %v6147_v21 = vunpack.i.l.bf16 %v6146_v44  ;;  %v6150_v43 = vunpack.i.h.bf16 %v6146_v44 }
 0x305   : > { %v6339_v2 = vpack.i.bf16 %v6147_v21, %v6142_v47  ;;  %v6507_v36 = vpack.i.bf16 %v6150_v43, %v6145_v10 }
 0x306   : > { %v7751_v61 = vpop.trf.xlu0 }
 0x307   : > { %9691 = vst [vmem:[#allocation14_spill] sm:$0xff] %v7751_v61  ;;  %v6152_v15 = vunpack.i.l.bf16 %v7751_v61 }
 0x30a   : > { %v7753_v63 = vpop.trf.xlu0 }
 0x30b   : > { %9692 = vst [vmem:[#allocation15_spill] sm:$0xff] %v7753_v63  ;;  %v6157_v24 = vunpack.i.l.bf16 %v7753_v63 }
 0x30c   : > { %6214 = vxpose.xlu0.b32.start.end [1/1] (short) (narrow) %v6213_v62, 64 }
 0x30d   : > { %v6465_v16 = vpack.i.bf16 %v6157_v24, %v6152_v15 }
 0x30e   : > { %v7755_v3 = vpop.trf.xlu0 }
 0x30f   : > { %9693 = vst [vmem:[#allocation16_spill] sm:$0xff] %v7755_v3  ;;  %v6162_v13 = vunpack.i.l.bf16 %v7755_v3  ;;  %v8181_v3 = vld [vmem:[#allocation5 + $0x98] sm:$0xff] }
 0x312   : > { %v7757_v5 = vpop.trf.xlu0 }
 0x313   : > { %9694 = vst [vmem:[#allocation17_spill] sm:$0xff] %v7757_v5  ;;  %v6167_v54 = vunpack.i.l.bf16 %v7757_v5  ;;  %v8179_v5 = vld [vmem:[#allocation5 + $0xd0] sm:$0xff] }
 0x315   : > { %v6549_v14 = vpack.i.bf16 %v6167_v54, %v6162_v13 }
 0x31c   : > { %6340 = vxpose.xlu1.b32.start.end [1/1] (short) (narrow) %v6339_v2, 64 }
 0x329   : > { %6298 = vxpose.xlu0.b32.start.end [1/1] (short) (narrow) %v6297_v25, 64 }
 0x339   : > { %6382 = vxpose.xlu1.b32.start.end [1/1] (short) (narrow) %v6381_v9, 64 }
 0x346   : > { %6550 = vxpose.xlu0.b32.start.end [1/1] (short) (narrow) %v6549_v14, 64 }
 0x356   : > { %6424 = vxpose.xlu1.b32.start.end [1/1] (short) (narrow) %v6423_v32, 64 }
 0x36b   : > { %v6173_v18 = vpop.trf.xlu0 }
 0x36c   : > { %v6177_v19 = vunpack.i.h.bf16 %v6173_v18  ;;  %v6174_v22 = vunpack.i.l.bf16 %v6173_v18 }
 0x36f   : > { %v6178_v26 = vpop.trf.xlu0 }
 0x370   : > { %v6182_v27 = vunpack.i.h.bf16 %v6178_v26  ;;  %v6179_v55 = vunpack.i.l.bf16 %v6178_v26 }
 0x372   : > { %v1249_v30 = vpack.c.bf16 %v6179_v55, %v6174_v22  ;;  %v1253_v31 = vpack.c.bf16 %v6182_v27, %v6177_v19 }
 0x373   : > { %6466 = vxpose.xlu1.b32.start.end [1/1] (short) (narrow) %v6465_v16, 64  ;;  %v7763_v0 = vpop.trf.xlu0 }
 0x374   : > { %5681 = vmatprep.mubr.msk.bf16.mxu1 %vm1857_vm1, %v1249_v30  ;;  %5697 = vmatprep.mubr.msk.bf16.mxu0 %vm1857_vm1, %v1253_v31  ;;  %v6184_v10 = vunpack.i.l.bf16 %v7763_v0 }
 0x377   : > { %v7767_v33 = vpop.trf.xlu0 }
 0x378   : > { %v6192_v43 = vunpack.i.h.bf16 %v7767_v33 }
 0x37b   : > { %v7769_v34 = vpop.trf.xlu1  ;;  %v7771_v20 = vpop.trf.xlu0 }
 0x37c   : > { %v6258_v22 = vunpack.i.l.bf16 %v7769_v34  ;;  %v6261_v16 = vunpack.i.h.bf16 %v7769_v34  ;;  %v6187_v34 = vunpack.i.h.bf16 %v7763_v0 }
 0x37f   : > { %v7773_v38 = vpop.trf.xlu1  ;;  %v7775_v39 = vpop.trf.xlu0 }
 0x380   : > { %v6263_v18 = vunpack.i.l.bf16 %v7773_v38  ;;  %v6266_v19 = vunpack.i.h.bf16 %v7773_v38  ;;  %v6202_v0 = vunpack.i.h.bf16 %v7775_v39 }
 0x382   : > { %v1537_v55 = vpack.c.bf16 %v6263_v18, %v6258_v22 }
 0x383   : > { %v6267_v40 = vpop.trf.xlu1  ;;  %v7777_v1 = vpop.trf.xlu0 }
 0x384   : > { %v6268_v8 = vunpack.i.l.bf16 %v6267_v40  ;;  %v6271_v9 = vunpack.i.h.bf16 %v6267_v40  ;;  %v1541_v40 = vpack.c.bf16 %v6266_v19, %v6261_v16 }
 0x387   : > { %v6272_v41 = vpop.trf.xlu1  ;;  %v7779_v42 = vpop.trf.xlu0 }
 0x388   : > { %v6273_v25 = vunpack.i.l.bf16 %v6272_v41  ;;  %v6276_v7 = vunpack.i.h.bf16 %v6272_v41  ;;  %v6209_v18 = vunpack.i.l.bf16 %v7779_v42 }
 0x38a   : > { %v1538_v32 = vpack.c.bf16 %v6273_v25, %v6268_v8  ;;  %v1542_v14 = vpack.c.bf16 %v6276_v7, %v6271_v9 }
 0x38b   : > { %v6277_v46 = vpop.trf.xlu1  ;;  %v7781_v48 = vpop.trf.xlu0 }
 0x38c   : > { %v6278_v58 = vunpack.i.l.bf16 %v6277_v46  ;;  %v6281_v44 = vunpack.i.h.bf16 %v6277_v46  ;;  %v1874_v30 = vsel %vm1857_vm1, %v1538_v32, 0  ;;  %v1963_v31 = vsel %vm1857_vm1, %v1542_v14, 0 }
 0x38f   : > { %v6282_v49 = vpop.trf.xlu1  ;;  %v7783_v50 = vpop.trf.xlu0 }
 0x390   : > { %6508 = vxpose.xlu1.b32.start.end [1/1] (short) (narrow) %v6507_v36, 64  ;;  %v6283_v52 = vunpack.i.l.bf16 %v6282_v49  ;;  %v6286_v17 = vunpack.i.h.bf16 %v6282_v49  ;;  %v6189_v36 = vunpack.i.l.bf16 %v7767_v33 }
 0x392   : > { %v1539_v62 = vpack.c.bf16 %v6283_v52, %v6278_v58  ;;  %v1543_v2 = vpack.c.bf16 %v6286_v17, %v6281_v44  ;;  %v1871_v52 = vsel %vm1857_vm1, %v1537_v55, 0 }
 0x393   : > { %v6287_v51 = vpop.trf.xlu1  ;;  %v7785_v11 = vpop.trf.xlu0 }
 0x394   : > { %v6291_v23 = vunpack.i.h.bf16 %v6287_v51  ;;  %v6288_v29 = vunpack.i.l.bf16 %v6287_v51  ;;  %v1877_v54 = vsel %vm1857_vm1, %v1539_v62, 0  ;;  %v1966_v13 = vsel %vm1857_vm1, %v1543_v2, 0 }
 0x395   : > { %v6194_v51 = vunpack.i.l.bf16 %v7771_v20 }
 0x397   : > { %v6292_v28 = vpop.trf.xlu1  ;;  %v7787_v53 = vpop.trf.xlu0 }
 0x398   : > { %v6296_v56 = vunpack.i.h.bf16 %v6292_v28  ;;  %v6293_v57 = vunpack.i.l.bf16 %v6292_v28  ;;  %v6199_v28 = vunpack.i.l.bf16 %v7775_v39  ;;  %v6204_v39 = vunpack.i.l.bf16 %v7777_v1 }
 0x39a   : > { %v1540_v59 = vpack.c.bf16 %v6293_v57, %v6288_v29  ;;  %v1544_v35 = vpack.c.bf16 %v6296_v56, %v6291_v23  ;;  %v1960_v23 = vsel %vm1857_vm1, %v1541_v40, 0  ;;  %v1254_v29 = vpack.c.bf16 %v6192_v43, %v6187_v34 }
 0x39b   : > { %v7789_v60 = vpop.trf.xlu1  ;;  %v7791_v37 = vpop.trf.xlu0  ;;  %v6197_v56 = vunpack.i.h.bf16 %v7771_v20  ;;  %v6207_v20 = vunpack.i.h.bf16 %v7777_v1  ;;  %v1252_v34 = vpack.c.bf16 %v6209_v18, %v6204_v39 }
 0x39c   : > { %6001 = vmatprep.subr.msk.bf16.mxu1 %vm1857_vm1, %v1540_v59  ;;  %6005 = vmatprep.subr.msk.bf16.mxu0 %vm1857_vm1, %v1544_v35  ;;  %v1880_v21 = vsel %vm1857_vm1, %v1540_v59, 0  ;;  %v1969_v47 = vsel %vm1857_vm1, %v1544_v35, 0  ;;  %v1250_v59 = vpack.c.bf16 %v6189_v36, %v6184_v10 }
 0x39d   : > { %5674 = vmatpush3.bf16.xpose.msra.mxu1 %v1880_v21  ;;  %5690 = vmatpush3.bf16.xpose.msra.mxu0 %v1969_v47  ;;  %v1251_v47 = vpack.c.bf16 %v6199_v28, %v6194_v51  ;;  %v1255_v8 = vpack.c.bf16 %v6202_v0, %v6197_v56 }
 0x39e   : > { %6002 = vmatprep.subr.msk.bf16.mxu1 %vm1857_vm1, %v1539_v62  ;;  %6006 = vmatprep.subr.msk.bf16.mxu0 %vm1857_vm1, %v1543_v2 }
 0x39f   : > { %v7799_v4 = vpop.trf.xlu1  ;;  %v7801_v6 = vpop.trf.xlu0 }
 0x3a0   : > { %v6350_v56 = vunpack.i.h.bf16 %v7799_v4  ;;  %v6347_v0 = vunpack.i.l.bf16 %v7799_v4  ;;  %v6244_v39 = vunpack.i.h.bf16 %v7801_v6 }
 0x3a3   : > { %v7803_v45 = vpop.trf.xlu1  ;;  %v7805_v12 = vpop.trf.xlu0 }
 0x3a4   : > { %v6355_v10 = vunpack.i.h.bf16 %v7803_v45 }
 0x3a5   : > { %5676 = vmatpush3.bf16.xpose.msra.mxu1 %v1877_v54  ;;  %5692 = vmatpush3.bf16.xpose.msra.mxu0 %v1966_v13  ;;  %v6212_v54 = vunpack.i.h.bf16 %v7779_v42  ;;  %v6216_v42 = vunpack.i.l.bf16 %v7781_v48 }
 0x3a6   : > { %6003 = vmatprep.subr.msk.bf16.mxu1 %vm1857_vm1, %v1538_v32  ;;  %6007 = vmatprep.subr.msk.bf16.mxu0 %vm1857_vm1, %v1542_v14 }
 0x3a7   : > { %v7811_v24 = vpop.trf.xlu1  ;;  %v7813_v15 = vpop.trf.xlu0  ;;  %v1256_v43 = vpack.c.bf16 %v6212_v54, %v6207_v20  ;;  %v6236_v20 = vunpack.i.l.bf16 %v7791_v37  ;;  %v6241_v54 = vunpack.i.l.bf16 %v7801_v6 }
 0x3a8   : > { %v6251_v6 = vunpack.i.l.bf16 %v7813_v15 }
 0x3ab   : > { %v6361_v26 = vpop.trf.xlu1  ;;  %v7819_v27 = vpop.trf.xlu0 }
 0x3ac   : > { %v6362_v2 = vunpack.i.l.bf16 %v6361_v26  ;;  %v6365_v9 = vunpack.i.h.bf16 %v6361_v26  ;;  %v6219_v26 = vunpack.i.h.bf16 %v7781_v48  ;;  %v6352_v48 = vunpack.i.l.bf16 %v7803_v45 }
 0x3ad   : > { %5678 = vmatpush3.bf16.xpose.msra.mxu1 %v1874_v30  ;;  %5694 = vmatpush3.bf16.xpose.msra.mxu0 %v1963_v31  ;;  %v6221_v30 = vunpack.i.l.bf16 %v7783_v50 }
 0x3ae   : > { %6004 = vmatprep.subr.msk.bf16.mxu1 %vm1857_vm1, %v1537_v55  ;;  %6008 = vmatprep.subr.msk.bf16.mxu0 %vm1857_vm1, %v1541_v40  ;;  %v6224_v55 = vunpack.i.h.bf16 %v7783_v50  ;;  %v6360_v40 = vunpack.i.h.bf16 %v7811_v24 }
 0x3af   : > { %v6366_v38 = vpop.trf.xlu1  ;;  %v7825_v41 = vpop.trf.xlu0  ;;  %v1257_v36 = vpack.c.bf16 %v6221_v30, %v6216_v42  ;;  %v6303_v42 = vunpack.i.h.bf16 %v7819_v27 }
 0x3b0   : > { %v6367_v57 = vunpack.i.l.bf16 %v6366_v38  ;;  %v6370_v21 = vunpack.i.h.bf16 %v6366_v38  ;;  %v6357_v38 = vunpack.i.l.bf16 %v7811_v24  ;;  %v1261_v50 = vpack.c.bf16 %v6224_v55, %v6219_v26 }
 0x3b1   : > { %v6246_v26 = vunpack.i.l.bf16 %v7805_v12  ;;  %v6300_v55 = vunpack.i.l.bf16 %v7819_v27  ;;  %v6308_v30 = vunpack.i.h.bf16 %v7825_v41 }
 0x3b2   : > { %v1547_v14 = vpack.c.bf16 %v6367_v57, %v6362_v2  ;;  %v1551_v1 = vpack.c.bf16 %v6370_v21, %v6365_v9  ;;  %v6345_v57 = vunpack.i.h.bf16 %v7789_v60  ;;  %v6239_v9 = vunpack.i.h.bf16 %v7791_v37 }
 0x3b3   : > { %v6371_v46 = vpop.trf.xlu1  ;;  %v7831_v49 = vpop.trf.xlu0  ;;  %v6254_v37 = vunpack.i.h.bf16 %v7813_v15 }
 0x3b4   : > { %v6375_v17 = vunpack.i.h.bf16 %v6371_v46  ;;  %v6372_v33 = vunpack.i.l.bf16 %v6371_v46  ;;  %v2055_v24 = vsel %vm1857_vm1, %v1547_v14, 0  ;;  %v2144_v28 = vsel %vm1857_vm1, %v1551_v1, 0 }
 0x3b5   : > { %5680 = vmatpush3.bf16.xpose.msra.mxu1 %v1871_v52  ;;  %5696 = vmatpush3.bf16.xpose.msra.mxu0 %v1960_v23  ;;  %v1546_v52 = vpack.c.bf16 %v6357_v38, %v6352_v48  ;;  %v1550_v23 = vpack.c.bf16 %v6360_v40, %v6355_v10  ;;  %v6305_v40 = vunpack.i.l.bf16 %v7825_v41  ;;  %v1269_v10 = vpack.c.bf16 %v6308_v30, %v6303_v42 }
 0x3b7   : > { %v6376_v58 = vpop.trf.xlu1  ;;  %v7839_v35 = vpop.trf.xlu0 }
 0x3b8   : > { %v6380_v44 = vunpack.i.h.bf16 %v6376_v58  ;;  %v6377_v62 = vunpack.i.l.bf16 %v6376_v58  ;;  %v2052_v58 = vsel %vm1857_vm1, %v1546_v52, 0 }
 0x3ba   : > { %v1548_v25 = vpack.c.bf16 %v6377_v62, %v6372_v33  ;;  %v1552_v7 = vpack.c.bf16 %v6380_v44, %v6375_v17  ;;  %v6342_v17 = vunpack.i.l.bf16 %v7789_v60  ;;  %v1549_v62 = vpack.c.bf16 %v6350_v56, %v6345_v57 }
 0x3bb   : > { %v7841_v32 = vpop.trf.xlu1  ;;  %v7846_v13 = vpop.trf.xlu0  ;;  %v6229_v60 = vunpack.i.h.bf16 %v7785_v11 }
 0x3bc   : > { %6009 = vmatprep.subr.msk.bf16.mxu1 %vm1857_vm1, %v1548_v25  ;;  %6013 = vmatprep.subr.msk.bf16.mxu0 %vm1857_vm1, %v1552_v7  ;;  %v2058_v19 = vsel %vm1857_vm1, %v1548_v25, 0  ;;  %v2147_v22 = vsel %vm1857_vm1, %v1552_v7, 0  ;;  %v1545_v44 = vpack.c.bf16 %v6347_v0, %v6342_v17  ;;  %v2138_v25 = vsel %vm1857_vm1, %v1549_v62, 0 }
 0x3bd   : > { %5682 = vmatmul.mubr.msk.bf16.vlgmr.msra.gmra.mxu1 %vm1857_vm1, %v1250_v59  ;;  %5698 = vmatmul.mubr.msk.bf16.vlgmr.msra.gmra.mxu0 %vm1857_vm1, %v1254_v29  ;;  %v2141_v59 = vsel %vm1857_vm1, %v1550_v23, 0  ;;  %v6234_v7 = vunpack.i.h.bf16 %v7787_v53 }
 0x3be   : > { %5706 = vmatpush3.bf16.xpose.msra.mxu1 %v2058_v19  ;;  %5722 = vmatpush3.bf16.xpose.msra.mxu0 %v2147_v22  ;;  %v2049_v2 = vsel %vm1857_vm1, %v1545_v44, 0  ;;  %v1259_v19 = vpack.c.bf16 %v6241_v54, %v6236_v20  ;;  %v1263_v22 = vpack.c.bf16 %v6244_v39, %v6239_v9 }
 0x3bf   : > { %6010 = vmatprep.subr.msk.bf16.mxu1 %vm1857_vm1, %v1547_v14  ;;  %6014 = vmatprep.subr.msk.bf16.mxu0 %vm1857_vm1, %v1551_v1  ;;  %v7857_v16 = vpop.trf.xlu1  ;;  %v7863_v31 = vpop.trf.xlu0  ;;  %v1262_v18 = vpack.c.bf16 %v6234_v7, %v6229_v60 }
 0x3c0   : > { %5685 = vmatprep.mubr.msk.bf16.mxu1 %vm1857_vm1, %v1251_v47  ;;  %5701 = vmatprep.mubr.msk.bf16.mxu0 %vm1857_vm1, %v1255_v8  ;;  %v6226_v47 = vunpack.i.l.bf16 %v7785_v11  ;;  %v6231_v8 = vunpack.i.l.bf16 %v7787_v53  ;;  %v6249_v53 = vunpack.i.h.bf16 %v7805_v12  ;;  %v1260_v12 = vpack.c.bf16 %v6251_v6, %v6246_v26 }
 0x3c2   : > { %v1258_v11 = vpack.c.bf16 %v6231_v8, %v6226_v47 }
 0x3c3   : > { %v7871_v46 = vpop.trf.xlu1  ;;  %v7873_v51 = vpop.trf.xlu0 }
 0x3c5   : > { %5686 = vmatmul.mubr.msk.bf16.gmra.mxu1 %vm1857_vm1, %v1252_v34  ;;  %5702 = vmatmul.mubr.msk.bf16.gmra.mxu0 %vm1857_vm1, %v1256_v43  ;;  %v1264_v34 = vpack.c.bf16 %v6254_v37, %v6249_v53  ;;  %v1265_v43 = vpack.c.bf16 %v6305_v40, %v6300_v55 }
 0x3c6   : > { %5708 = vmatpush3.bf16.xpose.msra.mxu1 %v2055_v24  ;;  %5724 = vmatpush3.bf16.xpose.msra.mxu0 %v2144_v28 }
 0x3c7   : > { %6011 = vmatprep.subr.msk.bf16.mxu1 %vm1857_vm1, %v1546_v52  ;;  %6015 = vmatprep.subr.msk.bf16.mxu0 %vm1857_vm1, %v1550_v23  ;;  %v7881_v45 = vpop.trf.xlu1  ;;  %v7885_v29 = vpop.trf.xlu0 }
 0x3c8   : > { %5713 = vmatprep.mubr.msk.bf16.mxu1 %vm1857_vm1, %v1257_v36  ;;  %5729 = vmatprep.mubr.msk.bf16.mxu0 %vm1857_vm1, %v1261_v50 }
 0x3cb   : > { %v7891_v33 = vpop.trf.xlu1 }
 0x3ce   : > { %5710 = vmatpush3.bf16.xpose.msra.mxu1 %v2052_v58  ;;  %5726 = vmatpush3.bf16.xpose.msra.mxu0 %v2141_v59 }
 0x3cf   : > { %6012 = vmatprep.subr.msk.bf16.mxu1 %vm1857_vm1, %v1545_v44  ;;  %6016 = vmatprep.subr.msk.bf16.mxu0 %vm1857_vm1, %v1549_v62  ;;  %v7897_v21 = vpop.trf.xlu1 }
 0x3d3   : > { %v7899_v4 = vpop.trf.xlu1 }
 0x3d6   : > { %5712 = vmatpush3.bf16.xpose.msra.mxu1 %v2049_v2  ;;  %5728 = vmatpush3.bf16.xpose.msra.mxu0 %v2138_v25 }
 0x3d7   : > { %v7911_v14 = vpop.trf.xlu1 }
 0x3db   : > { %v7913_v1 = vpop.trf.xlu1 }
 0x3dc   : > { %v6429_v37 = vunpack.i.h.bf16 %v7913_v1  ;;  %v6426_v6 = vunpack.i.l.bf16 %v7913_v1  ;;  %v6310_v1 = vunpack.i.l.bf16 %v7831_v49 }
 0x3dd   : > { %5714 = vmatmul.mubr.msk.bf16.vlgmr.msra.gmra.mxu1 %vm1857_vm1, %v1258_v11  ;;  %5730 = vmatmul.mubr.msk.bf16.vlgmr.msra.gmra.mxu0 %vm1857_vm1, %v1262_v18 }
 0x3de   : > { %5717 = vmatprep.mubr.msk.bf16.mxu1 %vm1857_vm1, %v1259_v19  ;;  %5733 = vmatprep.mubr.msk.bf16.mxu0 %vm1857_vm1, %v1263_v22 }
 0x3df   : > { %v6430_v38 = vpop.trf.xlu1 }
 0x3e0   : > { %v6434_v22 = vunpack.i.h.bf16 %v6430_v38  ;;  %v6431_v53 = vunpack.i.l.bf16 %v6430_v38 }
 0x3e2   : > { %v1553_v55 = vpack.c.bf16 %v6431_v53, %v6426_v6  ;;  %v1557_v30 = vpack.c.bf16 %v6434_v22, %v6429_v37 }
 0x3e3   : > { %v6435_v48 = vpop.trf.xlu1 }
 0x3e4   : > { %v6439_v9 = vunpack.i.h.bf16 %v6435_v48  ;;  %v6436_v20 = vunpack.i.l.bf16 %v6435_v48 }
 0x3e5   : > { %5718 = vmatmul.mubr.msk.bf16.gmra.mxu1 %vm1857_vm1, %v1260_v12  ;;  %5734 = vmatmul.mubr.msk.bf16.gmra.mxu0 %vm1857_vm1, %v1264_v34  ;;  %v6313_v34 = vunpack.i.h.bf16 %v7831_v49  ;;  %v6325_v49 = vunpack.i.l.bf16 %v7863_v31 }
 0x3e6   : > { %5745 = vmatprep.mubr.msk.bf16.mxu1 %vm1857_vm1, %v1265_v43  ;;  %5761 = vmatprep.mubr.msk.bf16.mxu0 %vm1857_vm1, %v1269_v10  ;;  %v6318_v43 = vunpack.i.h.bf16 %v7839_v35  ;;  %v6315_v10 = vunpack.i.l.bf16 %v7839_v35 }
 0x3e7   : > { %v6440_v15 = vpop.trf.xlu1 }
 0x3e8   : > { %v6444_v25 = vunpack.i.h.bf16 %v6440_v15  ;;  %v6441_v7 = vunpack.i.l.bf16 %v6440_v15  ;;  %v2227_v15 = vsel %vm1857_vm1, %v1553_v55, 0  ;;  %v1270_v35 = vpack.c.bf16 %v6318_v43, %v6313_v34 }
 0x3ea   : > { %v1554_v54 = vpack.c.bf16 %v6441_v7, %v6436_v20  ;;  %v1558_v11 = vpack.c.bf16 %v6444_v25, %v6439_v9 }
 0x3eb   : > { %v6445_v27 = vpop.trf.xlu1 }
 0x3ec   : > { %v6449_v57 = vunpack.i.h.bf16 %v6445_v27  ;;  %v6446_v17 = vunpack.i.l.bf16 %v6445_v27  ;;  %v2230_v40 = vsel %vm1857_vm1, %v1554_v54, 0  ;;  %v2319_v12 = vsel %vm1857_vm1, %v1558_v11, 0 }
 0x3ed   : > { %v2316_v27 = vsel %vm1857_vm1, %v1557_v30, 0 }
 0x3ef   : > { %v6450_v36 = vpop.trf.xlu1 }
 0x3f0   : > { %v6454_v52 = vunpack.i.h.bf16 %v6450_v36  ;;  %v6451_v41 = vunpack.i.l.bf16 %v6450_v36  ;;  %v6323_v36 = vunpack.i.h.bf16 %v7846_v13 }
 0x3f2   : > { %v1555_v62 = vpack.c.bf16 %v6451_v41, %v6446_v17  ;;  %v1559_v60 = vpack.c.bf16 %v6454_v52, %v6449_v57  ;;  %v6328_v52 = vunpack.i.h.bf16 %v7863_v31  ;;  %v6330_v57 = vunpack.i.l.bf16 %v7873_v51 }
 0x3f3   : > { %v6455_v50 = vpop.trf.xlu1  ;;  %v6335_v31 = vunpack.i.l.bf16 %v7885_v29  ;;  %v6392_v17 = vunpack.i.h.bf16 %v7857_v16 }
 0x3f4   : > { %v6459_v23 = vunpack.i.h.bf16 %v6455_v50  ;;  %v6456_v24 = vunpack.i.l.bf16 %v6455_v50  ;;  %v2233_v18 = vsel %vm1857_vm1, %v1555_v62, 0  ;;  %v2322_v19 = vsel %vm1857_vm1, %v1559_v60, 0 }
 0x3f5   : > { %v6320_v50 = vunpack.i.l.bf16 %v7846_v13  ;;  %v6338_v13 = vunpack.i.h.bf16 %v7885_v29 }
 0x3f7   : > { %v6460_v28 = vpop.trf.xlu1 }
 0x3f8   : > { %v6464_v56 = vunpack.i.h.bf16 %v6460_v28  ;;  %v6461_v0 = vunpack.i.l.bf16 %v6460_v28  ;;  %v1271_v28 = vpack.c.bf16 %v6328_v52, %v6323_v36 }
 0x3fa   : > { %v1556_v58 = vpack.c.bf16 %v6461_v0, %v6456_v24  ;;  %v1560_v59 = vpack.c.bf16 %v6464_v56, %v6459_v23  ;;  %v1266_v23 = vpack.c.bf16 %v6315_v10, %v6310_v1  ;;  %v1267_v24 = vpack.c.bf16 %v6325_v49, %v6320_v50 }
 0x3fb   : > { %v7931_v44 = vpop.trf.xlu1  ;;  %v6333_v0 = vunpack.i.h.bf16 %v7873_v51  ;;  %v6387_v51 = vunpack.i.h.bf16 %v7841_v32 }
 0x3fc   : > { %9695 = vst [vmem:[#allocation18_spill] sm:$0xff] %v7931_v44  ;;  %6017 = vmatprep.subr.msk.bf16.mxu1 %vm1857_vm1, %v1556_v58  ;;  %6021 = vmatprep.subr.msk.bf16.mxu0 %vm1857_vm1, %v1560_v59  ;;  %v2236_v47 = vsel %vm1857_vm1, %v1556_v58, 0  ;;  %v2325_v2 = vsel %vm1857_vm1, %v1560_v59, 0  ;;  %v6389_v58 = vunpack.i.l.bf16 %v7857_v16 }
 0x3fd   : > { %5738 = vmatpush3.bf16.xpose.msra.mxu1 %v2236_v47  ;;  %5754 = vmatpush3.bf16.xpose.msra.mxu0 %v2325_v2  ;;  %v6384_v47 = vunpack.i.l.bf16 %v7841_v32  ;;  %v1277_v7 = vpack.c.bf16 %v6392_v17, %v6387_v51  ;;  %v6399_v51 = vunpack.i.l.bf16 %v7881_v45 }
 0x3fe   : > { %6018 = vmatprep.subr.msk.bf16.mxu1 %vm1857_vm1, %v1555_v62  ;;  %6022 = vmatprep.subr.msk.bf16.mxu0 %vm1857_vm1, %v1559_v60  ;;  %v1268_v62 = vpack.c.bf16 %v6335_v31, %v6330_v57  ;;  %v1272_v60 = vpack.c.bf16 %v6338_v13, %v6333_v0 }
 0x3ff   : > { %v7939_v8 = vpop.trf.xlu1  ;;  %v1273_v25 = vpack.c.bf16 %v6389_v58, %v6384_v47  ;;  %v6412_v47 = vunpack.i.h.bf16 %v7897_v21 }
 0x400   : > { %9696 = vst [vmem:[#allocation19_spill] sm:$0xff] %v7939_v8 }
 0x403   : > { %v7941_v39 = vpop.trf.xlu1 }
 0x404   : > { %9697 = vst [vmem:[#allocation20_spill] sm:$0xff] %v7941_v39 }
 0x405   : > { %5740 = vmatpush3.bf16.xpose.msra.mxu1 %v2233_v18  ;;  %5756 = vmatpush3.bf16.xpose.msra.mxu0 %v2322_v19 }
 0x406   : > { %6019 = vmatprep.subr.msk.bf16.mxu1 %vm1857_vm1, %v1554_v54  ;;  %6023 = vmatprep.subr.msk.bf16.mxu0 %vm1857_vm1, %v1558_v11 }
 0x407   : > { %v7947_v26 = vpop.trf.xlu1 }
 0x408   : > { %9698 = vst [vmem:[#allocation21_spill] sm:$0xff] %v7947_v26 }
 0x40b   : > { %v7951_v42 = vpop.trf.xlu1 }
 0x40c   : > { %9699 = vst [vmem:[#allocation22_spill] sm:$0xff] %v7951_v42 }
 0x40d   : > { %5742 = vmatpush3.bf16.xpose.msra.mxu1 %v2230_v40  ;;  %5758 = vmatpush3.bf16.xpose.msra.mxu0 %v2319_v12 }
 0x40e   : > { %6020 = vmatprep.subr.msk.bf16.mxu1 %vm1857_vm1, %v1553_v55  ;;  %6024 = vmatprep.subr.msk.bf16.mxu0 %vm1857_vm1, %v1557_v30 }
 0x40f   : > { %v7957_v38 = vpop.trf.xlu1 }
 0x410   : > { %9700 = vst [vmem:[#allocation23_spill] sm:$0xff] %v7957_v38 }
 0x413   : > { %v7963_v48 = vpop.trf.xlu1 }
 0x414   : > { %v6498_v58 = vunpack.i.l.bf16 %v7963_v48 }
 0x415   : > { %5744 = vmatpush3.bf16.xpose.msra.mxu1 %v2227_v15  ;;  %5760 = vmatpush3.bf16.xpose.msra.mxu0 %v2316_v27 }
 0x417   : > { %v7971_v41 = vpop.trf.xlu1 }
 0x418   : > { %v6503_v17 = vunpack.i.l.bf16 %v7971_v41 }
 0x41b   : > { %v7973_v56 = vpop.trf.xlu1 }
 0x41c   : > { %5746 = vmatmul.mubr.msk.bf16.vlgmr.msra.gmra.mxu1 %vm1857_vm1, %v1266_v23  ;;  %5762 = vmatmul.mubr.msk.bf16.vlgmr.msra.gmra.mxu0 %vm1857_vm1, %v1270_v35 }
 0x41d   : > { %5749 = vmatprep.mubr.msk.bf16.mxu1 %vm1857_vm1, %v1267_v24  ;;  %5765 = vmatprep.mubr.msk.bf16.mxu0 %vm1857_vm1, %v1271_v28  ;;  %v6513_v24 = vunpack.i.h.bf16 %v7973_v56  ;;  %v6510_v28 = vunpack.i.l.bf16 %v7973_v56 }
 0x41f   : > { %v6514_v59 = vpop.trf.xlu1 }
 0x420   : > { %v6518_v23 = vunpack.i.h.bf16 %v6514_v59  ;;  %v6515_v35 = vunpack.i.l.bf16 %v6514_v59 }
 0x422   : > { %v1561_v13 = vpack.c.bf16 %v6515_v35, %v6510_v28  ;;  %v1565_v31 = vpack.c.bf16 %v6518_v23, %v6513_v24  ;;  %v8064_v28 = vld [vmem:[#allocation5 + $0x18] sm:$0xff] }
 0x423   : > { %v6519_v2 = vpop.trf.xlu1 }
 0x424   : > { %5750 = vmatmul.mubr.msk.bf16.gmra.mxu1 %vm1857_vm1, %v1268_v62  ;;  %5766 = vmatmul.mubr.msk.bf16.gmra.mxu0 %vm1857_vm1, %v1272_v60  ;;  %v6523_v15 = vunpack.i.h.bf16 %v6519_v2  ;;  %v6520_v27 = vunpack.i.l.bf16 %v6519_v2  ;;  %v2405_v59 = vsel %vm1857_vm1, %v1561_v13, 0  ;;  %v2494_v56 = vsel %vm1857_vm1, %v1565_v31, 0 }
 0x425   : > { %5777 = vmatprep.mubr.msk.bf16.mxu1 %vm1857_vm1, %v1273_v25  ;;  %5793 = vmatprep.mubr.msk.bf16.mxu0 %vm1857_vm1, %v1277_v7  ;;  %v1828_v62 = vpack.c.bf16 %v6503_v17, %v6498_v58  ;;  %v6402_v60 = vunpack.i.h.bf16 %v7881_v45  ;;  %v6409_v2 = vunpack.i.l.bf16 %v7897_v21  ;;  %v6397_v25 = vunpack.i.h.bf16 %v7871_v46 }
 0x426   : > { %v6394_v7 = vunpack.i.l.bf16 %v7871_v46  ;;  %v6488_v45 = vunpack.i.l.bf16 %v7951_v42  ;;  %v6483_v21 = vunpack.i.l.bf16 %v7947_v26  ;;  %v8244_v26 = vld [vmem:[#allocation5 + $0xb8] sm:$0xff] }
 0x427   : > { %v6524_v29 = vpop.trf.xlu1 }
 0x428   : > { %v6528_v43 = vunpack.i.h.bf16 %v6524_v29  ;;  %v6525_v10 = vunpack.i.l.bf16 %v6524_v29  ;;  %v6407_v29 = vunpack.i.h.bf16 %v7891_v33 }
 0x42a   : > { %v1562_v52 = vpack.c.bf16 %v6525_v10, %v6520_v27  ;;  %v1566_v49 = vpack.c.bf16 %v6528_v43, %v6523_v15 }
 0x42b   : > { %v6529_v16 = vpop.trf.xlu1 }
 0x42c   : > { %v6533_v37 = vunpack.i.h.bf16 %v6529_v16  ;;  %v6530_v6 = vunpack.i.l.bf16 %v6529_v16  ;;  %v2408_v0 = vsel %vm1857_vm1, %v1562_v52, 0  ;;  %v2497_v57 = vsel %vm1857_vm1, %v1566_v49, 0 }
 0x42d   : > { %v6404_v16 = vunpack.i.l.bf16 %v7891_v33  ;;  %v6422_v33 = vunpack.i.h.bf16 %v7911_v14 }
 0x42f   : > { %v6534_v9 = vpop.trf.xlu1 }
 0x430   : > { %v6538_v54 = vunpack.i.h.bf16 %v6534_v9  ;;  %v6535_v11 = vunpack.i.l.bf16 %v6534_v9  ;;  %v6493_v9 = vunpack.i.l.bf16 %v7957_v38  ;;  %v8256_v38 = vld [vmem:[#allocation5 + $0xe0] sm:$0xff] }
 0x432   : > { %v1563_v34 = vpack.c.bf16 %v6535_v11, %v6530_v6  ;;  %v1567_v1 = vpack.c.bf16 %v6538_v54, %v6533_v37  ;;  %v1278_v54 = vpack.c.bf16 %v6402_v60, %v6397_v25  ;;  %v1275_v11 = vpack.c.bf16 %v6409_v2, %v6404_v16  ;;  %v8084_v2 = vld [vmem:[#allocation5 + $0x58] sm:$0xff] }
 0x433   : > { %v6539_v20 = vpop.trf.xlu1  ;;  %v1827_v46 = vpack.c.bf16 %v6493_v9, %v6488_v45  ;;  %v6473_v6 = vunpack.i.l.bf16 %v7939_v8  ;;  %v8094_v9 = vld [vmem:[#allocation5 + $0x30] sm:$0xff] }
 0x434   : > { %v6543_v18 = vunpack.i.h.bf16 %v6539_v20  ;;  %v6540_v19 = vunpack.i.l.bf16 %v6539_v20  ;;  %v2411_v36 = vsel %vm1857_vm1, %v1563_v34, 0  ;;  %v2500_v50 = vsel %vm1857_vm1, %v1567_v1, 0 }
 0x435   : > { %v1274_v20 = vpack.c.bf16 %v6399_v51, %v6394_v7 }
 0x437   : > { %v6544_v32 = vpop.trf.xlu1 }
 0x438   : > { %v6548_v22 = vunpack.i.h.bf16 %v6544_v32  ;;  %v6545_v53 = vunpack.i.l.bf16 %v6544_v32  ;;  %v6478_v32 = vunpack.i.l.bf16 %v7941_v39  ;;  %v8242_v39 = vld [vmem:[#allocation5 + $0xf0] sm:$0xff] }
 0x43a   : > { %v1564_v55 = vpack.c.bf16 %v6545_v53, %v6540_v19  ;;  %v1568_v30 = vpack.c.bf16 %v6548_v22, %v6543_v18  ;;  %v1279_v18 = vpack.c.bf16 %v6412_v47, %v6407_v29  ;;  %v6419_v19 = vunpack.i.l.bf16 %v7911_v14 }
 0x43b   : > { %v6417_v22 = vunpack.i.h.bf16 %v7899_v4  ;;  %v6414_v53 = vunpack.i.l.bf16 %v7899_v4  ;;  %v1826_v37 = vpack.c.bf16 %v6483_v21, %v6478_v32  ;;  %v6501_v4 = vunpack.i.h.bf16 %v7963_v48  ;;  %v8110_v32 = vld [vmem:[#allocation5 + $0x70] sm:$0xff] }
 0x43c   : > { %6025 = vmatprep.subr.msk.bf16.mxu1 %vm1857_vm1, %v1564_v55  ;;  %6029 = vmatprep.subr.msk.bf16.mxu0 %vm1857_vm1, %v1568_v30  ;;  %v2414_v40 = vsel %vm1857_vm1, %v1564_v55, 0  ;;  %v2503_v12 = vsel %vm1857_vm1, %v1568_v30, 0 }
 0x43d   : > { %5770 = vmatpush3.bf16.xpose.msra.mxu1 %v2414_v40  ;;  %5786 = vmatpush3.bf16.xpose.msra.mxu0 %v2503_v12  ;;  %v1276_v55 = vpack.c.bf16 %v6419_v19, %v6414_v53  ;;  %v1280_v30 = vpack.c.bf16 %v6422_v33, %v6417_v22  ;;  %v6468_v40 = vunpack.i.l.bf16 %v7931_v44  ;;  %v6506_v12 = vunpack.i.h.bf16 %v7971_v41  ;;  %v8050_v41 = vld [vmem:[#allocation5 + $0x10] sm:$0xff]  ;;  %v8230_v44 = vld [vmem:[#allocation5 + $0xa0] sm:$0xff] }
 0x43e   : > { %6026 = vmatprep.subr.msk.bf16.mxu1 %vm1857_vm1, %v1563_v34  ;;  %6030 = vmatprep.subr.msk.bf16.mxu0 %vm1857_vm1, %v1567_v1  ;;  %v8037_v34 = vpop.trf.xlu0 }
 0x43f   : > { %v1825_v14 = vpack.c.bf16 %v6473_v6, %v6468_v40  ;;  %9701 = vst [vmem:[#allocation24_spill] sm:$0xff] %v8037_v34  ;;  %v8039_v1 = vpack.c.bf16 %v6506_v12, %v6501_v4  ;;  %v8124_v40 = vld [vmem:[#allocation5 + $0x60] sm:$0xff] }
 0x441   : > { %9702 = vst [vmem:[#allocation25_spill] sm:$0xff] %v8039_v1 }
 0x442   : > { %v8042_v43 = vpop.trf.xlu0 }
 0x443   : > { %9703 = vst [vmem:[#allocation26_spill] sm:$0xff] %v8042_v43 }
 0x445   : > { %5772 = vmatpush3.bf16.xpose.msra.mxu1 %v2411_v36  ;;  %5788 = vmatpush3.bf16.xpose.msra.mxu0 %v2500_v50  ;;  %v8052_v36 = vld [vmem:[#allocation5 + $0x50] sm:$0xff] }
 0x446   : > { %6027 = vmatprep.subr.msk.bf16.mxu1 %vm1857_vm1, %v1562_v52  ;;  %6031 = vmatprep.subr.msk.bf16.mxu0 %vm1857_vm1, %v1566_v49  ;;  %v8044_v10 = vpop.trf.xlu0  ;;  %v8056_v49 = vld [vmem:[#allocation5] sm:$0xff] }
 0x447   : > { %9704 = vst [vmem:[#allocation27_spill] sm:$0xff] %v8044_v10 }
 0x44a   : > { %v8046_v15 = vpop.trf.xlu0 }
 0x44b   : > { %9705 = vst [vmem:[#allocation28_spill] sm:$0xff] %v8046_v15 }
 0x44d   : > { %5774 = vmatpush3.bf16.xpose.msra.mxu1 %v2408_v0  ;;  %5790 = vmatpush3.bf16.xpose.msra.mxu0 %v2497_v57 }
 0x44e   : > { %6028 = vmatprep.subr.msk.bf16.mxu1 %vm1857_vm1, %v1561_v13  ;;  %6032 = vmatprep.subr.msk.bf16.mxu0 %vm1857_vm1, %v1565_v31  ;;  %v8048_v27 = vpop.trf.xlu0 }
 0x44f   : > { %9706 = vst [vmem:[#allocation29_spill] sm:$0xff] %v8048_v27 }
 0x452   : > { %v8054_v48 = vpop.trf.xlu0 }
 0x453   : > { %9707 = vst [vmem:[#allocation30_spill] sm:$0xff] %v8054_v48 }
 0x455   : > { %5776 = vmatpush3.bf16.xpose.msra.mxu1 %v2405_v59  ;;  %5792 = vmatpush3.bf16.xpose.msra.mxu0 %v2494_v56  ;;  %v8075_v59 = vld [vmem:[#allocation5 + $0x8] sm:$0xff]  ;;  %v8077_v56 = vld [vmem:[#allocation5 + $0x40] sm:$0xff] }
 0x456   : > { %5801 = vmatprep.subr.bf16.mxu0 %v1828_v62  ;;  %v8073_v17 = vpop.trf.xlu0 }
 0x457   : > { %9708 = vst [vmem:[#allocation31_spill] sm:$0xff] %v8073_v17 }
 0x45a   : > { %v8092_v29 = vpop.trf.xlu0 }
 0x45b   : > { %9709 = vst [vmem:[#allocation32_spill] sm:$0xff] %v8092_v29 }
 0x45c   : > { %5778 = vmatmul.mubr.msk.bf16.vlgmr.msra.gmra.mxu1 %vm1857_vm1, %v1274_v20  ;;  %5794 = vmatmul.mubr.msk.bf16.vlgmr.msra.gmra.mxu0 %vm1857_vm1, %v1278_v54 }
 0x45d   : > { %5781 = vmatprep.mubr.msk.bf16.mxu1 %vm1857_vm1, %v1275_v11  ;;  %5797 = vmatprep.mubr.msk.bf16.mxu0 %vm1857_vm1, %v1279_v18 }
 0x45e   : > { %5802 = vmatpush3.bf16.msra.mxu0 %v1828_v62 }
 0x45f   : > { %5803 = vmatprep.subr.bf16.mxu0 %v1827_v46 }
 0x462   : > { %5804 = vmatpush3.bf16.msra.mxu0 %v1827_v46  ;;  %v8103_v46 = vld [vmem:[#allocation5 + $0x20] sm:$0xff] }
 0x463   : > { %5805 = vmatprep.subr.bf16.mxu0 %v1826_v37 }
 0x464   : > { %5782 = vmatmul.mubr.msk.bf16.gmra.mxu1 %vm1857_vm1, %v1276_v55  ;;  %5798 = vmatmul.mubr.msk.bf16.gmra.mxu0 %vm1857_vm1, %v1280_v30 }
 0x466   : > { %5806 = vmatpush3.bf16.msra.mxu0 %v1826_v37  ;;  %v8117_v37 = vld [vmem:[#allocation5 + $0x48] sm:$0xff] }
 0x467   : > { %5807 = vmatprep.subr.bf16.mxu0 %v1825_v14 }
 0x46a   : > { %5808 = vmatpush3.bf16.msra.mxu0 %v1825_v14 }
 0x46b   : > { %5817 = vmatprep.subr.bf16.mxu0 %v8039_v1 }
 0x47d   : > { %v5683_v50 = vpop.f32.mrf.mxu1  ;;  %v5699_v52 = vpop.f32.mrf.mxu0 }
 0x47e   : > { %v8059_v23 = vadd.f32 %v5683_v50, %v8050_v41  ;;  %v8062_v35 = vadd.f32 %v5699_v52, %v8052_v36  ;;  %v8131_v50 = vld [vmem:[#allocation5 + $0x38] sm:$0xff] }
 0x47f   : > { %v1916_v24 = vpop.f32.mrf.mxu1  ;;  %v2005_v0 = vpop.f32.mrf.mxu0 }
 0x480   : > { %v8067_v57 = vadd.f32 %v8056_v49, %v1916_v24  ;;  %v2697_v13 = vsel %vm2666_vm2, %v8062_v35, -inf  ;;  %v2673_v31 = vsel %vm2666_vm2, %v8059_v23, -inf  ;;  %v8090_v7 = vadd.f32 %v8077_v56, %v2005_v0 }
 0x481   : > { %2698 = vmax.xlane.f32.xlu1 %v2697_v13  ;;  %2674 = vmax.xlane.f32.xlu0 %v2673_v31  ;;  %v5684_v58 = vpop.f32.mrf.mxu1  ;;  %v5700_v47 = vpop.f32.mrf.mxu0 }
 0x482   : > { %v8080_v62 = vadd.f32 %v5684_v58, %v8064_v28  ;;  %v2667_v60 = vsel %vm2666_vm2, %v8067_v57, -inf  ;;  %v8099_v11 = vadd.f32 %v5700_v47, %v8084_v2  ;;  %v2691_v21 = vsel %vm2666_vm2, %v8090_v7, -inf  ;;  %v8143_v58 = vld [vmem:[#allocation5 + $0x28] sm:$0xff] }
 0x483   : > { %v1919_v51 = vpop.f32.mrf.mxu1  ;;  %v2008_v20 = vpop.f32.mrf.mxu0 }
 0x484   : > { %v8087_v25 = vadd.f32 %v8075_v59, %v1919_v51  ;;  %v2676_v18 = vsel %vm2666_vm2, %v8080_v62, -inf  ;;  %v2700_v22 = vsel %vm2666_vm2, %v8099_v11, -inf  ;;  %v8127_v14 = vadd.f32 %v8117_v37, %v2008_v20 }
 0x485   : > { %2668 = vmax.xlane.f32.xlu0 %v2667_v60  ;;  %v5687_v16 = vpop.f32.mrf.mxu1  ;;  %v5703_v19 = vpop.f32.mrf.mxu0  ;;  %v6587_v60 = vunpack.i.l.bf16 %v8092_v29  ;;  %v6582_v51 = vunpack.i.l.bf16 %v8073_v17  ;;  %v8228_v17 = vld [vmem:[#allocation5 + $0xc8] sm:$0xff] }
 0x486   : > { %v2670_v54 = vsel %vm2666_vm2, %v8087_v25, -inf  ;;  %v8108_v33 = vadd.f32 %v5687_v16, %v8094_v9  ;;  %v8120_v6 = vadd.f32 %v5703_v19, %v8110_v32  ;;  %v2694_v0 = vsel %vm2666_vm2, %v8127_v14, -inf }
 0x487   : > { %2671 = vmax.xlane.f32.xlu1 %v2670_v54  ;;  %v1932_v45 = vpop.f32.mrf.mxu1  ;;  %v2021_v30 = vpop.f32.mrf.mxu0  ;;  %v1836_v16 = vpack.c.bf16 %v6587_v60, %v6582_v51  ;;  %v6572_v19 = vunpack.i.l.bf16 %v8048_v27  ;;  %v8169_v51 = vld [vmem:[#allocation5 + $0x80] sm:$0xff] }
 0x488   : > { %v8115_v53 = vadd.f32 %v8103_v46, %v1932_v45  ;;  %v2685_v55 = vsel %vm2666_vm2, %v8108_v33, -inf  ;;  %v8134_v52 = vadd.f32 %v8124_v40, %v2021_v30  ;;  %v2709_v24 = vsel %vm2666_vm2, %v8120_v6, -inf  ;;  %v8154_v45 = vld [vmem:[#allocation5 + $0x78] sm:$0xff] }
 0x489   : > { %2677 = vmax.xlane.f32.xlu0 %v2676_v18  ;;  %v5688_v4 = vpop.f32.mrf.mxu1  ;;  %v5704_v18 = vpop.f32.mrf.mxu0  ;;  %5833 = vmatprep.subr.bf16.mxu1 %v1836_v16 }
 0x48a   : > { %v2679_v12 = vsel %vm2666_vm2, %v8115_v53, -inf  ;;  %v8141_v13 = vadd.f32 %v5688_v4, %v8131_v50  ;;  %v2703_v47 = vsel %vm2666_vm2, %v8134_v52, -inf  ;;  %5834 = vmatpush3.bf16.msra.mxu1 %v1836_v16 }
 0x48b   : > { %2692 = vmax.xlane.f32.xlu1 %v2691_v21  ;;  %v1935_v31 = vpop.f32.mrf.mxu1  ;;  %v6577_v21 = vunpack.i.l.bf16 %v8054_v48  ;;  %v2024_v4 = vpop.f32.mrf.mxu0  ;;  %v8216_v48 = vld [vmem:[#allocation5 + $0xb0] sm:$0xff] }
 0x48c   : > { %v2688_v20 = vsel %vm2666_vm2, %v8141_v13, -inf  ;;  %v8152_v54 = vadd.f32 %v8143_v58, %v1935_v31  ;;  %v6562_v31 = vunpack.i.l.bf16 %v8044_v10 }
 0x48d   : > { %2701 = vmax.xlane.f32.xlu0 %v2700_v22  ;;  %v1835_v22 = vpack.c.bf16 %v6577_v21, %v6572_v19 }
 0x48e   : > { %v2682_v30 = vsel %vm2666_vm2, %v8152_v54, -inf }
 0x48f   : > { %2686 = vmax.xlane.f32.xlu1 %v2685_v55  ;;  %v8159_v55 = vadd.f32 %v5704_v18, %v8154_v45  ;;  %5835 = vmatprep.subr.bf16.mxu1 %v1835_v22 }
 0x490   : > { %5836 = vmatpush3.bf16.msra.mxu1 %v1835_v22  ;;  %v6557_v22 = vunpack.i.l.bf16 %v8042_v43 }
 0x491   : > { %2680 = vmax.xlane.f32.xlu0 %v2679_v12  ;;  %v8163_v12 = vld [vmem:[#allocation5 + $0x90] sm:$0xff]  ;;  %v2712_v18 = vsel %vm2666_vm2, %v8159_v55, -inf }
 0x493   : > { %2710 = vmax.xlane.f32.xlu1 %v2709_v24  ;;  %v8165_v24 = vld [vmem:[#allocation5 + $0x68] sm:$0xff] }
 0x495   : > { %2695 = vmax.xlane.f32.xlu0 %v2694_v0  ;;  %v6567_v0 = vunpack.i.l.bf16 %v8046_v15  ;;  %v8214_v15 = vld [vmem:[#allocation5 + $0xd8] sm:$0xff] }
 0x497   : > { %2704 = vmax.xlane.f32.xlu1 %v2703_v47  ;;  %v1834_v47 = vpack.c.bf16 %v6567_v0, %v6562_v31 }
 0x499   : > { %2689 = vmax.xlane.f32.xlu0 %v2688_v20  ;;  %v8175_v20 = vadd.f32 %v8165_v24, %v2024_v4  ;;  %5837 = vmatprep.subr.bf16.mxu1 %v1834_v47 }
 0x49a   : > { %5838 = vmatpush3.bf16.msra.mxu1 %v1834_v47 }
 0x49b   : > { %v2706_v61 = vsel %vm2666_vm2, %v8175_v20, -inf }
 0x49d   : > { %2683 = vmax.xlane.f32.xlu0 %v2682_v30  ;;  %v5715_v60 = vpop.f32.mrf.mxu1  ;;  %v5731_v19 = vpop.f32.mrf.mxu0  ;;  %v6552_v30 = vunpack.i.l.bf16 %v8037_v34 }
 0x49e   : > { %v8172_v16 = vadd.f32 %v5715_v60, %v8163_v12  ;;  %v8191_v63 = vadd.f32 %v5731_v19, %v8179_v5 }
 0x49f   : > { %v2094_v21 = vpop.f32.mrf.mxu1  ;;  %v1833_v60 = vpack.c.bf16 %v6557_v22, %v6552_v30  ;;  %v2183_v10 = vpop.f32.mrf.mxu0 }
 0x4a0   : > { %v2721_v0 = vsel %vm2666_vm2, %v8172_v16, -inf  ;;  %v8188_v4 = vadd.f32 %v8169_v51, %v2094_v21  ;;  %9710 = vst [vmem:[#allocation33_spill] sm:$0xff] %v8191_v63  ;;  %v8200_v21 = vld [vmem:[#allocation5 + $0xc0] sm:$0xff]  ;;  %v2745_v22 = vsel %vm2666_vm2, %v8191_v63, -inf }
 0x4a1   : > { %2713 = vmax.xlane.f32.xlu0 %v2712_v18  ;;  %2722 = vmax.xlane.f32.xlu1 %v2721_v0  ;;  %v5716_v31 = vpop.f32.mrf.mxu1  ;;  %v8202_v18 = vld [vmem:[#allocation5 + $0x88] sm:$0xff]  ;;  %v8205_v19 = vadd.f32 %v8200_v21, %v2183_v10 }
 0x4a2   : > { %v2715_v34 = vsel %vm2666_vm2, %v8188_v4, -inf  ;;  %v8198_v43 = vadd.f32 %v5716_v31, %v8181_v3  ;;  %5839 = vmatprep.subr.bf16.mxu1 %v1833_v60  ;;  %v5732_v31 = vpop.f32.mrf.mxu0 }
 0x4a3   : > { %v2097_v47 = vpop.f32.mrf.mxu1  ;;  %5840 = vmatpush3.bf16.msra.mxu1 %v1833_v60  ;;  %9711 = vst [vmem:[#allocation34_spill] sm:$0xff] %v8205_v19 }
 0x4a4   : > { %v2724_v30 = vsel %vm2666_vm2, %v8198_v43, -inf  ;;  %v8212_v0 = vadd.f32 %v8202_v18, %v2097_v47  ;;  %v2186_v47 = vpop.f32.mrf.mxu0 }
 0x4a5   : > { %2707 = vmax.xlane.f32.xlu0 %v2706_v61  ;;  %2716 = vmax.xlane.f32.xlu1 %v2715_v34  ;;  %v5719_v27 = vpop.f32.mrf.mxu1  ;;  %v8219_v61 = vadd.f32 %v5732_v31, %v8214_v15  ;;  %v2739_v34 = vsel %vm2666_vm2, %v8205_v19, -inf  ;;  %v8279_v19 = vld [vmem:[#allocation5 + $0xe8] sm:$0xff] }
 0x4a6   : > { %9712 = vst [vmem:[#allocation35_spill] sm:$0xff] %v8212_v0  ;;  %v2718_v10 = vsel %vm2666_vm2, %v8212_v0, -inf  ;;  %v8226_v60 = vadd.f32 %v5719_v27, %v8216_v48  ;;  %v5735_v8 = vpop.f32.mrf.mxu0 }
 0x4a7   : > { %9713 = vst [vmem:[#allocation36_spill] sm:$0xff] %v8219_v61  ;;  %v2110_v29 = vpop.f32.mrf.mxu1 }
 0x4a8   : > { %9714 = vst [vmem:[#allocation37_spill] sm:$0xff] %v8226_v60  ;;  %v2733_v31 = vsel %vm2666_vm2, %v8226_v60, -inf  ;;  %v8240_v27 = vadd.f32 %v8230_v44, %v2110_v29  ;;  %v2199_v42 = vpop.f32.mrf.mxu0 }
 0x4a9   : > { %2746 = vmax.xlane.f32.xlu1 %v2745_v22  ;;  %2725 = vmax.xlane.f32.xlu0 %v2724_v30  ;;  %v8233_v22 = vadd.f32 %v8228_v17, %v2186_v47  ;;  %v2748_v30 = vsel %vm2666_vm2, %v8219_v61, -inf  ;;  %v5720_v1 = vpop.f32.mrf.mxu1  ;;  %v8258_v61 = vld [vmem:[#allocation5 + $0xa8] sm:$0xff] }
 0x4aa   : > { %9716 = vst [vmem:[#allocation39_spill] sm:$0xff] %v8240_v27  ;;  %v2727_v47 = vsel %vm2666_vm2, %v8240_v27, -inf  ;;  %v8254_v29 = vadd.f32 %v5720_v1, %v8244_v26  ;;  %v5736_v27 = vpop.f32.mrf.mxu0 }
 0x4ab   : > { %9715 = vst [vmem:[#allocation38_spill] sm:$0xff] %v8233_v22  ;;  %v2113_v60 = vpop.f32.mrf.mxu1 }
 0x4ac   : > { %9718 = vst [vmem:[#allocation41_spill] sm:$0xff] %v8254_v29  ;;  %v8268_v1 = vadd.f32 %v8258_v61, %v2113_v60 }
 0x4ad   : > { %2740 = vmax.xlane.f32.xlu1 %v2739_v34  ;;  %2719 = vmax.xlane.f32.xlu0 %v2718_v10  ;;  %v8247_v34 = vadd.f32 %v5735_v8, %v8242_v39  ;;  %v2742_v10 = vsel %vm2666_vm2, %v8233_v22, -inf  ;;  %v8261_v8 = vadd.f32 %v8256_v38, %v2199_v42  ;;  %v8270_v22 = vld [vmem:[#allocation5 + $0xf8] sm:$0xff] }
 0x4af   : > { %9717 = vst [vmem:[#allocation40_spill] sm:$0xff] %v8247_v34  ;;  %9719 = vst [vmem:[#allocation42_spill] sm:$0xff] %v8261_v8  ;;  %v2751_v42 = vsel %vm2666_vm2, %v8261_v8, -inf }
 0x4b1   : > { %2749 = vmax.xlane.f32.xlu0 %v2748_v30  ;;  %2734 = vmax.xlane.f32.xlu1 %v2733_v31  ;;  %v2757_v30 = vsel %vm2666_vm2, %v8247_v34, -inf  ;;  %v2736_v31 = vsel %vm2666_vm2, %v8254_v29, -inf  ;;  %v2202_v34 = vpop.f32.mrf.mxu0 }
 0x4b2   : > { %v8282_v60 = vadd.f32 %v8279_v19, %v2202_v34 }
 0x4b4   : > { %9720 = vst [vmem:[#allocation43_spill] sm:$0xff] %v8282_v60 }
 0x4b5   : > { %2743 = vmax.xlane.f32.xlu0 %v2742_v10  ;;  %2728 = vmax.xlane.f32.xlu1 %v2727_v47  ;;  %v8273_v10 = vadd.f32 %v5736_v27, %v8270_v22  ;;  %v2730_v47 = vsel %vm2666_vm2, %v8268_v1, -inf  ;;  %v2754_v27 = vsel %vm2666_vm2, %v8282_v60, -inf }
 0x4b9   : > { %2758 = vmax.xlane.f32.xlu1 %v2757_v30  ;;  %2737 = vmax.xlane.f32.xlu0 %v2736_v31  ;;  %v2760_v30 = vsel %vm2666_vm2, %v8273_v10, -inf }
 0x4bd   : > { %2752 = vmax.xlane.f32.xlu1 %v2751_v42  ;;  %2731 = vmax.xlane.f32.xlu0 %v2730_v47 }
 0x4c1   : > { %2761 = vmax.xlane.f32.xlu0 %v2760_v30 }
 0x4c5   : > { %2755 = vmax.xlane.f32.xlu0 %v2754_v27 }
 0x4dc   : > { %v5747_v31 = vpop.f32.mrf.mxu1  ;;  %v5763_v8 = vpop.f32.mrf.mxu0 }
 0x4dd   : > { %v8289_v29 = vadd.f32 %v5747_v31, %v8050_v41  ;;  %v8300_v27 = vadd.f32 %v5763_v8, %v8052_v36 }
 0x4de   : > { %v2272_v0 = vpop.f32.mrf.mxu1  ;;  %v2361_v63 = vpop.f32.mrf.mxu0 }
 0x4df   : > { %9721 = vst [vmem:[#allocation44_spill] sm:$0xff] %v8289_v29  ;;  %v8292_v42 = vadd.f32 %v8056_v49, %v2272_v0  ;;  %v2769_v34 = vsel %vm2666_vm2, %v8289_v29, -inf  ;;  %9724 = vst [vmem:[#allocation47_spill] sm:$0xff] %v8300_v27  ;;  %v2793_v8 = vsel %vm2666_vm2, %v8300_v27, -inf }
 0x4e0   : > { %2770 = vmax.xlane.f32.xlu1 %v2769_v34  ;;  %v5748_v47 = vpop.f32.mrf.mxu1  ;;  %v5764_v60 = vpop.f32.mrf.mxu0 }
 0x4e1   : > { %9722 = vst [vmem:[#allocation45_spill] sm:$0xff] %v8292_v42  ;;  %v8297_v30 = vadd.f32 %v5748_v47, %v8064_v28  ;;  %v2763_v41 = vsel %vm2666_vm2, %v8292_v42, -inf  ;;  %v8310_v28 = vadd.f32 %v8077_v56, %v2361_v63  ;;  %v8313_v36 = vadd.f32 %v5764_v60, %v8084_v2 }
 0x4e2   : > { %v2275_v31 = vpop.f32.mrf.mxu1  ;;  %v2364_v42 = vpop.f32.mrf.mxu0 }
 0x4e3   : > { %9723 = vst [vmem:[#allocation46_spill] sm:$0xff] %v8297_v30  ;;  %v2772_v49 = vsel %vm2666_vm2, %v8297_v30, -inf  ;;  %v8307_v0 = vadd.f32 %v8075_v59, %v2275_v31  ;;  %9726 = vst [vmem:[#allocation49_spill] sm:$0xff] %v8310_v28  ;;  %v8320_v59 = vadd.f32 %v8117_v37, %v2364_v42  ;;  %v2787_v63 = vsel %vm2666_vm2, %v8310_v28, -inf }
 0x4e4   : > { %2764 = vmax.xlane.f32.xlu1 %v2763_v41  ;;  %2773 = vmax.xlane.f32.xlu0 %v2772_v49  ;;  %v5751_v34 = vpop.f32.mrf.mxu1  ;;  %9727 = vst [vmem:[#allocation50_spill] sm:$0xff] %v8313_v36  ;;  %v2796_v56 = vsel %vm2666_vm2, %v8313_v36, -inf  ;;  %v5767_v41 = vpop.f32.mrf.mxu0 }
 0x4e5   : > { %9725 = vst [vmem:[#allocation48_spill] sm:$0xff] %v8307_v0  ;;  %v2766_v47 = vsel %vm2666_vm2, %v8307_v0, -inf  ;;  %9728 = vst [vmem:[#allocation51_spill] sm:$0xff] %v8320_v59  ;;  %v8327_v2 = vadd.f32 %v5751_v34, %v8094_v9  ;;  %v2790_v37 = vsel %vm2666_vm2, %v8320_v59, -inf  ;;  %v8340_v9 = vadd.f32 %v5767_v41, %v8110_v32 }
 0x4e6   : > { %v2288_v30 = vpop.f32.mrf.mxu1 }
 0x4e7   : > { %v8330_v31 = vadd.f32 %v8103_v46, %v2288_v30  ;;  %v2781_v42 = vsel %vm2666_vm2, %v8327_v2, -inf  ;;  %v2805_v32 = vsel %vm2666_vm2, %v8340_v9, -inf }
 0x4e8   : > { %2794 = vmax.xlane.f32.xlu1 %v2793_v8  ;;  %2767 = vmax.xlane.f32.xlu0 %v2766_v47  ;;  %v5752_v60 = vpop.f32.mrf.mxu1  ;;  %v2377_v47 = vpop.f32.mrf.mxu0 }
 0x4e9   : > { %v8337_v49 = vadd.f32 %v5752_v60, %v8131_v50  ;;  %v2775_v46 = vsel %vm2666_vm2, %v8330_v31, -inf  ;;  %v8350_v50 = vadd.f32 %v8124_v40, %v2377_v47 }
 0x4ea   : > { %v2291_v8 = vpop.f32.mrf.mxu1 }
 0x4eb   : > { %v2784_v30 = vsel %vm2666_vm2, %v8337_v49, -inf  ;;  %v8347_v34 = vadd.f32 %v8143_v58, %v2291_v8 }
 0x4ec   : > { %2788 = vmax.xlane.f32.xlu1 %v2787_v63  ;;  %2797 = vmax.xlane.f32.xlu0 %v2796_v56  ;;  %v5768_v63 = vpop.f32.mrf.mxu0 }
 0x4ed   : > { %v8353_v56 = vadd.f32 %v5768_v63, %v8154_v45  ;;  %v2778_v60 = vsel %vm2666_vm2, %v8347_v34, -inf }
 0x4ee   : > { %v2380_v41 = vpop.f32.mrf.mxu0 }
 0x4ef   : > { %v8360_v58 = vadd.f32 %v8165_v24, %v2380_v41  ;;  %v2808_v40 = vsel %vm2666_vm2, %v8353_v56, -inf }
 0x4f0   : > { %2791 = vmax.xlane.f32.xlu0 %v2790_v37  ;;  %2782 = vmax.xlane.f32.xlu1 %v2781_v42  ;;  %v2799_v37 = vsel %vm2666_vm2, %v8350_v50, -inf }
 0x4f1   : > { %9729 = vst [vmem:[#allocation52_spill] sm:$0xff] %v8360_v58  ;;  %v2802_v45 = vsel %vm2666_vm2, %v8360_v58, -inf }
 0x4f4   : > { %2776 = vmax.xlane.f32.xlu1 %v2775_v46  ;;  %2785 = vmax.xlane.f32.xlu0 %v2784_v30 }
 0x4f8   : > { %2806 = vmax.xlane.f32.xlu1 %v2805_v32  ;;  %2779 = vmax.xlane.f32.xlu0 %v2778_v60 }
 0x4fc   : > { %2800 = vmax.xlane.f32.xlu1 %v2799_v37  ;;  %2809 = vmax.xlane.f32.xlu0 %v2808_v40 }
 0x500   : > { %2803 = vmax.xlane.f32.xlu0 %v2802_v45 }
 0x50a   : > { %v2675_v42 = vpop.xlane.xlu0 %2674  ;;  %v8370_v30 = vpop.xlane.xlu1 %2698 }
 0x50e   : > { %v2669_v8 = vpop.xlane.xlu0 %2668 }
 0x510   : > { %v8374_v32 = vpop.xlane.xlu1 %2671 }
 0x512   : > { %v2678_v47 = vpop.xlane.xlu0 %2677 }
 0x516   : > { %v8368_v46 = vpop.xlane.xlu0 %2701 }
 0x51a   : > { %v8372_v24 = vpop.xlane.xlu0 %2680 }
 0x51c   : > { %v5779_v63 = vpop.f32.mrf.mxu1  ;;  %v5795_v41 = vpop.f32.mrf.mxu0 }
 0x51d   : > { %v8377_v60 = vadd.f32 %v5779_v63, %v8163_v12  ;;  %v2693_v63 = vpop.xlane.xlu1 %2692  ;;  %v8392_v58 = vadd.f32 %v5795_v41, %v8179_v5 }
 0x51e   : > { %v8379_v37 = vpop.xlane.xlu0 %2695  ;;  %v2450_v40 = vpop.f32.mrf.mxu1 }
 0x51f   : > { %9730 = vst [vmem:[#allocation53_spill] sm:$0xff] %v8377_v60  ;;  %v8382_v45 = vadd.f32 %v8169_v51, %v2450_v40  ;;  %v2817_v59 = vsel %vm2666_vm2, %v8377_v60, -inf  ;;  %v2539_v28 = vpop.f32.mrf.mxu0  ;;  %v2861_v60 = vsub.f32 %v8059_v23, %v2675_v42  ;;  %v2841_v41 = vsel %vm2666_vm2, %v8392_v58, -inf }
 0x520   : > { %v5780_v36 = vpop.f32.mrf.mxu1  ;;  %2818 = vmax.xlane.f32.xlu1 %v2817_v59  ;;  %v8405_v5 = vadd.f32 %v8200_v21, %v2539_v28  ;;  %v2862_v28 = vsub.f32 %v8080_v62, %v2678_v47 }
 0x521   : > { %9731 = vst [vmem:[#allocation54_spill] sm:$0xff] %v8382_v45  ;;  %v8387_v0 = vadd.f32 %v5780_v36, %v8181_v3  ;;  %v2811_v51 = vsel %vm2666_vm2, %v8382_v45, -inf  ;;  %v5796_v59 = vpop.f32.mrf.mxu0  ;;  %v2687_v45 = vpop.xlane.xlu1 %2686  ;;  %v2927_v21 = vmul.f32 1.442695, %v2861_v60 }
 0x522   : > { %v8389_v27 = vpop.xlane.xlu0 %2689  ;;  %v2453_v12 = vpop.f32.mrf.mxu1 }
 0x523   : > { %9732 = vst [vmem:[#allocation55_spill] sm:$0xff] %v8387_v0  ;;  %v8395_v29 = vadd.f32 %v8202_v18, %v2453_v12  ;;  %v2820_v40 = vsel %vm2666_vm2, %v8387_v0, -inf  ;;  %v8408_v18 = vadd.f32 %v5796_v59, %v8214_v15  ;;  %v2542_v0 = vpop.f32.mrf.mxu0  ;;  %v2835_v59 = vsel %vm2666_vm2, %v8405_v5, -inf }
 0x524   : > { %2812 = vmax.xlane.f32.xlu1 %v2811_v51  ;;  %2821 = vmax.xlane.f32.xlu0 %v2820_v40  ;;  %v5783_v3 = vpop.f32.mrf.mxu1  ;;  %v2859_v40 = vsub.f32 %v8067_v57, %v2669_v8  ;;  %v8419_v15 = vadd.f32 %v8228_v17, %v2542_v0  ;;  %v2869_v8 = vsub.f32 %v8062_v35, %v8370_v30  ;;  %6805 = vpow2.f32 %v2927_v21 }
 0x525   : > { %v2814_v12 = vsel %vm2666_vm2, %v8395_v29, -inf  ;;  %v8422_v42 = vadd.f32 %v5783_v3, %v8216_v48  ;;  %v2860_v48 = vsub.f32 %v8087_v25, %v8374_v32  ;;  %v2929_v17 = vmul.f32 1.442695, %v2862_v28  ;;  %v8434_v0 = vpop.xlane.xlu1 %2710 }
 0x526   : > { %v8401_v36 = vpop.xlane.xlu0 %2683  ;;  %v2466_v51 = vpop.f32.mrf.mxu1  ;;  %v2923_v62 = vmul.f32 1.442695, %v2859_v40  ;;  %v2943_v25 = vmul.f32 1.442695, %v2869_v8  ;;  %v2867_v32 = vsub.f32 %v8090_v7, %v2693_v63 }
 0x527   : > { %v8437_v60 = vadd.f32 %v8230_v44, %v2466_v51  ;;  %v2829_v35 = vsel %vm2666_vm2, %v8422_v42, -inf  ;;  %v2925_v44 = vmul.f32 1.442695, %v2860_v48 }
 0x528   : > { %2842 = vmax.xlane.f32.xlu1 %v2841_v41  ;;  %2815 = vmax.xlane.f32.xlu0 %v2814_v12  ;;  %v2844_v41 = vsel %vm2666_vm2, %v8408_v18, -inf  ;;  %v5799_v12 = vpop.f32.mrf.mxu0  ;;  %v5784_v57 = vpop.f32.mrf.mxu1  ;;  %6807 = vpow2.f32 %v2923_v62  ;;  %v2939_v63 = vmul.f32 1.442695, %v2867_v32 }
 0x529   : > { %v8440_v3 = vadd.f32 %v5784_v57, %v8244_v26  ;;  %6809 = vpow2.f32 %v2929_v17  ;;  %v2870_v26 = vsub.f32 %v8099_v11, %v8368_v46  ;;  %v8452_v51 = vadd.f32 %v5799_v12, %v8242_v39  ;;  %v2705_v46 = vpop.xlane.xlu1 %2704 }
 0x52a   : > { %v8415_v23 = vpop.xlane.xlu0 %2713  ;;  %v2555_v30 = vpop.f32.mrf.mxu0  ;;  %6811 = vpow2.f32 %v2943_v25  ;;  %v2865_v39 = vsub.f32 %v8108_v33, %v2687_v45 }
 0x52b   : > { %v2469_v40 = vpop.f32.mrf.mxu1  ;;  %v2832_v57 = vsel %vm2666_vm2, %v8440_v3, -inf  ;;  %6813 = vpow2.f32 %v2925_v44  ;;  %v2945_v11 = vmul.f32 1.442695, %v2870_v26  ;;  %v8467_v12 = vadd.f32 %v8256_v38, %v2555_v30 }
 0x52c   : > { %2836 = vmax.xlane.f32.xlu1 %v2835_v59  ;;  %2845 = vmax.xlane.f32.xlu0 %v2844_v41  ;;  %v2838_v59 = vsel %vm2666_vm2, %v8419_v15, -inf  ;;  %v8455_v28 = vadd.f32 %v8258_v61, %v2469_v40  ;;  %v2823_v41 = vsel %vm2666_vm2, %v8437_v60, -inf  ;;  %v5800_v7 = vpop.f32.mrf.mxu0  ;;  %v2868_v61 = vsub.f32 %v8127_v14, %v8379_v37 }
 0x52d   : > { %v8470_v62 = vadd.f32 %v5800_v7, %v8270_v22  ;;  %v2853_v48 = vsel %vm2666_vm2, %v8452_v51, -inf  ;;  %6815 = vpow2.f32 %v2939_v63  ;;  %v2935_v14 = vmul.f32 1.442695, %v2865_v39  ;;  %v8480_v22 = vpop.xlane.xlu1 %2722 }
 0x52e   : > { %v8430_v47 = vpop.xlane.xlu0 %2707  ;;  %9733 = vst [vmem:[#allocation56_spill] sm:$0xff] %v8455_v28  ;;  %v2826_v17 = vsel %vm2666_vm2, %v8455_v28, -inf  ;;  %6817 = vpow2.f32 %v2945_v11  ;;  %v2863_v38 = vsub.f32 %v8115_v53, %v8372_v24  ;;  %v2941_v37 = vmul.f32 1.442695, %v2868_v61 }
 0x52f   : > { %v2847_v40 = vsel %vm2666_vm2, %v8467_v12, -inf  ;;  %v2856_v25 = vsel %vm2666_vm2, %v8470_v62, -inf  ;;  %6819 = vpow2.f32 %v2935_v14 }
 0x530   : > { %2839 = vmax.xlane.f32.xlu0 %v2838_v59  ;;  %2830 = vmax.xlane.f32.xlu1 %v2829_v35  ;;  %v2558_v59 = vpop.f32.mrf.mxu0  ;;  %v2866_v35 = vsub.f32 %v8141_v13, %v8389_v27  ;;  %v2931_v32 = vmul.f32 1.442695, %v2863_v38  ;;  %v2873_v13 = vsub.f32 %v8120_v6, %v8434_v0  ;;  %6821 = vpow2.f32 %v2941_v37 }
 0x531   : > { %v8482_v45 = vpop.eup %6805  ;;  %v8487_v30 = vadd.f32 %v8279_v19, %v2558_v59  ;;  %v2864_v6 = vsub.f32 %v8152_v54, %v8401_v36 }
 0x532   : > { %v8447_v21 = vpop.xlane.xlu0 %2725  ;;  %v2937_v19 = vmul.f32 1.442695, %v2866_v35  ;;  %v3057_v44 = vsel %vm2666_vm2, %v8482_v45, 0.0  ;;  %6823 = vpow2.f32 %v2931_v32  ;;  %v2951_v63 = vmul.f32 1.442695, %v2873_v13 }
 0x533   : > { %v2850_v26 = vsel %vm2666_vm2, %v8487_v30, -inf  ;;  %v2933_v59 = vmul.f32 1.442695, %v2864_v6 }
 0x534   : > { %2824 = vmax.xlane.f32.xlu1 %v2823_v41  ;;  %2833 = vmax.xlane.f32.xlu0 %v2832_v57  ;;  %v8505_v41 = vpop.xlane.xlu1 %2716  ;;  %6825 = vpow2.f32 %v2937_v19 }
 0x535   : > { %v8495_v24 = vpop.eup %6807  ;;  %6827 = vpow2.f32 %v2951_v63  ;;  %v2877_v63 = vsub.f32 %v8172_v16, %v8480_v22  ;;  %v2875_v16 = vsub.f32 %v8188_v4, %v8505_v41 }
 0x536   : > { %v8461_v8 = vpop.xlane.xlu0 %2719  ;;  %v8499_v27 = vpop.eup %6809  ;;  %v3051_v11 = vsel %vm2666_vm2, %v8495_v24, 0.0  ;;  %6829 = vpow2.f32 %v2933_v59 }
 0x537   : > { %v8509_v7 = vpop.eup %6811  ;;  %v3060_v39 = vsel %vm2666_vm2, %v8499_v27, 0.0  ;;  %v2959_v59 = vmul.f32 1.442695, %v2877_v63 }
 0x538   : > { %2854 = vmax.xlane.f32.xlu1 %v2853_v48  ;;  %2827 = vmax.xlane.f32.xlu0 %v2826_v17  ;;  %v8513_v0 = vpop.eup %6813  ;;  %v2871_v17 = vsub.f32 %v8134_v52, %v2705_v46  ;;  %v2747_v14 = vpop.xlane.xlu1 %2746  ;;  %v3081_v38 = vsel %vm2666_vm2, %v8509_v7, 0.0  ;;  %v2874_v52 = vsub.f32 %v8159_v55, %v8415_v23 }
 0x539   : > { %v3054_v37 = vsel %vm2666_vm2, %v8513_v0, 0.0 }
 0x53a   : > { %v8476_v33 = vpop.xlane.xlu0 %2749  ;;  %v8519_v48 = vpop.eup %6815 }
 0x53b   : > { %v8523_v36 = vpop.eup %6817 }
 0x53c   : > { %2848 = vmax.xlane.f32.xlu1 %v2847_v40  ;;  %2857 = vmax.xlane.f32.xlu0 %v2856_v25  ;;  %v2947_v40 = vmul.f32 1.442695, %v2871_v17  ;;  %v8529_v25 = vpop.eup %6819  ;;  %v3084_v46 = vsel %vm2666_vm2, %v8523_v36, 0.0  ;;  %v2741_v13 = vpop.xlane.xlu1 %2740 }
 0x53d   : > { %v8537_v32 = vpop.eup %6821  ;;  %v3069_v55 = vsel %vm2666_vm2, %v8529_v25, 0.0 }
 0x53e   : > { %v8493_v53 = vpop.xlane.xlu0 %2743  ;;  %v3078_v23 = vsel %vm2666_vm2, %v8537_v32, 0.0 }
 0x53f   : > { %v8539_v19 = vpop.eup %6823 }
 0x540   : > { %3058 = vadd.xlane.f32.xlu1 %v3057_v44  ;;  %2851 = vmax.xlane.f32.xlu0 %v2850_v26  ;;  %v2953_v44 = vmul.f32 1.442695, %v2874_v52  ;;  %v2872_v26 = vsub.f32 %v8175_v20, %v8430_v47  ;;  %v3063_v20 = vsel %vm2666_vm2, %v8539_v19, 0.0  ;;  %v2878_v52 = vsub.f32 %v8198_v43, %v8447_v21  ;;  %v9736_v43 = vld [vmem:[#allocation35_spill] sm:$0xff] }
 0x541   : > { %v8547_v6 = vpop.eup %6825  ;;  %v2876_v21 = vsub.f32 %v9736_v43, %v8461_v8  ;;  %v9741_v43 = vld [vmem:[#allocation37_spill] sm:$0xff] }
 0x542   : > { %v8507_v57 = vpop.xlane.xlu0 %2737  ;;  %v3072_v47 = vsel %vm2666_vm2, %v8547_v6, 0.0 }
 0x544   : > { %3052 = vadd.xlane.f32.xlu1 %v3051_v11  ;;  %3061 = vadd.xlane.f32.xlu0 %v3060_v39  ;;  %v8551_v11 = vpop.xlane.xlu1 %2734  ;;  %v2949_v39 = vmul.f32 1.442695, %v2872_v26 }
 0x546   : > { %v2732_v61 = vpop.xlane.xlu0 %2731 }
 0x547   : > { %v2880_v54 = vsub.f32 %v8268_v1, %v2732_v61  ;;  %v3075_v1 = vsel %vm2666_vm2, %v8519_v48, 0.0  ;;  %v8557_v61 = vpop.eup %6827 }
 0x548   : > { %3082 = vadd.xlane.f32.xlu1 %v3081_v38  ;;  %3055 = vadd.xlane.f32.xlu0 %v3054_v37  ;;  %v8559_v17 = vpop.eup %6829  ;;  %v3093_v22 = vsel %vm2666_vm2, %v8557_v61, 0.0  ;;  %v8567_v38 = vpop.xlane.xlu1 %2728 }
 0x549   : > { %v2965_v35 = vmul.f32 1.442695, %v2880_v54  ;;  %v3066_v4 = vsel %vm2666_vm2, %v8559_v17, 0.0 }
 0x54b   : > { %6831 = vpow2.f32 %v2965_v35 }
 0x54c   : > { %3076 = vadd.xlane.f32.xlu1 %v3075_v1  ;;  %3085 = vadd.xlane.f32.xlu0 %v3084_v46  ;;  %6833 = vpow2.f32 %v2947_v40  ;;  %v2955_v40 = vmul.f32 1.442695, %v2875_v16  ;;  %v8577_v41 = vpop.xlane.xlu1 %2758  ;;  %v9735_v1 = vld [vmem:[#allocation33_spill] sm:$0xff]  ;;  %v2957_v16 = vmul.f32 1.442695, %v2876_v21  ;;  %v2881_v21 = vsub.f32 %v9741_v43, %v8551_v11  ;;  %v9745_v43 = vld [vmem:[#allocation39_spill] sm:$0xff] }
 0x54d   : > { %6835 = vpow2.f32 %v2953_v44  ;;  %v2885_v46 = vsub.f32 %v9735_v1, %v2747_v14  ;;  %v2961_v44 = vmul.f32 1.442695, %v2878_v52 }
 0x54e   : > { %6837 = vpow2.f32 %v2949_v39 }
 0x54f   : > { %6839 = vpow2.f32 %v2959_v59  ;;  %v2975_v63 = vmul.f32 1.442695, %v2885_v46 }
 0x550   : > { %3070 = vadd.xlane.f32.xlu1 %v3069_v55  ;;  %3079 = vadd.xlane.f32.xlu0 %v3078_v23  ;;  %6841 = vpow2.f32 %v2955_v40  ;;  %v8584_v23 = vpop.xlane.xlu0 %2761  ;;  %v8592_v14 = vpop.xlane.xlu1 %2752 }
 0x551   : > { %6843 = vpow2.f32 %v2961_v44 }
 0x552   : > { %6845 = vpow2.f32 %v2975_v63 }
 0x553   : > { %6847 = vpow2.f32 %v2957_v16  ;;  %v2967_v16 = vmul.f32 1.442695, %v2881_v21 }
 0x554   : > { %3064 = vadd.xlane.f32.xlu1 %v3063_v20  ;;  %3073 = vadd.xlane.f32.xlu0 %v3072_v47  ;;  %v9737_v47 = vld [vmem:[#allocation34_spill] sm:$0xff]  ;;  %v8599_v40 = vpop.xlane.xlu0 %2755 }
 0x555   : > { %v2883_v59 = vsub.f32 %v9737_v47, %v2741_v13 }
 0x557   : > { %v2971_v52 = vmul.f32 1.442695, %v2883_v59 }
 0x558   : > { %v8565_v54 = vpop.eup %6831  ;;  %3094 = vadd.xlane.f32.xlu0 %v3093_v22 }
 0x559   : > { %9734 = vst [vmem:[#allocation57_spill] sm:$0xff] %v8565_v54  ;;  %v3114_v37 = vsel %vm2666_vm2, %v8565_v54, 0.0  ;;  %v8571_v35 = vpop.eup %6833  ;;  %6849 = vpow2.f32 %v2971_v52 }
 0x55a   : > { %3115 = vadd.xlane.f32.xlu1 %v3114_v37  ;;  %v3087_v26 = vsel %vm2666_vm2, %v8571_v35, 0.0  ;;  %v8582_v55 = vpop.eup %6835 }
 0x55b   : > { %v3096_v39 = vsel %vm2666_vm2, %v8582_v55, 0.0  ;;  %v8590_v20 = vpop.eup %6837 }
 0x55c   : > { %3067 = vadd.xlane.f32.xlu0 %v3066_v4  ;;  %v3090_v22 = vsel %vm2666_vm2, %v8590_v20, 0.0  ;;  %v8597_v37 = vpop.eup %6839  ;;  %v9739_v4 = vld [vmem:[#allocation36_spill] sm:$0xff] }
 0x55d   : > { %9738 = vst [vmem:[#allocation33_spill] sm:$0xff] %v8597_v37  ;;  %v2886_v1 = vsub.f32 %v9739_v4, %v8476_v33  ;;  %v3105_v46 = vsel %vm2666_vm2, %v8597_v37, 0.0  ;;  %v8607_v13 = vpop.eup %6841  ;;  %v9746_v37 = vld [vmem:[#allocation41_spill] sm:$0xff] }
 0x55e   : > { %9740 = vst [vmem:[#allocation35_spill] sm:$0xff] %v8607_v13  ;;  %v8617_v47 = vpop.eup %6843 }
 0x55f   : > { %v2977_v63 = vmul.f32 1.442695, %v2886_v1  ;;  %9742 = vst [vmem:[#allocation34_spill] sm:$0xff] %v8617_v47  ;;  %v3108_v52 = vsel %vm2666_vm2, %v8617_v47, 0.0  ;;  %v8627_v1 = vpop.eup %6845 }
 0x560   : > { %3088 = vadd.xlane.f32.xlu0 %v3087_v26  ;;  %9744 = vst [vmem:[#allocation36_spill] sm:$0xff] %v8627_v1  ;;  %v8637_v21 = vpop.eup %6847 }
 0x561   : > { %6851 = vpow2.f32 %v2977_v63  ;;  %v3129_v63 = vsel %vm2666_vm2, %v8627_v1, 0.0 }
 0x562   : > { %6853 = vpow2.f32 %v2967_v16 }
 0x564   : > { %3097 = vadd.xlane.f32.xlu0 %v3096_v39  ;;  %v3099_v39 = vsel %vm2666_vm2, %v8607_v13, 0.0  ;;  %v2882_v13 = vsub.f32 %v9746_v37, %v8507_v57 }
 0x566   : > { %v8646_v16 = vpop.eup %6849 }
 0x567   : > { %v3123_v37 = vsel %vm2666_vm2, %v8646_v16, 0.0 }
 0x568   : > { %3091 = vadd.xlane.f32.xlu0 %v3090_v22  ;;  %v9743_v22 = vld [vmem:[#allocation38_spill] sm:$0xff] }
 0x569   : > { %v8601_v8 = vpop.xlane.xlu1 %2770  ;;  %v2884_v4 = vsub.f32 %v9743_v22, %v8493_v53 }
 0x56b   : > { %v2973_v28 = vmul.f32 1.442695, %v2884_v4 }
 0x56c   : > { %3106 = vadd.xlane.f32.xlu0 %v3105_v46 }
 0x56d   : > { %v8609_v44 = vpop.xlane.xlu1 %2764  ;;  %v8611_v26 = vpop.xlane.xlu0 %2773  ;;  %6855 = vpow2.f32 %v2973_v28  ;;  %v2969_v28 = vmul.f32 1.442695, %v2882_v13 }
 0x570   : > { %3100 = vadd.xlane.f32.xlu0 %v3099_v39  ;;  %v2879_v39 = vsub.f32 %v9745_v43, %v8567_v38  ;;  %v3102_v38 = vsel %vm2666_vm2, %v8637_v21, 0.0 }
 0x571   : > { %v8619_v33 = vpop.xlane.xlu1 %2794  ;;  %v8621_v59 = vpop.xlane.xlu0 %2767 }
 0x572   : > { %v2963_v54 = vmul.f32 1.442695, %v2879_v39 }
 0x574   : > { %3109 = vadd.xlane.f32.xlu0 %v3108_v52 }
 0x575   : > { %v8629_v11 = vpop.xlane.xlu1 %2788  ;;  %v8631_v46 = vpop.xlane.xlu0 %2797 }
 0x578   : > { %3130 = vadd.xlane.f32.xlu0 %v3129_v63 }
 0x579   : > { %v8639_v53 = vpop.xlane.xlu0 %2791  ;;  %v2783_v22 = vpop.xlane.xlu1 %2782 }
 0x57a   : > { %v2897_v52 = vsub.f32 %v8327_v2, %v2783_v22  ;;  %v9747_v2 = vld [vmem:[#allocation40_spill] sm:$0xff]  ;;  %v8654_v22 = vpop.eup %6851 }
 0x57b   : > { %v2889_v39 = vsub.f32 %v9747_v2, %v8577_v41  ;;  %v9748_v41 = vld [vmem:[#allocation42_spill] sm:$0xff]  ;;  %v8661_v13 = vpop.eup %6853 }
 0x57c   : > { %v2999_v47 = vmul.f32 1.442695, %v2897_v52  ;;  %3103 = vadd.xlane.f32.xlu0 %v3102_v38 }
 0x57d   : > { %v2777_v4 = vpop.xlane.xlu1 %2776  ;;  %v2786_v43 = vpop.xlane.xlu0 %2785 }
 0x57e   : > { %v2895_v63 = vsub.f32 %v8330_v31, %v2777_v4  ;;  %v2898_v1 = vsub.f32 %v8337_v49, %v2786_v43  ;;  %6857 = vpow2.f32 %v2999_v47  ;;  %v2983_v49 = vmul.f32 1.442695, %v2889_v39 }
 0x57f   : > { %6859 = vpow2.f32 %v2963_v54  ;;  %v2887_v47 = vsub.f32 %v9748_v41, %v8592_v14  ;;  %v3132_v54 = vsel %vm2666_vm2, %v8654_v22, 0.0  ;;  %v3117_v14 = vsel %vm2666_vm2, %v8661_v13, 0.0 }
 0x580   : > { %v2995_v57 = vmul.f32 1.442695, %v2895_v63  ;;  %v3001_v52 = vmul.f32 1.442695, %v2898_v1  ;;  %3124 = vadd.xlane.f32.xlu0 %v3123_v37 }
 0x581   : > { %v2807_v38 = vpop.xlane.xlu1 %2806  ;;  %v2780_v4 = vpop.xlane.xlu0 %2779  ;;  %v2979_v2 = vmul.f32 1.442695, %v2887_v47 }
 0x582   : > { %6861 = vpow2.f32 %v2995_v57  ;;  %v2905_v31 = vsub.f32 %v8340_v9, %v2807_v38  ;;  %v2896_v1 = vsub.f32 %v8347_v34, %v2780_v4  ;;  %v2890_v9 = vsub.f32 %v8273_v10, %v8584_v23  ;;  %v9749_v38 = vld [vmem:[#allocation43_spill] sm:$0xff] }
 0x583   : > { %6863 = vpow2.f32 %v2969_v28  ;;  %v8668_v28 = vpop.eup %6855  ;;  %v2888_v10 = vsub.f32 %v9749_v38, %v8599_v40  ;;  %v9750_v40 = vld [vmem:[#allocation44_spill] sm:$0xff] }
 0x584   : > { %6865 = vpow2.f32 %v3001_v52  ;;  %v3015_v43 = vmul.f32 1.442695, %v2905_v31  ;;  %3133 = vadd.xlane.f32.xlu0 %v3132_v54  ;;  %v2997_v57 = vmul.f32 1.442695, %v2896_v1  ;;  %v2985_v52 = vmul.f32 1.442695, %v2890_v9 }
 0x585   : > { %v2801_v63 = vpop.xlane.xlu1 %2800  ;;  %6867 = vpow2.f32 %v2983_v49  ;;  %v2810_v39 = vpop.xlane.xlu0 %2809  ;;  %v3126_v23 = vsel %vm2666_vm2, %v8668_v28, 0.0  ;;  %v2981_v54 = vmul.f32 1.442695, %v2888_v10 }
 0x586   : > { %6869 = vpow2.f32 %v3015_v43  ;;  %v2903_v37 = vsub.f32 %v8350_v50, %v2801_v63  ;;  %v2906_v49 = vsub.f32 %v8353_v56, %v2810_v39  ;;  %v2893_v43 = vsub.f32 %v9750_v40, %v8601_v8  ;;  %v9752_v8 = vld [vmem:[#allocation45_spill] sm:$0xff] }
 0x587   : > { %6871 = vpow2.f32 %v2979_v2  ;;  %v9751_v2 = vld [vmem:[#allocation52_spill] sm:$0xff] }
 0x588   : > { %3118 = vadd.xlane.f32.xlu0 %v3117_v14  ;;  %6873 = vpow2.f32 %v2997_v57  ;;  %v3011_v4 = vmul.f32 1.442695, %v2903_v37  ;;  %v3017_v9 = vmul.f32 1.442695, %v2906_v49  ;;  %v2991_v57 = vmul.f32 1.442695, %v2893_v43 }
 0x589   : > { %v2804_v41 = vpop.xlane.xlu0 %2803  ;;  %6875 = vpow2.f32 %v2985_v52  ;;  %v2891_v37 = vsub.f32 %v9752_v8, %v8609_v44 }
 0x58a   : > { %6877 = vpow2.f32 %v3011_v4  ;;  %v2904_v39 = vsub.f32 %v9751_v2, %v2804_v41 }
 0x58b   : > { %v8671_v34 = vpop.eup %6857  ;;  %6879 = vpow2.f32 %v2981_v54  ;;  %v2987_v49 = vmul.f32 1.442695, %v2891_v37  ;;  %v9756_v37 = vld [vmem:[#allocation48_spill] sm:$0xff] }
 0x58c   : > { %v8677_v31 = vpop.eup %6859  ;;  %3127 = vadd.xlane.f32.xlu0 %v3126_v23  ;;  %v3165_v50 = vsel %vm2666_vm2, %v8671_v34, 0.0  ;;  %6881 = vpow2.f32 %v3017_v9  ;;  %v3013_v10 = vmul.f32 1.442695, %v2904_v39  ;;  %v9754_v9 = vld [vmem:[#allocation47_spill] sm:$0xff] }
 0x58d   : > { %3166 = vadd.xlane.f32.xlu1 %v3165_v50  ;;  %v3111_v1 = vsel %vm2666_vm2, %v8677_v31, 0.0  ;;  %6883 = vpow2.f32 %v2991_v57  ;;  %v9753_v50 = vld [vmem:[#allocation46_spill] sm:$0xff] }
 0x58e   : > { %v2894_v41 = vsub.f32 %v9753_v50, %v8611_v26  ;;  %6885 = vpow2.f32 %v3013_v10  ;;  %v2901_v26 = vsub.f32 %v9754_v9, %v8619_v33 }
 0x58f   : > { %v8682_v47 = vpop.eup %6861  ;;  %6887 = vpow2.f32 %v2987_v49 }
 0x590   : > { %v3159_v63 = vsel %vm2666_vm2, %v8682_v47, 0.0  ;;  %v8690_v56 = vpop.eup %6863  ;;  %3112 = vadd.xlane.f32.xlu0 %v3111_v1  ;;  %v3007_v8 = vmul.f32 1.442695, %v2901_v26 }
 0x591   : > { %v8693_v14 = vpop.eup %6865  ;;  %3160 = vadd.xlane.f32.xlu1 %v3159_v63  ;;  %v3120_v52 = vsel %vm2666_vm2, %v8690_v56, 0.0  ;;  %v2993_v63 = vmul.f32 1.442695, %v2894_v41  ;;  %v9758_v41 = vld [vmem:[#allocation49_spill] sm:$0xff] }
 0x592   : > { %v8699_v38 = vpop.eup %6867  ;;  %v3168_v23 = vsel %vm2666_vm2, %v8693_v14, 0.0 }
 0x593   : > { %v8703_v4 = vpop.eup %6869  ;;  %v3141_v44 = vsel %vm2666_vm2, %v8699_v38, 0.0  ;;  %6889 = vpow2.f32 %v2993_v63 }
 0x594   : > { %3121 = vadd.xlane.f32.xlu0 %v3120_v52  ;;  %v8709_v54 = vpop.eup %6871  ;;  %v3189_v40 = vsel %vm2666_vm2, %v8703_v4, 0.0  ;;  %v2892_v52 = vsub.f32 %v9756_v37, %v8621_v59  ;;  %6891 = vpow2.f32 %v3007_v8 }
 0x595   : > { %3169 = vadd.xlane.f32.xlu1 %v3168_v23  ;;  %v8713_v43 = vpop.eup %6873  ;;  %v3135_v2 = vsel %vm2666_vm2, %v8709_v54, 0.0 }
 0x596   : > { %v8715_v1 = vpop.eup %6875  ;;  %v3162_v39 = vsel %vm2666_vm2, %v8713_v43, 0.0  ;;  %v2989_v50 = vmul.f32 1.442695, %v2892_v52 }
 0x597   : > { %v8723_v57 = vpop.eup %6877  ;;  %v3144_v10 = vsel %vm2666_vm2, %v8715_v1, 0.0 }
 0x598   : > { %3142 = vadd.xlane.f32.xlu0 %v3141_v44  ;;  %9755 = vst [vmem:[#allocation37_spill] sm:$0xff] %v8723_v57  ;;  %v8729_v23 = vpop.eup %6879  ;;  %v3183_v33 = vsel %vm2666_vm2, %v8723_v57, 0.0  ;;  %v2899_v44 = vsub.f32 %v9758_v41, %v8629_v11  ;;  %6893 = vpow2.f32 %v2989_v50 }
 0x599   : > { %3190 = vadd.xlane.f32.xlu1 %v3189_v40  ;;  %v8733_v49 = vpop.eup %6881  ;;  %v3138_v59 = vsel %vm2666_vm2, %v8729_v23, 0.0 }
 0x59a   : > { %9757 = vst [vmem:[#allocation38_spill] sm:$0xff] %v8733_v49  ;;  %v8739_v40 = vpop.eup %6883  ;;  %v3192_v63 = vsel %vm2666_vm2, %v8733_v49, 0.0  ;;  %v3003_v26 = vmul.f32 1.442695, %v2899_v44 }
 0x59b   : > { %9759 = vst [vmem:[#allocation39_spill] sm:$0xff] %v8739_v40  ;;  %v8743_v9 = vpop.eup %6885  ;;  %v3153_v11 = vsel %vm2666_vm2, %v8739_v40, 0.0 }
 0x59c   : > { %3136 = vadd.xlane.f32.xlu0 %v3135_v2  ;;  %9760 = vst [vmem:[#allocation41_spill] sm:$0xff] %v8743_v9  ;;  %v9761_v2 = vld [vmem:[#allocation50_spill] sm:$0xff]  ;;  %v8749_v8 = vpop.eup %6887  ;;  %v3186_v37 = vsel %vm2666_vm2, %v8743_v9, 0.0  ;;  %6895 = vpow2.f32 %v3003_v26 }
 0x59d   : > { %3163 = vadd.xlane.f32.xlu1 %v3162_v39  ;;  %v2902_v39 = vsub.f32 %v9761_v2, %v8631_v46  ;;  %9762 = vst [vmem:[#allocation40_spill] sm:$0xff] %v8749_v8  ;;  %v3147_v41 = vsel %vm2666_vm2, %v8749_v8, 0.0 }
 0x5a0   : > { %3145 = vadd.xlane.f32.xlu0 %v3144_v10  ;;  %v3009_v10 = vmul.f32 1.442695, %v2902_v39  ;;  %v8757_v46 = vpop.eup %6889 }
 0x5a1   : > { %3184 = vadd.xlane.f32.xlu1 %v3183_v33  ;;  %v9763_v33 = vld [vmem:[#allocation51_spill] sm:$0xff]  ;;  %9764 = vst [vmem:[#allocation42_spill] sm:$0xff] %v8757_v46  ;;  %v3156_v39 = vsel %vm2666_vm2, %v8757_v46, 0.0 }
 0x5a2   : > { %v2900_v50 = vsub.f32 %v9763_v33, %v8639_v53  ;;  %6897 = vpow2.f32 %v3009_v10  ;;  %v8764_v53 = vpop.eup %6891 }
 0x5a3   : > { %v3177_v10 = vsel %vm2666_vm2, %v8764_v53, 0.0 }
 0x5a4   : > { %3139 = vadd.xlane.f32.xlu0 %v3138_v59  ;;  %v3005_v40 = vmul.f32 1.442695, %v2900_v50 }
 0x5a5   : > { %3193 = vadd.xlane.f32.xlu1 %v3192_v63  ;;  %v9765_v63 = vld [vmem:[#allocation54_spill] sm:$0xff]  ;;  %v8769_v50 = vpop.eup %6893 }
 0x5a8   : > { %3154 = vadd.xlane.f32.xlu0 %v3153_v11  ;;  %v9766_v11 = vld [vmem:[#allocation55_spill] sm:$0xff] }
 0x5a9   : > { %v2819_v52 = vpop.xlane.xlu1 %2818  ;;  %3187 = vadd.xlane.f32.xlu1 %v3186_v37  ;;  %v9767_v37 = vld [vmem:[#allocation53_spill] sm:$0xff] }
 0x5aa   : > { %v2909_v26 = vsub.f32 %v9767_v37, %v2819_v52 }
 0x5ac   : > { %3148 = vadd.xlane.f32.xlu0 %v3147_v41 }
 0x5ad   : > { %v2813_v44 = vpop.xlane.xlu1 %2812  ;;  %v2822_v59 = vpop.xlane.xlu0 %2821 }
 0x5ae   : > { %v2907_v2 = vsub.f32 %v9765_v63, %v2813_v44  ;;  %v2910_v57 = vsub.f32 %v9766_v11, %v2822_v59  ;;  %v3023_v44 = vmul.f32 1.442695, %v2909_v26 }
 0x5b0   : > { %v3019_v33 = vmul.f32 1.442695, %v2907_v2  ;;  %v3025_v9 = vmul.f32 1.442695, %v2910_v57  ;;  %3157 = vadd.xlane.f32.xlu0 %v3156_v39 }
 0x5b1   : > { %v2843_v8 = vpop.xlane.xlu1 %2842  ;;  %v2816_v41 = vpop.xlane.xlu0 %2815 }
 0x5b2   : > { %6899 = vpow2.f32 %v3019_v33  ;;  %v2917_v49 = vsub.f32 %v8392_v58, %v2843_v8  ;;  %v2908_v59 = vsub.f32 %v8395_v29, %v2816_v41  ;;  %v3150_v58 = vsel %vm2666_vm2, %v8769_v50, 0.0 }
 0x5b3   : > { %6901 = vpow2.f32 %v3005_v40  ;;  %v8775_v40 = vpop.eup %6895 }
 0x5b4   : > { %6903 = vpow2.f32 %v3025_v9  ;;  %v3039_v52 = vmul.f32 1.442695, %v2917_v49  ;;  %3178 = vadd.xlane.f32.xlu0 %v3177_v10  ;;  %v3021_v8 = vmul.f32 1.442695, %v2908_v59  ;;  %v3171_v29 = vsel %vm2666_vm2, %v8775_v40, 0.0  ;;  %v8780_v26 = vpop.eup %6897 }
 0x5b5   : > { %v2837_v63 = vpop.xlane.xlu1 %2836  ;;  %v2846_v57 = vpop.xlane.xlu0 %2845  ;;  %6905 = vpow2.f32 %v3023_v44 }
 0x5b6   : > { %v2915_v2 = vsub.f32 %v8405_v5, %v2837_v63  ;;  %6907 = vpow2.f32 %v3039_v52  ;;  %v2918_v49 = vsub.f32 %v8408_v18, %v2846_v57  ;;  %v3180_v18 = vsel %vm2666_vm2, %v8780_v26, 0.0 }
 0x5b7   : > { %6909 = vpow2.f32 %v3021_v8 }
 0x5b8   : > { %3151 = vadd.xlane.f32.xlu0 %v3150_v58  ;;  %v3035_v9 = vmul.f32 1.442695, %v2915_v2  ;;  %v3041_v10 = vmul.f32 1.442695, %v2918_v49 }
 0x5b9   : > { %v2840_v11 = vpop.xlane.xlu0 %2839  ;;  %v2831_v37 = vpop.xlane.xlu1 %2830 }
 0x5ba   : > { %v2913_v5 = vsub.f32 %v8422_v42, %v2831_v37  ;;  %6911 = vpow2.f32 %v3035_v9  ;;  %v2916_v52 = vsub.f32 %v8419_v15, %v2840_v11 }
 0x5bc   : > { %3172 = vadd.xlane.f32.xlu0 %v3171_v29  ;;  %v3031_v63 = vmul.f32 1.442695, %v2913_v5  ;;  %v3037_v15 = vmul.f32 1.442695, %v2916_v52 }
 0x5bd   : > { %v2825_v39 = vpop.xlane.xlu1 %2824  ;;  %v2834_v33 = vpop.xlane.xlu0 %2833 }
 0x5be   : > { %v2911_v41 = vsub.f32 %v8437_v60, %v2825_v39  ;;  %v2914_v42 = vsub.f32 %v8440_v3, %v2834_v33 }
 0x5bf   : > { %v8784_v44 = vpop.eup %6899 }
 0x5c0   : > { %9768 = vst [vmem:[#allocation43_spill] sm:$0xff] %v8784_v44  ;;  %v8789_v59 = vpop.eup %6901  ;;  %v3027_v57 = vmul.f32 1.442695, %v2911_v41  ;;  %3181 = vadd.xlane.f32.xlu0 %v3180_v18  ;;  %v3195_v2 = vsel %vm2666_vm2, %v8784_v44, 0.0  ;;  %v3033_v3 = vmul.f32 1.442695, %v2914_v42 }
 0x5c1   : > { %v8794_v60 = vpop.eup %6903  ;;  %3196 = vadd.xlane.f32.xlu1 %v3195_v2  ;;  %v2855_v58 = vpop.xlane.xlu1 %2854  ;;  %v3174_v11 = vsel %vm2666_vm2, %v8789_v59, 0.0 }
 0x5c2   : > { %v8796_v8 = vpop.xlane.xlu0 %2827  ;;  %6913 = vpow2.f32 %v3027_v57  ;;  %v8800_v37 = vpop.eup %6905  ;;  %v2921_v9 = vsub.f32 %v8452_v51, %v2855_v58  ;;  %v3204_v49 = vsel %vm2666_vm2, %v8794_v60, 0.0 }
 0x5c3   : > { %6915 = vpow2.f32 %v3041_v10  ;;  %v8805_v29 = vpop.eup %6907  ;;  %v3201_v41 = vsel %vm2666_vm2, %v8800_v37, 0.0 }
 0x5c4   : > { %6917 = vpow2.f32 %v3031_v63  ;;  %3175 = vadd.xlane.f32.xlu0 %v3174_v11  ;;  %9769 = vst [vmem:[#allocation44_spill] sm:$0xff] %v8805_v29  ;;  %v3047_v10 = vmul.f32 1.442695, %v2921_v9  ;;  %v3225_v51 = vsel %vm2666_vm2, %v8805_v29, 0.0  ;;  %v8812_v52 = vpop.eup %6909 }
 0x5c5   : > { %3205 = vadd.xlane.f32.xlu1 %v3204_v49  ;;  %v2849_v5 = vpop.xlane.xlu1 %2848  ;;  %6919 = vpow2.f32 %v3037_v15  ;;  %9770 = vst [vmem:[#allocation52_spill] sm:$0xff] %v8812_v52 }
 0x5c6   : > { %v2858_v39 = vpop.xlane.xlu0 %2857  ;;  %v2919_v33 = vsub.f32 %v8467_v12, %v2849_v5  ;;  %6921 = vpow2.f32 %v3033_v3  ;;  %v3198_v12 = vsel %vm2666_vm2, %v8812_v52, 0.0  ;;  %v9777_v52 = vld [vmem:[#allocation23_spill] sm:$0xff] }
 0x5c7   : > { %v2922_v42 = vsub.f32 %v8470_v62, %v2858_v39  ;;  %v8815_v2 = vpop.eup %6911  ;;  %6923 = vpow2.f32 %v3047_v10  ;;  %v6496_v44 = vunpack.i.h.bf16 %v9777_v52 }
 0x5c8   : > { %3202 = vadd.xlane.f32.xlu0 %v3201_v41  ;;  %v3043_v57 = vmul.f32 1.442695, %v2919_v33  ;;  %9771 = vst [vmem:[#allocation45_spill] sm:$0xff] %v8815_v2  ;;  %v3219_v62 = vsel %vm2666_vm2, %v8815_v2, 0.0 }
 0x5c9   : > { %3226 = vadd.xlane.f32.xlu1 %v3225_v51  ;;  %v3059_v18 = vpop.xlane.xlu1 %3058  ;;  %v3049_v3 = vmul.f32 1.442695, %v2922_v42 }
 0x5ca   : > { %v2852_v63 = vpop.xlane.xlu0 %2851  ;;  %6925 = vpow2.f32 %v3043_v57 }
 0x5cb   : > { %v2920_v49 = vsub.f32 %v8487_v30, %v2852_v63 }
 0x5cd   : > { %3199 = vadd.xlane.f32.xlu1 %v3198_v12  ;;  %v3053_v58 = vpop.xlane.xlu1 %3052  ;;  %v3045_v30 = vmul.f32 1.442695, %v2920_v49 }
 0x5ce   : > { %v3062_v15 = vpop.xlane.xlu0 %3061 }
 0x5cf   : > { %v8819_v11 = vpop.eup %6913  ;;  %6927 = vrcp.f32 %v3062_v15 }
 0x5d0   : > { %9772 = vst [vmem:[#allocation46_spill] sm:$0xff] %v8819_v11  ;;  %v8821_v9 = vpop.eup %6915  ;;  %v3207_v5 = vsel %vm2666_vm2, %v8819_v11, 0.0  ;;  %6929 = vrcp.f32 %v3053_v58 }
 0x5d1   : > { %9773 = vst [vmem:[#allocation47_spill] sm:$0xff] %v8821_v9  ;;  %v8828_v39 = vpop.eup %6917  ;;  %3220 = vadd.xlane.f32.xlu1 %v3219_v62  ;;  %v8830_v33 = vpop.xlane.xlu1 %3082  ;;  %3208 = vadd.xlane.f32.xlu0 %v3207_v5  ;;  %6931 = vrcp.f32 %v3059_v18  ;;  %v3228_v51 = vsel %vm2666_vm2, %v8821_v9, 0.0 }
 0x5d2   : > { %v3056_v41 = vpop.xlane.xlu0 %3055  ;;  %v8832_v10 = vpop.eup %6919  ;;  %v3213_v63 = vsel %vm2666_vm2, %v8828_v39, 0.0 }
 0x5d3   : > { %6933 = vrcp.f32 %v3056_v41  ;;  %9774 = vst [vmem:[#allocation48_spill] sm:$0xff] %v8832_v10  ;;  %v8838_v57 = vpop.eup %6921  ;;  %v3222_v18 = vsel %vm2666_vm2, %v8832_v10, 0.0 }
 0x5d4   : > { %6935 = vpow2.f32 %v3049_v3  ;;  %v3216_v58 = vsel %vm2666_vm2, %v8838_v57, 0.0  ;;  %v8844_v15 = vpop.eup %6923 }
 0x5d5   : > { %3229 = vadd.xlane.f32.xlu1 %v3228_v51  ;;  %v3077_v42 = vpop.xlane.xlu1 %3076  ;;  %3214 = vadd.xlane.f32.xlu0 %v3213_v63  ;;  %6937 = vpow2.f32 %v3045_v30  ;;  %9775 = vst [vmem:[#allocation49_spill] sm:$0xff] %v8844_v15  ;;  %v3237_v5 = vsel %vm2666_vm2, %v8844_v15, 0.0 }
 0x5d6   : > { %v3086_v12 = vpop.xlane.xlu0 %3085  ;;  %6939 = vrcp.f32 %v3077_v42  ;;  %v9778_v42 = vld [vmem:[#allocation22_spill] sm:$0xff] }
 0x5d7   : > { %v8846_v62 = vpop.eup %6925  ;;  %v6491_v46 = vunpack.i.h.bf16 %v9778_v42 }
 0x5d8   : > { %9776 = vst [vmem:[#allocation50_spill] sm:$0xff] %v8846_v62  ;;  %v3231_v9 = vsel %vm2666_vm2, %v8846_v62, 0.0 }
 0x5d9   : > { %3223 = vadd.xlane.f32.xlu1 %v3222_v18  ;;  %3217 = vadd.xlane.f32.xlu0 %v3216_v58  ;;  %v3071_v49 = vpop.xlane.xlu1 %3070 }
 0x5da   : > { %v3080_v3 = vpop.xlane.xlu0 %3079 }
 0x5db   : > { %6941 = vrcp.f32 %v3080_v3 }
 0x5dc   : > { %v6928_v41 = vpop.eup %6927 }
 0x5dd   : > { %3238 = vadd.xlane.f32.xlu0 %v3237_v5  ;;  %v6930_v51 = vpop.eup %6929  ;;  %v3310_v29 = vmul.f32 %v6928_v41, %v8499_v27  ;;  %v3065_v58 = vpop.xlane.xlu1 %3064 }
 0x5de   : > { %v3074_v30 = vpop.xlane.xlu0 %3073  ;;  %v6932_v63 = vpop.eup %6931  ;;  %v3307_v10 = vmul.f32 %v6930_v51, %v8495_v24 }
 0x5df   : > { %v3309_v5 = vmul.f32 %v6932_v63, %v8482_v45  ;;  %6943 = vrcp.f32 %v3074_v30  ;;  %v1831_v45 = vpack.c.bf16 %v6496_v44, %v6491_v46  ;;  %v9782_v30 = vld [vmem:[#allocation19_spill] sm:$0xff] }
 0x5e0   : > { %v6934_v11 = vpop.eup %6933  ;;  %6945 = vrcp.f32 %v3065_v58  ;;  %v6476_v51 = vunpack.i.h.bf16 %v9782_v30 }
 0x5e1   : > { %v8853_v18 = vpop.eup %6935  ;;  %3232 = vadd.xlane.f32.xlu0 %v3231_v9  ;;  %v3308_v15 = vmul.f32 %v6934_v11, %v8513_v0  ;;  %v3372_v62 = vpack.c.bf16 %v3310_v29, %v3309_v5  ;;  %6947 = vrcp.f32 %v3071_v49  ;;  %v9779_v0 = vld [vmem:[#allocation21_spill] sm:$0xff]  ;;  %v9784_v5 = vld [vmem:[#allocation32_spill] sm:$0xff] }
 0x5e2   : > { %v3095_v2 = vpop.xlane.xlu0 %3094  ;;  %v3240_v41 = vsel %vm2666_vm2, %v8853_v18, 0.0  ;;  %v8862_v9 = vpop.eup %6937  ;;  %v6486_v52 = vunpack.i.h.bf16 %v9779_v0  ;;  %v9780_v11 = vld [vmem:[#allocation25_spill] sm:$0xff] }
 0x5e3   : > { %v3371_v27 = vpack.c.bf16 %v3308_v15, %v3307_v10  ;;  %v3234_v29 = vsel %vm2666_vm2, %v8862_v9, 0.0  ;;  %v9781_v10 = vld [vmem:[#allocation20_spill] sm:$0xff]  ;;  %v6940_v63 = vpop.eup %6939 }
 0x5e4   : > { %v6481_v15 = vunpack.i.h.bf16 %v9781_v10 }
 0x5e5   : > { %5809 = vmatprep.mubr.msk.bf16.mxu0 %vm2666_vm2, %v3371_v27  ;;  %3241 = vadd.xlane.f32.xlu0 %v3240_v41  ;;  %v6590_v27 = vunpack.i.h.bf16 %v9784_v5  ;;  %v9785_v41 = vld [vmem:[#allocation31_spill] sm:$0xff] }
 0x5e6   : > { %v3068_v24 = vpop.xlane.xlu0 %3067  ;;  %5810 = vmatmul.mubr.msk.bf16.vlgmr.msra.gmra.mxu0 %vm2666_vm2, %v3372_v62  ;;  %v1830_v49 = vpack.c.bf16 %v6486_v52, %v6481_v15  ;;  %v9783_v62 = vld [vmem:[#allocation18_spill] sm:$0xff]  ;;  %v6585_v42 = vunpack.i.h.bf16 %v9785_v41 }
 0x5e7   : > { %6949 = vrcp.f32 %v3068_v24  ;;  %5818 = vmatpush3.bf16.msra.mxu0 %v9780_v11  ;;  %v6471_v46 = vunpack.i.h.bf16 %v9783_v62  ;;  %v3315_v62 = vmul.f32 %v6940_v63, %v8519_v48  ;;  %v9787_v48 = vld [vmem:[#allocation29_spill] sm:$0xff] }
 0x5e8   : > { %5819 = vmatprep.subr.bf16.mxu0 %v1831_v45  ;;  %6951 = vrcp.f32 %v3086_v12  ;;  %v6942_v24 = vpop.eup %6941  ;;  %v1840_v11 = vpack.c.bf16 %v6590_v27, %v6585_v42  ;;  %v6575_v63 = vunpack.i.h.bf16 %v9787_v48 }
 0x5e9   : > { %3235 = vadd.xlane.f32.xlu0 %v3234_v29  ;;  %6953 = vrcp.f32 %v8830_v33  ;;  %v1829_v58 = vpack.c.bf16 %v6476_v51, %v6471_v46 }
 0x5ea   : > { %v3089_v3 = vpop.xlane.xlu0 %3088 }
 0x5eb   : > { %5820 = vmatpush3.bf16.msra.mxu0 %v1831_v45  ;;  %6955 = vrcp.f32 %v3089_v3 }
 0x5ec   : > { %5821 = vmatprep.subr.bf16.mxu0 %v1830_v49  ;;  %v6944_v0 = vpop.eup %6943 }
 0x5ed   : > { %v6946_v52 = vpop.eup %6945  ;;  %v3314_v33 = vmul.f32 %v6944_v0, %v8547_v6 }
 0x5ee   : > { %v3098_v44 = vpop.xlane.xlu0 %3097  ;;  %v6948_v45 = vpop.eup %6947  ;;  %v3311_v10 = vmul.f32 %v6946_v52, %v8539_v19 }
 0x5ef   : > { %5822 = vmatpush3.bf16.msra.mxu0 %v1830_v49  ;;  %v3316_v49 = vmul.f32 %v6942_v24, %v8537_v32  ;;  %v3313_v30 = vmul.f32 %v6948_v45, %v8529_v25 }
 0x5f0   : > { %5823 = vmatprep.subr.bf16.mxu0 %v1829_v58 }
 0x5f1   : > { %v3374_v46 = vpack.c.bf16 %v3314_v33, %v3313_v30  ;;  %v9789_v33 = vld [vmem:[#allocation27_spill] sm:$0xff] }
 0x5f2   : > { %v3092_v12 = vpop.xlane.xlu0 %3091 }
 0x5f3   : > { %6957 = vrcp.f32 %v3092_v12  ;;  %5824 = vmatpush3.bf16.msra.mxu0 %v1829_v58  ;;  %v9786_v58 = vld [vmem:[#allocation30_spill] sm:$0xff] }
 0x5f4   : > { %v6950_v29 = vpop.eup %6949  ;;  %6959 = vrcp.f32 %v3098_v44  ;;  %5849 = vmatprep.subr.bf16.mxu0 %v1840_v11  ;;  %v3375_v44 = vpack.c.bf16 %v3316_v49, %v3315_v62  ;;  %v6580_v27 = vunpack.i.h.bf16 %v9786_v58 }
 0x5f5   : > { %v3312_v15 = vmul.f32 %v6950_v29, %v8559_v17  ;;  %6961 = vrcp.f32 %v3095_v2  ;;  %v6952_v5 = vpop.eup %6951 }
 0x5f6   : > { %v3107_v3 = vpop.xlane.xlu0 %3106  ;;  %v6954_v19 = vpop.eup %6953  ;;  %v3318_v32 = vmul.f32 %v6952_v5, %v8523_v36  ;;  %v1839_v45 = vpack.c.bf16 %v6580_v27, %v6575_v63  ;;  %v9788_v36 = vld [vmem:[#allocation28_spill] sm:$0xff]  ;;  %v9795_v27 = vld [vmem:[#allocation17_spill] sm:$0xff] }
 0x5f7   : > { %v3373_v51 = vpack.c.bf16 %v3312_v15, %v3311_v10  ;;  %v3317_v2 = vmul.f32 %v6954_v19, %v8509_v7  ;;  %v6570_v29 = vunpack.i.h.bf16 %v9788_v36  ;;  %v6565_v7 = vunpack.i.h.bf16 %v9789_v33 }
 0x5f8   : > { %v6956_v17 = vpop.eup %6955  ;;  %v6170_v48 = vunpack.i.h.bf16 %v9795_v27 }
 0x5f9   : > { %5813 = vmatprep.mubr.msk.bf16.mxu0 %vm2666_vm2, %v3373_v51  ;;  %v3376_v42 = vpack.c.bf16 %v3318_v32, %v3317_v2  ;;  %v3319_v0 = vmul.f32 %v6956_v17, %v8571_v35  ;;  %v9790_v35 = vld [vmem:[#allocation26_spill] sm:$0xff]  ;;  %v1838_v51 = vpack.c.bf16 %v6570_v29, %v6565_v7  ;;  %v9797_v29 = vld [vmem:[#allocation35_spill] sm:$0xff] }
 0x5fa   : > { %5814 = vmatmul.mubr.msk.bf16.gmra.mxu0 %vm2666_vm2, %v3374_v46  ;;  %v3101_v6 = vpop.xlane.xlu0 %3100  ;;  %v9791_v46 = vld [vmem:[#allocation24_spill] sm:$0xff] }
 0x5fb   : > { %5825 = vmatprep.mubr.msk.bf16.mxu0 %vm2666_vm2, %v3375_v44  ;;  %v6555_v5 = vunpack.i.h.bf16 %v9791_v46  ;;  %v9792_v44 = vld [vmem:[#allocation14_spill] sm:$0xff] }
 0x5fc   : > { %v6155_v19 = vunpack.i.h.bf16 %v9792_v44 }
 0x5fe   : > { %v3110_v25 = vpop.xlane.xlu0 %3109 }
 0x5ff   : > { %6963 = vrcp.f32 %v3110_v25  ;;  %v9794_v25 = vld [vmem:[#allocation16_spill] sm:$0xff] }
 0x600   : > { %v6958_v41 = vpop.eup %6957  ;;  %6965 = vrcp.f32 %v3101_v6  ;;  %v6165_v58 = vunpack.i.h.bf16 %v9794_v25 }
 0x601   : > { %v6960_v24 = vpop.eup %6959  ;;  %v3320_v52 = vmul.f32 %v6958_v41, %v8590_v20  ;;  %v6560_v20 = vunpack.i.h.bf16 %v9790_v35  ;;  %6967 = vrcp.f32 %v3107_v3 }
 0x602   : > { %5826 = vmatmul.mubr.msk.bf16.vlgmr.msra.gmra.mxu0 %vm2666_vm2, %v3376_v42  ;;  %v3131_v12 = vpop.xlane.xlu0 %3130  ;;  %v6962_v10 = vpop.eup %6961  ;;  %v3322_v49 = vmul.f32 %v6960_v24, %v8582_v55  ;;  %v6633_v36 = vpack.i.bf16 %v6170_v48, %v6165_v58 }
 0x603   : > { %5850 = vmatpush3.bf16.msra.mxu0 %v1840_v11  ;;  %v3377_v15 = vpack.c.bf16 %v3320_v52, %v3319_v0  ;;  %v3321_v62 = vmul.f32 %v6962_v10, %v8557_v61  ;;  %v9793_v11 = vld [vmem:[#allocation15_spill] sm:$0xff]  ;;  %v1837_v17 = vpack.c.bf16 %v6560_v20, %v6555_v5  ;;  %v3116_v24 = vpop.xlane.xlu1 %3115  ;;  %v9796_v52 = vld [vmem:[#allocation34_spill] sm:$0xff]  ;;  %v9798_v10 = vld [vmem:[#allocation33_spill] sm:$0xff] }
 0x604   : > { %5851 = vmatprep.subr.bf16.mxu0 %v1839_v45  ;;  %v6160_v32 = vunpack.i.h.bf16 %v9793_v11 }
 0x605   : > { %5829 = vmatprep.mubr.msk.bf16.mxu0 %vm2666_vm2, %v3377_v15  ;;  %v3378_v55 = vpack.c.bf16 %v3322_v49, %v3321_v62 }
 0x606   : > { %v3104_v30 = vpop.xlane.xlu0 %3103  ;;  %v6591_v3 = vpack.i.bf16 %v6160_v32, %v6155_v19 }
 0x607   : > { %5852 = vmatpush3.bf16.msra.mxu0 %v1839_v45  ;;  %6969 = vrcp.f32 %v3104_v30 }
 0x608   : > { %5853 = vmatprep.subr.bf16.mxu0 %v1838_v51 }
 0x60a   : > { %5830 = vmatmul.mubr.msk.bf16.gmra.mxu0 %vm2666_vm2, %v3378_v55  ;;  %v3125_v6 = vpop.xlane.xlu0 %3124 }
 0x60b   : > { %5854 = vmatpush3.bf16.msra.mxu0 %v1838_v51 }
 0x60c   : > { %5855 = vmatprep.subr.bf16.mxu0 %v1837_v17  ;;  %6592 = vxpose.xlu1.b32.start.end [1/1] (short) (narrow) %v6591_v3, 64  ;;  %v6964_v61 = vpop.eup %6963 }
 0x60d   : > { %v6966_v63 = vpop.eup %6965  ;;  %v3326_v45 = vmul.f32 %v6964_v61, %v9796_v52 }
 0x60e   : > { %v3134_v2 = vpop.xlane.xlu0 %3133  ;;  %v6968_v42 = vpop.eup %6967  ;;  %v3323_v33 = vmul.f32 %v6966_v63, %v9797_v29 }
 0x60f   : > { %5856 = vmatpush3.bf16.msra.mxu0 %v1837_v17  ;;  %6971 = vrcp.f32 %v3134_v2  ;;  %v3325_v15 = vmul.f32 %v6968_v42, %v9798_v10  ;;  %v9799_v2 = vld [vmem:[#allocation36_spill] sm:$0xff]  ;;  %v9800_v42 = vld [vmem:[#allocation57_spill] sm:$0xff] }
 0x610   : > { %6973 = vrcp.f32 %v3125_v6 }
 0x611   : > { %6975 = vrcp.f32 %v3131_v12  ;;  %v3380_v30 = vpack.c.bf16 %v3326_v45, %v3325_v15 }
 0x612   : > { %v3119_v41 = vpop.xlane.xlu0 %3118 }
 0x614   : > { %v6970_v0 = vpop.eup %6969 }
 0x615   : > { %v3324_v7 = vmul.f32 %v6970_v0, %v8637_v21 }
 0x616   : > { %v3128_v49 = vpop.xlane.xlu0 %3127  ;;  %v3167_v35 = vpop.xlane.xlu1 %3166  ;;  %6634 = vxpose.xlu0.b32.start.end [1/1] (short) (narrow) %v6633_v36, 64 }
 0x617   : > { %6977 = vrcp.f32 %v3128_v49  ;;  %v3379_v20 = vpack.c.bf16 %v3324_v7, %v3323_v33 }
 0x618   : > { %6979 = vrcp.f32 %v3116_v24 }
 0x619   : > { %5841 = vmatprep.mubr.msk.bf16.mxu1 %vm2666_vm2, %v3379_v20 }
 0x61a   : > { %5842 = vmatmul.mubr.msk.bf16.vlgmr.msra.gmra.mxu1 %vm2666_vm2, %v3380_v30  ;;  %v3113_v51 = vpop.xlane.xlu0 %3112  ;;  %v3161_v62 = vpop.xlane.xlu1 %3160 }
 0x61b   : > { %6981 = vrcp.f32 %v3113_v51  ;;  %v9801_v51 = vld [vmem:[#allocation56_spill] sm:$0xff] }
 0x61c   : > { %6983 = vrcp.f32 %v3119_v41  ;;  %v6972_v12 = vpop.eup %6971 }
 0x61d   : > { %6985 = vrcp.f32 %v3167_v35  ;;  %v6974_v5 = vpop.eup %6973  ;;  %v3334_v55 = vmul.f32 %v6972_v12, %v8654_v22 }
 0x61e   : > { %v3122_v21 = vpop.xlane.xlu0 %3121  ;;  %v3170_v46 = vpop.xlane.xlu1 %3169  ;;  %v3331_v6 = vmul.f32 %v6974_v5, %v8646_v16 }
 0x61f   : > { %6987 = vrcp.f32 %v3122_v21  ;;  %v6976_v19 = vpop.eup %6975 }
 0x620   : > { %6989 = vrcp.f32 %v3170_v46  ;;  %v3333_v61 = vmul.f32 %v6976_v19, %v9799_v2  ;;  %v9802_v2 = vld [vmem:[#allocation38_spill] sm:$0xff] }
 0x621   : > { %6991 = vrcp.f32 %v3161_v62  ;;  %v2912_v62 = vsub.f32 %v9801_v51, %v8796_v8 }
 0x622   : > { %v3143_v44 = vpop.xlane.xlu0 %3142  ;;  %v3191_v11 = vpop.xlane.xlu1 %3190  ;;  %v3384_v63 = vpack.c.bf16 %v3334_v55, %v3333_v61 }
 0x624   : > { %v6978_v32 = vpop.eup %6977 }
 0x625   : > { %v3332_v17 = vmul.f32 %v6978_v32, %v8668_v28  ;;  %v6980_v3 = vpop.eup %6979 }
 0x626   : > { %v3137_v25 = vpop.xlane.xlu0 %3136  ;;  %v3164_v58 = vpop.xlane.xlu1 %3163  ;;  %v3328_v22 = vmul.f32 %v6980_v3, %v9800_v42 }
 0x627   : > { %v3383_v27 = vpack.c.bf16 %v3332_v17, %v3331_v6  ;;  %6993 = vrcp.f32 %v3164_v58 }
 0x628   : > { %v6982_v48 = vpop.eup %6981  ;;  %6995 = vrcp.f32 %v3143_v44 }
 0x629   : > { %5857 = vmatprep.mubr.msk.bf16.mxu0 %vm2666_vm2, %v3383_v27  ;;  %v3327_v41 = vmul.f32 %v6982_v48, %v8677_v31  ;;  %v6984_v24 = vpop.eup %6983 }
 0x62a   : > { %5858 = vmatmul.mubr.msk.bf16.vlgmr.msra.gmra.mxu0 %vm2666_vm2, %v3384_v63  ;;  %v3146_v16 = vpop.xlane.xlu0 %3145  ;;  %v6986_v28 = vpop.eup %6985  ;;  %v3329_v29 = vmul.f32 %v6984_v24, %v8661_v13 }
 0x62b   : > { %v8918_v0 = vpop.xlane.xlu1 %3184  ;;  %v3381_v52 = vpack.c.bf16 %v3328_v22, %v3327_v41  ;;  %6997 = vrcp.f32 %v3146_v16  ;;  %v8924_v7 = vmul.f32 %v6986_v28, %v8671_v34  ;;  %v9803_v16 = vld [vmem:[#allocation40_spill] sm:$0xff] }
 0x62c   : > { %v6988_v45 = vpop.eup %6987  ;;  %6999 = vrcp.f32 %v3137_v25 }
 0x62d   : > { %v6990_v36 = vpop.eup %6989  ;;  %5845 = vmatprep.mubr.msk.bf16.mxu1 %vm2666_vm2, %v3381_v52  ;;  %v3330_v31 = vmul.f32 %v6988_v45, %v8690_v56  ;;  %7001 = vrcp.f32 %v3191_v11  ;;  %v3029_v11 = vmul.f32 1.442695, %v2912_v62 }
 0x62e   : > { %v3140_v33 = vpop.xlane.xlu0 %3139  ;;  %v8927_v10 = vmul.f32 %v6990_v36, %v8693_v14  ;;  %v6992_v56 = vpop.eup %6991 }
 0x62f   : > { %7003 = vrcp.f32 %v3140_v33  ;;  %v3194_v15 = vpop.xlane.xlu1 %3193  ;;  %v3382_v49 = vpack.c.bf16 %v3330_v31, %v3329_v29  ;;  %v8935_v34 = vmul.f32 %v6992_v56, %v8682_v47 }
 0x630   : > { %7005 = vrcp.f32 %v3194_v15  ;;  %v3390_v35 = vpack.c.bf16 %v8927_v10, %v8924_v7  ;;  %v9812_v7 = vld [vmem:[#allocation47_spill] sm:$0xff] }
 0x631   : > { %5846 = vmatmul.mubr.msk.bf16.gmra.mxu1 %vm2666_vm2, %v3382_v49  ;;  %7007 = vpow2.f32 %v3029_v11 }
 0x632   : > { %v8932_v13 = vpop.xlane.xlu0 %3154 }
 0x634   : > { %v6994_v20 = vpop.eup %6993 }
 0x635   : > { %v8938_v14 = vmul.f32 %v6994_v20, %v8713_v43  ;;  %v6996_v21 = vpop.eup %6995 }
 0x636   : > { %v3149_v30 = vpop.xlane.xlu0 %3148  ;;  %v3337_v8 = vmul.f32 %v6996_v21, %v8699_v38 }
 0x637   : > { %v3389_v46 = vpack.c.bf16 %v8938_v14, %v8935_v34  ;;  %7009 = vrcp.f32 %v3149_v30 }
 0x638   : > { %v6998_v12 = vpop.eup %6997 }
 0x639   : > { %v7000_v5 = vpop.eup %6999  ;;  %v3338_v47 = vmul.f32 %v6998_v12, %v8715_v1 }
 0x63a   : > { %v8944_v44 = vpop.xlane.xlu0 %3157  ;;  %v7002_v19 = vpop.eup %7001  ;;  %v3335_v43 = vmul.f32 %v7000_v5, %v8709_v54 }
 0x63b   : > { %v8951_v3 = vmul.f32 %v7002_v19, %v8703_v4  ;;  %v3386_v58 = vpack.c.bf16 %v3338_v47, %v3337_v8 }
 0x63c   : > { %v7004_v32 = vpop.eup %7003 }
 0x63d   : > { %v7006_v55 = vpop.eup %7005  ;;  %v3336_v6 = vmul.f32 %v7004_v32, %v8729_v23  ;;  %v8960_v23 = vpop.xlane.xlu1 %3187 }
 0x63e   : > { %v3179_v17 = vpop.xlane.xlu0 %3178  ;;  %v8954_v61 = vmul.f32 %v7006_v55, %v9802_v2  ;;  %v8964_v48 = vpop.eup %7007 }
 0x63f   : > { %v3385_v25 = vpack.c.bf16 %v3336_v6, %v3335_v43  ;;  %v3210_v22 = vsel %vm2666_vm2, %v8964_v48, 0.0 }
 0x640   : > { %v3394_v1 = vpack.c.bf16 %v8954_v61, %v8951_v3 }
 0x641   : > { %5861 = vmatprep.mubr.msk.bf16.mxu0 %vm2666_vm2, %v3385_v25 }
 0x642   : > { %5862 = vmatmul.mubr.msk.bf16.gmra.mxu0 %vm2666_vm2, %v3386_v58  ;;  %v3152_v54 = vpop.xlane.xlu0 %3151 }
 0x643   : > { %7011 = vrcp.f32 %v3152_v54 }
 0x644   : > { %7013 = vrcp.f32 %v3179_v17  ;;  %v7010_v63 = vpop.eup %7009 }
 0x645   : > { %v3339_v28 = vmul.f32 %v7010_v63, %v9803_v16 }
 0x646   : > { %v3173_v38 = vpop.xlane.xlu0 %3172 }
 0x64a   : > { %v3182_v4 = vpop.xlane.xlu0 %3181  ;;  %v8962_v27 = vpop.xlane.xlu1 %3196 }
 0x64b   : > { %7015 = vrcp.f32 %v3182_v4 }
 0x64c   : > { %7017 = vrcp.f32 %v3173_v38 }
 0x64e   : > { %v3176_v41 = vpop.xlane.xlu0 %3175  ;;  %v3206_v42 = vpop.xlane.xlu1 %3205 }
 0x64f   : > { %7019 = vrcp.f32 %v3176_v41  ;;  %3211 = vadd.xlane.f32.xlu1 %v3210_v22 }
 0x650   : > { %v7012_v24 = vpop.eup %7011  ;;  %7021 = vrcp.f32 %v3206_v42 }
 0x651   : > { %v3340_v52 = vmul.f32 %v7012_v24, %v8769_v50  ;;  %v7014_v29 = vpop.eup %7013 }
 0x652   : > { %v3203_v45 = vpop.xlane.xlu0 %3202  ;;  %v8972_v33 = vmul.f32 %v7014_v29, %v8764_v53 }
 0x653   : > { %7023 = vrcp.f32 %v3203_v45  ;;  %v3387_v36 = vpack.c.bf16 %v3340_v52, %v3339_v28 }
 0x655   : > { %5873 = vmatprep.mubr.msk.bf16.mxu1 %vm2666_vm2, %v3387_v36 }
 0x658   : > { %v7016_v31 = vpop.eup %7015 }
 0x659   : > { %v8975_v15 = vmul.f32 %v7016_v31, %v8780_v26  ;;  %v7018_v49 = vpop.eup %7017 }
 0x65a   : > { %v8979_v20 = vpop.xlane.xlu0 %3208  ;;  %v3347_v30 = vmul.f32 %v7018_v49, %v8775_v40  ;;  %v8992_v40 = vpop.xlane.xlu1 %3226 }
 0x65b   : > { %v3392_v56 = vpack.c.bf16 %v8975_v15, %v8972_v33  ;;  %v9808_v15 = vld [vmem:[#allocation43_spill] sm:$0xff] }
 0x65c   : > { %v7020_v50 = vpop.eup %7019 }
 0x65d   : > { %v3348_v51 = vmul.f32 %v7020_v50, %v8789_v59  ;;  %v7022_v62 = vpop.eup %7021 }
 0x65e   : > { %v3215_v21 = vpop.xlane.xlu0 %3214  ;;  %v8984_v53 = vmul.f32 %v7022_v62, %v8794_v60  ;;  %v3200_v47 = vpop.xlane.xlu1 %3199 }
 0x65f   : > { %v3391_v12 = vpack.c.bf16 %v3348_v51, %v3347_v30  ;;  %7025 = vrcp.f32 %v3215_v21 }
 0x660   : > { %v7024_v5 = vpop.eup %7023 }
 0x661   : > { %v8987_v26 = vmul.f32 %v7024_v5, %v8800_v37  ;;  %5889 = vmatprep.mubr.msk.bf16.mxu0 %vm2666_vm2, %v3391_v12 }
 0x662   : > { %v3218_v11 = vpop.xlane.xlu0 %3217  ;;  %v3221_v43 = vpop.xlane.xlu1 %3220 }
 0x663   : > { %v3396_v19 = vpack.c.bf16 %v8984_v53, %v8987_v26  ;;  %7027 = vrcp.f32 %v3218_v11 }
 0x664   : > { %7029 = vrcp.f32 %v8960_v23 }
 0x665   : > { %7031 = vrcp.f32 %v8944_v44 }
 0x666   : > { %v9002_v6 = vpop.xlane.xlu0 %3238  ;;  %v9004_v17 = vpop.xlane.xlu1 %3229  ;;  %7033 = vrcp.f32 %v8932_v13 }
 0x667   : > { %7035 = vrcp.f32 %v8918_v0 }
 0x668   : > { %7037 = vrcp.f32 %v8962_v27 }
 0x669   : > { %7039 = vrcp.f32 %v3200_v47 }
 0x66a   : > { %v9006_v8 = vpop.xlane.xlu0 %3232  ;;  %v3224_v2 = vpop.xlane.xlu1 %3223  ;;  %7041 = vrcp.f32 %v3221_v43 }
 0x66b   : > { %7043 = vrcp.f32 %v3224_v2 }
 0x66c   : > { %v7026_v59 = vpop.eup %7025  ;;  %7045 = vrcp.f32 %v9004_v17  ;;  %v9807_v17 = vld [vmem:[#allocation37_spill] sm:$0xff] }
 0x66d   : > { %v8995_v55 = vmul.f32 %v7026_v59, %v8828_v39 }
 0x66e   : > { %v9008_v25 = vpop.xlane.xlu0 %3241 }
 0x670   : > { %v7028_v32 = vpop.eup %7027 }
 0x671   : > { %v8998_v60 = vmul.f32 %v7028_v32, %v8838_v57 }
 0x672   : > { %v9014_v54 = vpop.xlane.xlu0 %3235 }
 0x673   : > { %v3398_v37 = vpack.c.bf16 %v8998_v60, %v8995_v55  ;;  %7047 = vrcp.f32 %v9014_v54 }
 0x674   : > { %7049 = vrcp.f32 %v8992_v40 }
 0x675   : > { %7051 = vrcp.f32 %v9006_v8 }
 0x676   : > { %7053 = vrcp.f32 %v9008_v25 }
 0x677   : > { %7055 = vrcp.f32 %v9002_v6 }
 0x678   : > { %7057 = vrcp.f32 %v8979_v20 }
 0x688   : > { %v9010_v58 = vpop.trf.xlu1 }
 0x689   : > { %v6594_v27 = vunpack.i.l.bf16 %v9010_v58 }
 0x68c   : > { %v9012_v39 = vpop.trf.xlu1 }
 0x690   : > { %v6603_v57 = vpop.trf.xlu1 }
 0x691   : > { %v6607_v5 = vunpack.i.h.bf16 %v6603_v57  ;;  %v6604_v11 = vunpack.i.l.bf16 %v6603_v57  ;;  %v6602_v57 = vunpack.i.h.bf16 %v9012_v39 }
 0x692   : > { %v9016_v38 = vpop.trf.xlu0 }
 0x693   : > { %v6639_v34 = vunpack.i.h.bf16 %v9016_v38  ;;  %v6636_v14 = vunpack.i.l.bf16 %v9016_v38 }
 0x694   : > { %v6608_v4 = vpop.trf.xlu1 }
 0x695   : > { %v6612_v59 = vunpack.i.h.bf16 %v6608_v4  ;;  %v6609_v32 = vunpack.i.l.bf16 %v6608_v4  ;;  %v6599_v4 = vunpack.i.l.bf16 %v9012_v39  ;;  %v9804_v39 = vld [vmem:[#allocation41_spill] sm:$0xff] }
 0x696   : > { %v9018_v63 = vpop.trf.xlu0 }
 0x697   : > { %v1846_v47 = vpack.c.bf16 %v6612_v59, %v6607_v5  ;;  %v6644_v25 = vunpack.i.h.bf16 %v9018_v63 }
 0x698   : > { %v6613_v41 = vpop.trf.xlu1 }
 0x699   : > { %v6617_v28 = vunpack.i.h.bf16 %v6613_v41  ;;  %v6614_v52 = vunpack.i.l.bf16 %v6613_v41  ;;  %v6597_v41 = vunpack.i.h.bf16 %v9010_v58 }
 0x69a   : > { %v9020_v42 = vpop.trf.xlu0 }
 0x69b   : > { %v6649_v40 = vunpack.i.h.bf16 %v9020_v42  ;;  %v6646_v8 = vunpack.i.l.bf16 %v9020_v42  ;;  %v9809_v42 = vld [vmem:[#allocation52_spill] sm:$0xff] }
 0x69c   : > { %v6618_v22 = vpop.trf.xlu1 }
 0x69d   : > { %v6622_v45 = vunpack.i.h.bf16 %v6618_v22  ;;  %v6619_v36 = vunpack.i.l.bf16 %v6618_v22  ;;  %v7030_v22 = vpop.eup %7029 }
 0x69e   : > { %v9022_v24 = vpop.trf.xlu0 }
 0x69f   : > { %v1843_v23 = vpack.c.bf16 %v6619_v36, %v6614_v52  ;;  %v1847_v12 = vpack.c.bf16 %v6622_v45, %v6617_v28  ;;  %v7032_v28 = vpop.eup %7031 }
 0x6a0   : > { %v6623_v16 = vpop.trf.xlu1  ;;  %v7034_v58 = vpop.eup %7033 }
 0x6a1   : > { %v6627_v31 = vunpack.i.h.bf16 %v6623_v16  ;;  %v6624_v49 = vunpack.i.l.bf16 %v6623_v16  ;;  %v1842_v16 = vpack.c.bf16 %v6609_v32, %v6604_v11 }
 0x6a2   : > { %v9026_v29 = vpop.trf.xlu0 }
 0x6a3   : > { %v6659_v11 = vunpack.i.h.bf16 %v9026_v29  ;;  %v6656_v59 = vunpack.i.l.bf16 %v9026_v29 }
 0x6a4   : > { %v6628_v50 = vpop.trf.xlu1 }
 0x6a5   : > { %v6632_v30 = vunpack.i.h.bf16 %v6628_v50  ;;  %v6629_v51 = vunpack.i.l.bf16 %v6628_v50  ;;  %v1845_v50 = vpack.c.bf16 %v6602_v57, %v6597_v41 }
 0x6a6   : > { %v9030_v62 = vpop.trf.xlu0  ;;  %v9033_v0 = vpop.f32.mrf.mxu0 }
 0x6a7   : > { %v1844_v21 = vpack.c.bf16 %v6629_v51, %v6624_v49  ;;  %v1848_v44 = vpack.c.bf16 %v6632_v30, %v6627_v31  ;;  %v1841_v49 = vpack.c.bf16 %v6599_v4, %v6594_v27  ;;  %v3352_v30 = vmul.f32 %v7030_v22, %v9804_v39  ;;  %v7036_v51 = vpop.eup %7035  ;;  %v9806_v27 = vld [vmem:[#allocation39_spill] sm:$0xff] }
 0x6a8   : > { %v9039_v36 = vpop.f32.mrf.mxu0  ;;  %v6664_v32 = vunpack.i.h.bf16 %v9030_v62  ;;  %v7038_v41 = vpop.eup %7037  ;;  %v3341_v22 = vmul.f32 %v7034_v58, %v9806_v27  ;;  %v3351_v57 = vmul.f32 %v7036_v51, %v9807_v17  ;;  %v6641_v39 = vunpack.i.l.bf16 %v9018_v63 }
 0x6a9   : > { %5865 = vmatprep.subr.bf16.mxu1 %v1844_v21  ;;  %5881 = vmatprep.subr.bf16.mxu0 %v1848_v44  ;;  %v7040_v4 = vpop.eup %7039 }
 0x6aa   : > { %5866 = vmatpush3.bf16.msra.mxu1 %v1844_v21  ;;  %5882 = vmatpush3.bf16.msra.mxu0 %v1848_v44  ;;  %v6665_v13 = vpop.trf.xlu0  ;;  %v9805_v21 = vld [vmem:[#allocation42_spill] sm:$0xff]  ;;  %v9044_v44 = vpop.f32.mrf.mxu0  ;;  %v1849_v63 = vpack.c.bf16 %v6641_v39, %v6636_v14 }
 0x6ab   : > { %5867 = vmatprep.subr.bf16.mxu1 %v1843_v23  ;;  %5883 = vmatprep.subr.bf16.mxu0 %v1847_v12  ;;  %v6669_v43 = vunpack.i.h.bf16 %v6665_v13  ;;  %v6666_v52 = vunpack.i.l.bf16 %v6665_v13  ;;  %v6661_v13 = vunpack.i.l.bf16 %v9030_v62  ;;  %v7042_v62 = vpop.eup %7041 }
 0x6ae   : > { %5868 = vmatpush3.bf16.msra.mxu1 %v1843_v23  ;;  %5884 = vmatpush3.bf16.msra.mxu0 %v1847_v12  ;;  %v6670_v45 = vpop.trf.xlu0  ;;  %v3342_v23 = vmul.f32 %v7032_v28, %v9805_v21  ;;  %v1851_v28 = vpack.c.bf16 %v6661_v13, %v6656_v59 }
 0x6af   : > { %5869 = vmatprep.subr.bf16.mxu1 %v1842_v16  ;;  %5885 = vmatprep.subr.bf16.mxu0 %v1846_v47  ;;  %v6674_v2 = vunpack.i.h.bf16 %v6670_v45  ;;  %v6671_v31 = vunpack.i.l.bf16 %v6670_v45  ;;  %v6654_v45 = vunpack.i.h.bf16 %v9022_v24 }
 0x6b0   : > { %v3388_v29 = vpack.c.bf16 %v3342_v23, %v3341_v22  ;;  %v9814_v22 = vld [vmem:[#allocation50_spill] sm:$0xff] }
 0x6b1   : > { %v1852_v12 = vpack.c.bf16 %v6671_v31, %v6666_v52  ;;  %v1856_v5 = vpack.c.bf16 %v6674_v2, %v6669_v43  ;;  %v1855_v43 = vpack.c.bf16 %v6664_v32, %v6659_v11  ;;  %v7044_v52 = vpop.eup %7043  ;;  %v6651_v2 = vunpack.i.l.bf16 %v9022_v24  ;;  %v9810_v24 = vld [vmem:[#allocation48_spill] sm:$0xff] }
 0x6b2   : > { %5870 = vmatpush3.bf16.msra.mxu1 %v1842_v16  ;;  %5886 = vmatpush3.bf16.msra.mxu0 %v1846_v47  ;;  %v9055_v16 = vpop.f32.mrf.mxu0  ;;  %v3393_v47 = vpack.c.bf16 %v3352_v30, %v3351_v57  ;;  %v3356_v31 = vmul.f32 %v7040_v4, %v9809_v42  ;;  %v3364_v58 = vmul.f32 %v7044_v52, %v9810_v24  ;;  %v7046_v23 = vpop.eup %7045 }
 0x6b3   : > { %5871 = vmatprep.subr.bf16.mxu1 %v1841_v49  ;;  %5887 = vmatprep.subr.bf16.mxu0 %v1845_v50  ;;  %v1850_v30 = vpack.c.bf16 %v6651_v2, %v6646_v8  ;;  %v1854_v51 = vpack.c.bf16 %v6654_v45, %v6649_v40  ;;  %v7048_v38 = vpop.eup %7047  ;;  %v1853_v11 = vpack.c.bf16 %v6644_v25, %v6639_v34 }
 0x6b4   : > { %v7050_v59 = vpop.eup %7049  ;;  %v3366_v10 = vmul.f32 %v7046_v23, %v9812_v7  ;;  %v3368_v61 = vmul.f32 %v7048_v38, %v8862_v9 }
 0x6b5   : > { %v7052_v13 = vpop.eup %7051 }
 0x6b6   : > { %5872 = vmatpush3.bf16.msra.mxu1 %v1841_v49  ;;  %5888 = vmatpush3.bf16.msra.mxu0 %v1845_v50  ;;  %v9811_v49 = vld [vmem:[#allocation45_spill] sm:$0xff]  ;;  %v3367_v17 = vmul.f32 %v7052_v13, %v9814_v22 }
 0x6b7   : > { %5897 = vmatprep.subr.bf16.mxu1 %v1852_v12  ;;  %5913 = vmatprep.subr.bf16.mxu0 %v1856_v5  ;;  %v3363_v50 = vmul.f32 %v7042_v62, %v9811_v49 }
 0x6b8   : > { %v3401_v62 = vpack.c.bf16 %v3368_v61, %v3367_v17 }
 0x6b9   : > { %5874 = vmatmul.mubr.msk.bf16.vlgmr.msra.gmra.mxu1 %vm2666_vm2, %v3388_v29  ;;  %5890 = vmatmul.mubr.msk.bf16.vlgmr.msra.gmra.mxu0 %vm2666_vm2, %v3392_v56  ;;  %v3355_v56 = vmul.f32 %v7038_v41, %v9808_v15  ;;  %v7054_v29 = vpop.eup %7053 }
 0x6ba   : > { %v9057_v54 = vpop.f32.mrf.mxu0  ;;  %5877 = vmatprep.mubr.msk.bf16.mxu1 %vm2666_vm2, %v3389_v46  ;;  %5893 = vmatprep.mubr.msk.bf16.mxu0 %vm2666_vm2, %v3393_v47  ;;  %v7056_v47 = vpop.eup %7055  ;;  %v3370_v9 = vmul.f32 %v7054_v29, %v8853_v18 }
 0x6bb   : > { %5898 = vmatpush3.bf16.msra.mxu1 %v1852_v12  ;;  %5914 = vmatpush3.bf16.msra.mxu0 %v1856_v5  ;;  %v3395_v6 = vpack.c.bf16 %v3356_v31, %v3355_v56  ;;  %v3399_v12 = vpack.c.bf16 %v3364_v58, %v3363_v50  ;;  %v7058_v15 = vpop.eup %7057  ;;  %v9816_v31 = vld [vmem:[#allocation46_spill] sm:$0xff] }
 0x6bc   : > { %v9073_v33 = vpop.f32.mrf.mxu0  ;;  %5899 = vmatprep.subr.bf16.mxu1 %v1851_v28  ;;  %5915 = vmatprep.subr.bf16.mxu0 %v1855_v43 }
 0x6be   : > { %v9082_v46 = vpop.f32.mrf.mxu0 }
 0x6bf   : > { %5900 = vmatpush3.bf16.msra.mxu1 %v1851_v28  ;;  %5916 = vmatpush3.bf16.msra.mxu0 %v1855_v43 }
 0x6c0   : > { %v3468_v21 = vpop.f32.mrf.mxu0  ;;  %5901 = vmatprep.subr.bf16.mxu1 %v1850_v30  ;;  %5917 = vmatprep.subr.bf16.mxu0 %v1854_v51 }
 0x6c1   : > { %5878 = vmatmul.mubr.msk.bf16.gmra.mxu1 %vm2666_vm2, %v3390_v35  ;;  %5894 = vmatmul.mubr.msk.bf16.gmra.mxu0 %vm2666_vm2, %v3394_v1  ;;  %v9813_v1 = vld [vmem:[#allocation44_spill] sm:$0xff] }
 0x6c2   : > { %v5827_v5 = vpop.f32.mrf.mxu0  ;;  %5905 = vmatprep.mubr.msk.bf16.mxu1 %vm2666_vm2, %v3395_v6  ;;  %5921 = vmatprep.mubr.msk.bf16.mxu0 %vm2666_vm2, %v3399_v12  ;;  %v3365_v41 = vmul.f32 %v7050_v59, %v9813_v1 }
 0x6c3   : > { %5902 = vmatpush3.bf16.msra.mxu1 %v1850_v30  ;;  %5918 = vmatpush3.bf16.msra.mxu0 %v1854_v51  ;;  %v6679_v28 = vpack.i.bf16 %v5827_v5, %v9033_v0 }
 0x6c4   : > { %v3526_v32 = vpop.f32.mrf.mxu0  ;;  %5903 = vmatprep.subr.bf16.mxu1 %v1849_v63  ;;  %5919 = vmatprep.subr.bf16.mxu0 %v1853_v11  ;;  %v3400_v57 = vpack.c.bf16 %v3366_v10, %v3365_v41 }
 0x6c5   : > { %v6675_v35 = vpack.i.bf16 %v3526_v32, %v9039_v36 }
 0x6c6   : > { %v5828_v3 = vpop.f32.mrf.mxu0 }
 0x6c7   : > { %6676 = vxpose.xlu1.b32.start [1/8] (short) (narrow) %v6675_v35, 8  ;;  %5904 = vmatpush3.bf16.msra.mxu1 %v1849_v63  ;;  %v6681_v8 = vpack.i.bf16 %v5828_v3, %v9044_v44 }
 0x6c8   : > { %5920 = vmatpush3.bf16.msra.mxu0 %v1853_v11  ;;  %v3529_v27 = vpop.f32.mrf.mxu0 }
 0x6c9   : > { %v6677_v4 = vpack.i.bf16 %v3529_v27, %v9055_v16  ;;  %v9815_v16 = vld [vmem:[#allocation49_spill] sm:$0xff] }
 0x6ca   : > { %v5831_v36 = vpop.f32.mrf.mxu0  ;;  %5906 = vmatmul.mubr.msk.bf16.vlgmr.msra.gmra.mxu1 %vm2666_vm2, %v3396_v19  ;;  %v3369_v52 = vmul.f32 %v7056_v47, %v9815_v16 }
 0x6cb   : > { %5922 = vmatmul.mubr.msk.bf16.vlgmr.msra.gmra.mxu0 %vm2666_vm2, %v3400_v57  ;;  %6678 = vxpose.xlu1.b32.cont [2/8] (short) (narrow) %v6677_v4, 8  ;;  %v6687_v0 = vpack.i.bf16 %v5831_v36, %v9057_v54 }
 0x6cc   : > { %5925 = vmatprep.mubr.msk.bf16.mxu0 %vm2666_vm2, %v3401_v62  ;;  %v3542_v43 = vpop.f32.mrf.mxu0  ;;  %v3402_v40 = vpack.c.bf16 %v3370_v9, %v3369_v52 }
 0x6cd   : > { %v6683_v53 = vpack.i.bf16 %v3542_v43, %v9073_v33  ;;  %v3359_v33 = vmul.f32 %v7058_v15, %v9816_v31 }
 0x6ce   : > { %v5832_v45 = vpop.f32.mrf.mxu0 }
 0x6cf   : > { %6680 = vxpose.xlu1.b32.cont [3/8] (short) (narrow) %v6679_v28, 8  ;;  %v6689_v2 = vpack.i.bf16 %v5832_v45, %v9082_v46 }
 0x6d0   : > { %v3545_v26 = vpop.f32.mrf.mxu0 }
 0x6d1   : > { %v6685_v19 = vpack.i.bf16 %v3545_v26, %v3468_v21 }
 0x6d3   : > { %5926 = vmatmul.mubr.msk.bf16.gmra.mxu0 %vm2666_vm2, %v3402_v40  ;;  %6682 = vxpose.xlu1.b32.cont [4/8] (short) (narrow) %v6681_v8, 8 }
 0x6d7   : > { %6684 = vxpose.xlu1.b32.cont [5/8] (short) (narrow) %v6683_v53, 8 }
 0x6d8   : > { %v3212_v18 = vpop.xlane.xlu1 %3211 }
 0x6d9   : > { %7059 = vrcp.f32 %v3212_v18 }
 0x6da   : > { %v5843_v44 = vpop.f32.mrf.mxu1 }
 0x6db   : > { %6686 = vxpose.xlu1.b32.cont [6/8] (short) (narrow) %v6685_v19, 8 }
 0x6dc   : > { %v3603_v42 = vpop.f32.mrf.mxu1 }
 0x6de   : > { %v5844_v34 = vpop.f32.mrf.mxu1 }
 0x6df   : > { %6688 = vxpose.xlu1.b32.cont [7/8] (short) (narrow) %v6687_v0, 8 }
 0x6e0   : > { %v3606_v46 = vpop.f32.mrf.mxu1 }
 0x6e3   : > { %6690 = vxpose.xlu1.b32.end [8/8] (short) (narrow) %v6689_v2, 8 }
 0x6e6   : > { %v7060_v56 = vpop.eup %7059 }
 0x6e7   : > { %v3360_v24 = vmul.f32 %v7060_v56, %v8964_v48 }
 0x6e9   : > { %v3397_v58 = vpack.c.bf16 %v3360_v24, %v3359_v33  ;;  %v6761_v24 = vld [vmem:[%s9585_s6 + $0x8] sm:$0xff]  }
 0x6ea   : > { %v5859_v20 = vpop.f32.mrf.mxu0  ;;  %5929 = vmatprep.subr.bf16.mxu1 %v6761_v24 }
 0x6eb   : > { %5909 = vmatprep.mubr.msk.bf16.mxu1 %vm2666_vm2, %v3397_v58  ;;  %v6700_v39 = vpack.i.bf16 %v5859_v20, %v5843_v44  ;;  %5930 = vmatpush3.bf16.msra.mxu1 %v6761_v24  ;;  %v6762_v58 = vld [vmem:[%s9585_s6] sm:$0xff]  }
 0x6ec   : > { %v3680_v14 = vpop.f32.mrf.mxu0  ;;  %5910 = vmatmul.mubr.msk.bf16.gmra.mxu1 %vm2666_vm2, %v3398_v37  ;;  %5931 = vmatprep.subr.bf16.mxu1 %v6762_v58 }
 0x6ed   : > { %v6696_v49 = vpack.i.bf16 %v3680_v14, %v3603_v42 }
 0x6ee   : > { %v5860_v54 = vpop.f32.mrf.mxu0 }
 0x6ef   : > { %6697 = vxpose.xlu0.b32.start [1/8] (short) (narrow) %v6696_v49, 8  ;;  %v6702_v48 = vpack.i.bf16 %v5860_v54, %v5844_v34  ;;  %5932 = vmatpush3.bf16.msra.mxu1 %v6762_v58 }
 0x6f0   : > { %v3683_v50 = vpop.f32.mrf.mxu0 }
 0x6f1   : > { %v6698_v25 = vpack.i.bf16 %v3683_v50, %v3606_v46  ;;  %v5847_v30 = vpop.f32.mrf.mxu1 }
 0x6f3   : > { %6699 = vxpose.xlu0.b32.cont [2/8] (short) (narrow) %v6698_v25, 8  ;;  %v3619_v51 = vpop.f32.mrf.mxu1 }
 0x6f5   : > { %v5848_v23 = vpop.f32.mrf.mxu1 }
 0x6f7   : > { %6701 = vxpose.xlu0.b32.cont [3/8] (short) (narrow) %v6700_v39, 8  ;;  %v3622_v55 = vpop.f32.mrf.mxu1 }
 0x6fb   : > { %6703 = vxpose.xlu0.b32.cont [4/8] (short) (narrow) %v6702_v48, 8 }
 0x702   : > { %v5863_v21 = vpop.f32.mrf.mxu0 }
 0x703   : > { %v6708_v38 = vpack.i.bf16 %v5863_v21, %v5847_v30 }
 0x704   : > { %v3696_v6 = vpop.f32.mrf.mxu0 }
 0x705   : > { %v6704_v12 = vpack.i.bf16 %v3696_v6, %v3619_v51 }
 0x706   : > { %v5864_v5 = vpop.f32.mrf.mxu0 }
 0x707   : > { %6705 = vxpose.xlu0.b32.cont [5/8] (short) (narrow) %v6704_v12, 8  ;;  %v6710_v63 = vpack.i.bf16 %v5864_v5, %v5848_v23 }
 0x708   : > { %v3699_v60 = vpop.f32.mrf.mxu0 }
 0x709   : > { %v6706_v37 = vpack.i.bf16 %v3699_v60, %v3622_v55 }
 0x70b   : > { %6707 = vxpose.xlu0.b32.cont [6/8] (short) (narrow) %v6706_v37, 8 }
 0x70f   : > { %6709 = vxpose.xlu0.b32.cont [7/8] (short) (narrow) %v6708_v38, 8 }
 0x713   : > { %6711 = vxpose.xlu0.b32.end [8/8] (short) (narrow) %v6710_v63, 8 }
 0x743   : > { %v6691_v11 = vpop.trf.xlu1 }
 0x744   : > { %v6692_v31 = vunpack.i.l.bf16 %v6691_v11  ;;  %v6695_v33 = vunpack.i.h.bf16 %v6691_v11 }
 0x773   : > { %v9125_v59 = vpop.trf.xlu0 }
 0x774   : > { %v6713_v20 = vunpack.i.l.bf16 %v9125_v59  ;;  %v6716_v14 = vunpack.i.h.bf16 %v9125_v59 }
 0x779   : > { %v5875_v32 = vpop.f32.mrf.mxu1  ;;  %v5891_v13 = vpop.f32.mrf.mxu0 }
 0x77a   : > { %v6721_v29 = vpack.i.bf16 %v5891_v13, %v5875_v32 }
 0x77b   : > { %v3757_v7 = vpop.f32.mrf.mxu1  ;;  %v3834_v10 = vpop.f32.mrf.mxu0 }
 0x77c   : > { %v6717_v35 = vpack.i.bf16 %v3834_v10, %v3757_v7 }
 0x77d   : > { %v5876_v3 = vpop.f32.mrf.mxu1  ;;  %v5892_v61 = vpop.f32.mrf.mxu0 }
 0x77e   : > { %6718 = vxpose.xlu0.b32.start [1/8] (short) (narrow) %v6717_v35, 8  ;;  %v6723_v28 = vpack.i.bf16 %v5892_v61, %v5876_v3 }
 0x77f   : > { %v3760_v1 = vpop.f32.mrf.mxu1  ;;  %v3837_v41 = vpop.f32.mrf.mxu0 }
 0x780   : > { %v6719_v27 = vpack.i.bf16 %v3837_v41, %v3760_v1 }
 0x781   : > { %v5879_v22 = vpop.f32.mrf.mxu1  ;;  %v5895_v17 = vpop.f32.mrf.mxu0 }
 0x782   : > { %6720 = vxpose.xlu0.b32.cont [2/8] (short) (narrow) %v6719_v27, 8  ;;  %v6729_v44 = vpack.i.bf16 %v5895_v17, %v5879_v22 }
 0x783   : > { %v3773_v57 = vpop.f32.mrf.mxu1  ;;  %v3850_v4 = vpop.f32.mrf.mxu0 }
 0x784   : > { %v6725_v52 = vpack.i.bf16 %v3850_v4, %v3773_v57 }
 0x785   : > { %v5880_v62 = vpop.f32.mrf.mxu1  ;;  %v5896_v47 = vpop.f32.mrf.mxu0 }
 0x786   : > { %6722 = vxpose.xlu0.b32.cont [3/8] (short) (narrow) %v6721_v29, 8  ;;  %v6731_v56 = vpack.i.bf16 %v5896_v47, %v5880_v62 }
 0x787   : > { %v3776_v36 = vpop.f32.mrf.mxu1  ;;  %v3853_v9 = vpop.f32.mrf.mxu0 }
 0x788   : > { %v6727_v18 = vpack.i.bf16 %v3853_v9, %v3776_v36 }
 0x78a   : > { %v5907_v43 = vpop.f32.mrf.mxu1  ;;  %6724 = vxpose.xlu0.b32.cont [4/8] (short) (narrow) %v6723_v28, 8 }
 0x78b   : > { %v5923_v16 = vpop.f32.mrf.mxu0 }
 0x78c   : > { %v3911_v40 = vpop.f32.mrf.mxu1  ;;  %v6742_v15 = vpack.i.bf16 %v5923_v16, %v5907_v43  ;;  %v9146_v16 = vld [vmem:[%s9586_s7] ss:$0 sm:$0xff] }
 0x78d   : > { %v3988_v8 = vpop.f32.mrf.mxu0 }
 0x78e   : > { %v6738_v45 = vpack.i.bf16 %v3988_v8, %v3911_v40  ;;  %v5908_v53 = vpop.f32.mrf.mxu1  ;;  %6726 = vxpose.xlu0.b32.cont [5/8] (short) (narrow) %v6725_v52, 8 }
 0x78f   : > { %v5924_v26 = vpop.f32.mrf.mxu0 }
 0x790   : > { %6739 = vxpose.xlu1.b32.start [1/8] (short) (narrow) %v6738_v45, 8  ;;  %v3914_v19 = vpop.f32.mrf.mxu1  ;;  %v6744_v42 = vpack.i.bf16 %v5924_v26, %v5908_v53  ;;  %v7157_v53 = vld [vmem:[%s7506_s27 + $0x20] sm:$0xff] }
 0x791   : > { %v3991_v0 = vpop.f32.mrf.mxu0 }
 0x792   : > { %v6740_v2 = vpack.i.bf16 %v3991_v0, %v3914_v19  ;;  %6728 = vxpose.xlu0.b32.cont [6/8] (short) (narrow) %v6727_v18, 8  ;;  %v7158_v18 = vld [vmem:[%s7506_s27] sm:$0xff] }
 0x793   : > { %v5927_v34 = vpop.f32.mrf.mxu0 }
 0x794   : > { %6741 = vxpose.xlu1.b32.cont [2/8] (short) (narrow) %v6740_v2, 8 }
 0x795   : > { %v4004_v49 = vpop.f32.mrf.mxu0 }
 0x796   : > { %6730 = vxpose.xlu0.b32.cont [7/8] (short) (narrow) %v6729_v44, 8 }
 0x797   : > { %v5928_v46 = vpop.f32.mrf.mxu0 }
 0x798   : > { %6743 = vxpose.xlu1.b32.cont [3/8] (short) (narrow) %v6742_v15, 8 }
 0x799   : > { %v4007_v48 = vpop.f32.mrf.mxu0 }
 0x79a   : > { %6732 = vxpose.xlu0.b32.end [8/8] (short) (narrow) %v6731_v56, 8  ;;  %v7159_v56 = vld [vmem:[%s7506_s27 + $0x30] sm:$0xff] }
 0x79c   : > { %6745 = vxpose.xlu1.b32.cont [4/8] (short) (narrow) %v6744_v42, 8 }
 0x79e   : > { %4275 = vxpose.xlu0.b32.start [1/4] (short) (narrow) %v6692_v31, 64  ;;  %v7160_v31 = vld [vmem:[%s7506_s27 + $0x10] sm:$0xff] }
 0x7a2   : > { %4276 = vxpose.xlu0.b32.cont [2/4] (short) (narrow) %v6695_v33, 64 }
 0x7a6   : > { %4277 = vxpose.xlu0.b32.cont [3/4] (short) (narrow) %v6713_v20, 64 }
 0x7aa   : > { %4278 = vxpose.xlu0.b32.end [4/4] (short) (narrow) %v6716_v14, 64 }
 0x7ac   : > { %v5911_v54 = vpop.f32.mrf.mxu1 }
 0x7ad   : > { %v6750_v21 = vpack.i.bf16 %v5927_v34, %v5911_v54  ;;  %v7161_v54 = vld [vmem:[%s7506_s27 + $0x60] sm:$0xff] }
 0x7ae   : > { %v3927_v50 = vpop.f32.mrf.mxu1 }
 0x7af   : > { %v6746_v25 = vpack.i.bf16 %v4004_v49, %v3927_v50 }
 0x7b0   : > { %v5912_v39 = vpop.f32.mrf.mxu1 }
 0x7b1   : > { %6747 = vxpose.xlu1.b32.cont [5/8] (short) (narrow) %v6746_v25, 8  ;;  %v6752_v23 = vpack.i.bf16 %v5928_v46, %v5912_v39  ;;  %v7162_v39 = vld [vmem:[%s7506_s27 + $0x40] sm:$0xff] }
 0x7b2   : > { %v3930_v30 = vpop.f32.mrf.mxu1 }
 0x7b3   : > { %v6748_v51 = vpack.i.bf16 %v4007_v48, %v3930_v30 }
 0x7b5   : > { %6749 = vxpose.xlu1.b32.cont [6/8] (short) (narrow) %v6748_v51, 8 }
 0x7b9   : > { %6751 = vxpose.xlu1.b32.cont [7/8] (short) (narrow) %v6750_v21, 8 }
 0x7bd   : > { %6753 = vxpose.xlu1.b32.end [8/8] (short) (narrow) %v6752_v23, 8  ;;  %v7163_v23 = vld [vmem:[%s7506_s27 + $0x70] sm:$0xff] }
 0x7fa   : > { %v6733_v6 = vpop.trf.xlu0 }
 0x7fb   : > { %v6734_v12 = vunpack.i.l.bf16 %v6733_v6  ;;  %v6737_v5 = vunpack.i.h.bf16 %v6733_v6 }
 0x7fd   : > { %4307 = vxpose.xlu0.b32.start [1/4] (short) (narrow) %v6734_v12, 64 }
 0x801   : > { %4308 = vxpose.xlu0.b32.cont [2/4] (short) (narrow) %v6737_v5, 64 }
 0x81a   : > { %v4291_v55 = vpop.trf.xlu0 }
 0x81d   : > { %v6754_v60 = vpop.trf.xlu1 }
 0x81e   : > { %v4292_v37 = vpop.trf.xlu0  ;;  %v6755_v38 = vunpack.i.l.bf16 %v6754_v60  ;;  %v6758_v59 = vunpack.i.h.bf16 %v6754_v60 }
 0x81f   : > { %v4339_v63 = vpack.c.bf16 %v4292_v37, %v4291_v55  ;;  %v7164_v55 = vld [vmem:[%s7506_s27 + $0x50] sm:$0xff] }
 0x820   : > { %4309 = vxpose.xlu0.b32.cont [3/4] (short) (narrow) %v6755_v38, 64 }
 0x821   : > { %5933 = vmatprep.mubr.msk.bf16.mxu1 %vm523_vm0, %v4339_v63 }
 0x822   : > { %v4293_v11 = vpop.trf.xlu0 }
 0x824   : > { %4310 = vxpose.xlu0.b32.end [4/4] (short) (narrow) %v6758_v59, 64 }
 0x826   : > { %v4294_v32 = vpop.trf.xlu0 }
 0x827   : > { %v4340_v13 = vpack.c.bf16 %v4294_v32, %v4293_v11  ;;  %v7165_v32 = vld [vmem:[%s7506_s27 + $0x28] sm:$0xff] }
 0x829   : > { %5934 = vmatmul.mubr.msk.bf16.vlgmr.msra.gmra.mxu1 %vm523_vm0, %v4340_v13 }
 0x82a   : > { %v4295_v7 = vpop.trf.xlu0 }
 0x82e   : > { %v4296_v10 = vpop.trf.xlu0 }
 0x82f   : > { %v4341_v35 = vpack.c.bf16 %v4296_v10, %v4295_v7 }
 0x831   : > { %5937 = vmatprep.mubr.msk.bf16.mxu1 %vm523_vm0, %v4341_v35  ;;  %v7166_v35 = vld [vmem:[%s7506_s27 + $0x8] sm:$0xff] }
 0x832   : > { %v4297_v3 = vpop.trf.xlu0 }
 0x836   : > { %v4298_v61 = vpop.trf.xlu0 }
 0x837   : > { %v4342_v1 = vpack.c.bf16 %v4298_v61, %v4297_v3 }
 0x839   : > { %5938 = vmatmul.mubr.msk.bf16.gmra.mxu1 %vm523_vm0, %v4342_v1 }
 0x894   : > { %v4323_v41 = vpop.trf.xlu0 }
 0x898   : > { %v4324_v27 = vpop.trf.xlu0 }
 0x899   : > { %v4343_v22 = vpack.c.bf16 %v4324_v27, %v4323_v41  ;;  %v7167_v27 = vld [vmem:[%s7506_s27 + $0x38] sm:$0xff] }
 0x89b   : > { %5941 = vmatprep.mubr.msk.bf16.mxu1 %vm523_vm0, %v4343_v22 }
 0x89c   : > { %v4325_v17 = vpop.trf.xlu0 }
 0x8a0   : > { %v4326_v57 = vpop.trf.xlu0 }
 0x8a1   : > { %v4344_v4 = vpack.c.bf16 %v4326_v57, %v4325_v17 }
 0x8a3   : > { %5942 = vmatmul.mubr.msk.bf16.gmra.mxu1 %vm523_vm0, %v4344_v4  ;;  %v7168_v4 = vld [vmem:[%s7506_s27 + $0x18] sm:$0xff] }
 0x8a4   : > { %v4327_v29 = vpop.trf.xlu0 }
 0x8a8   : > { %v4328_v62 = vpop.trf.xlu0 }
 0x8a9   : > { %v4345_v47 = vpack.c.bf16 %v4328_v62, %v4327_v29 }
 0x8ab   : > { %5945 = vmatprep.mubr.msk.bf16.mxu1 %vm523_vm0, %v4345_v47 }
 0x8ac   : > { %v4329_v36 = vpop.trf.xlu0 }
 0x8b0   : > { %v4330_v9 = vpop.trf.xlu0 }
 0x8b1   : > { %v4346_v28 = vpack.c.bf16 %v4330_v9, %v4329_v36 }
 0x8b3   : > { %5946 = vmatmul.mubr.msk.bf16.gmra.mxu1 %vm523_vm0, %v4346_v28 }
 0x8e9   : > { %v5935_v43 = vpop.f32.mrf.mxu1 }
 0x8ea   : > { %v4437_v52 = vadd.f32 %v5935_v43, %v9146_v16 }
 0x8eb   : > { %v4428_v40 = vpop.f32.mrf.mxu1 }
 0x8ec   : > { %v4429_v8 = vadd.f32 %v9146_v16, %v4428_v40  ;;  %v9151_v26 = vadd.f32 %v7157_v53, %v4437_v52  ;;  %v7169_v52 = vld [vmem:[%s7506_s27 + $0x48] sm:$0xff] }
 0x8ed   : > { %v5936_v45 = vpop.f32.mrf.mxu1 }
 0x8ee   : > { %v9154_v19 = vadd.f32 %v7158_v18, %v4429_v8  ;;  %v4440_v0 = vadd.f32 %v5936_v45, %v9146_v16  ;;  %v4515_v24 = vsel %vm523_vm0, %v9151_v26, 0.0  ;;  %v7170_v18 = vld [vmem:[%s7506_s27 + $0x78] sm:$0xff] }
 0x8ef   : > { %v4431_v2 = vpop.f32.mrf.mxu1 }
 0x8f0   : > { %v4432_v44 = vadd.f32 %v9146_v16, %v4431_v2  ;;  %v4509_v15 = vsel %vm523_vm0, %v9154_v19, 0.0  ;;  %v9161_v42 = vadd.f32 %v7159_v56, %v4440_v0 }
 0x8f1   : > { %4510 = vadd.xlane.f32.xlu1 %v4509_v15 }
 0x8f2   : > { %v9164_v33 = vadd.f32 %v7160_v31, %v4432_v44  ;;  %v4518_v58 = vsel %vm523_vm0, %v9161_v42, 0.0  ;;  %v7171_v31 = vld [vmem:[%s7506_s27 + $0x58] sm:$0xff] }
 0x8f4   : > { %v4512_v20 = vsel %vm523_vm0, %v9164_v33, 0.0 }
 0x8f5   : > { %4513 = vadd.xlane.f32.xlu0 %v4512_v20  ;;  %4516 = vadd.xlane.f32.xlu1 %v4515_v24 }
 0x8f9   : > { %v5939_v34 = vpop.f32.mrf.mxu1  ;;  %4519 = vadd.xlane.f32.xlu1 %v4518_v58  ;;  %v7172_v58 = vld [vmem:[%s7506_s27 + $0x68] sm:$0xff]  ;;  %s7227_s27 = scalar_lea.vmem %s9532_s12, 2048 }
 0x8fa   : > { %v4453_v14 = vadd.f32 %v5939_v34, %v9146_v16  ;;  %p7228_p3 = scmp.ne.s32.totalorder %s9532_s12, %s7227_s27 }
 0x8fb   : > { %v4444_v49 = vpop.f32.mrf.mxu1 }
 0x8fc   : > { %v9174_v46 = vadd.f32 %v7161_v54, %v4453_v14  ;;  %v4445_v50 = vadd.f32 %v9146_v16, %v4444_v49  ;;  %p7229_p7 = pnand %p7228_p3, %p9821_p10 }
 0x8fd   : > { %v5940_v25 = vpop.f32.mrf.mxu1 }
 0x8fe   : > { %v9178_v48 = vadd.f32 %v7162_v39, %v4445_v50  ;;  %v4527_v30 = vsel %vm523_vm0, %v9174_v46, 0.0  ;;  %v4456_v51 = vadd.f32 %v5940_v25, %v9146_v16  ;;  %p7230_p9 = pneg %p7229_p7 }
 0x8ff   : > { %4528 = vadd.xlane.f32.xlu1 %v4527_v30  ;;  %v4447_v21 = vpop.f32.mrf.mxu1 }
 0x900   : > { %v9184_v6 = vadd.f32 %v7163_v23, %v4456_v51  ;;  %v4521_v12 = vsel %vm523_vm0, %v9178_v48, 0.0  ;;  %v4448_v5 = vadd.f32 %v9146_v16, %v4447_v21 }
 0x902   : > { %v9190_v60 = vadd.f32 %v7164_v55, %v4448_v5  ;;  %v4530_v37 = vsel %vm523_vm0, %v9184_v6, 0.0 }
 0x903   : > { %4522 = vadd.xlane.f32.xlu1 %v4521_v12 }
 0x904   : > { %v4524_v38 = vsel %vm523_vm0, %v9190_v60, 0.0 }
 0x907   : > { %4531 = vadd.xlane.f32.xlu1 %v4530_v37 }
 0x90b   : > { %4525 = vadd.xlane.f32.xlu1 %v4524_v38 }
 0x963   : > { %v5943_v63 = vpop.f32.mrf.mxu1 }
 0x964   : > { %v4469_v11 = vadd.f32 %v5943_v63, %v9146_v16 }
 0x965   : > { %v4460_v59 = vpop.f32.mrf.mxu1 }
 0x966   : > { %v9198_v13 = vadd.f32 %v7165_v32, %v4469_v11  ;;  %v4461_v7 = vadd.f32 %v9146_v16, %v4460_v59 }
 0x967   : > { %v5944_v10 = vpop.f32.mrf.mxu1 }
 0x968   : > { %v9202_v3 = vadd.f32 %v7166_v35, %v4461_v7  ;;  %v4472_v61 = vadd.f32 %v5944_v10, %v9146_v16  ;;  %v4539_v1 = vsel %vm523_vm0, %v9198_v13, 0.0 }
 0x969   : > { %v4463_v41 = vpop.f32.mrf.mxu1  ;;  %4540 = vadd.xlane.f32.xlu1 %v4539_v1 }
 0x96a   : > { %v9208_v22 = vadd.f32 %v7167_v27, %v4472_v61  ;;  %v4464_v17 = vadd.f32 %v9146_v16, %v4463_v41  ;;  %v4533_v57 = vsel %vm523_vm0, %v9202_v3, 0.0 }
 0x96c   : > { %v9214_v29 = vadd.f32 %v7168_v4, %v4464_v17  ;;  %v4542_v62 = vsel %vm523_vm0, %v9208_v22, 0.0 }
 0x96d   : > { %4534 = vadd.xlane.f32.xlu1 %v4533_v57 }
 0x96e   : > { %v4536_v36 = vsel %vm523_vm0, %v9214_v29, 0.0 }
 0x971   : > { %4543 = vadd.xlane.f32.xlu1 %v4542_v62 }
 0x973   : > { %v5947_v47 = vpop.f32.mrf.mxu1 }
 0x974   : > { %v4485_v53 = vadd.f32 %v5947_v47, %v9146_v16 }
 0x975   : > { %v4476_v9 = vpop.f32.mrf.mxu1  ;;  %4537 = vadd.xlane.f32.xlu1 %v4536_v36 }
 0x976   : > { %v4477_v28 = vadd.f32 %v9146_v16, %v4476_v9  ;;  %v9238_v34 = vadd.f32 %v7172_v58, %v4485_v53 }
 0x977   : > { %v5948_v43 = vpop.f32.mrf.mxu1 }
 0x978   : > { %v9222_v40 = vadd.f32 %v7169_v52, %v4477_v28  ;;  %v4488_v8 = vadd.f32 %v5948_v43, %v9146_v16  ;;  %v4551_v21 = vsel %vm523_vm0, %v9238_v34, 0.0 }
 0x979   : > { %v4479_v45 = vpop.f32.mrf.mxu1 }
 0x97a   : > { %v9227_v0 = vadd.f32 %v7170_v18, %v4488_v8  ;;  %v4480_v2 = vadd.f32 %v9146_v16, %v4479_v45  ;;  %v4511_v44 = vpop.xlane.xlu1 %4510  ;;  %v4545_v15 = vsel %vm523_vm0, %v9222_v40, 0.0  ;;  %v6763_v18 = vld [vmem:[%s9589_s10 + $0x8] sm:$0xff]  }
 0x97b   : > { %v4557_v56 = vmul.f32 0.03125, %v4511_v44  ;;  %4546 = vadd.xlane.f32.xlu1 %v4545_v15  ;;  %5949 = vmatprep.subr.bf16.mxu0 %v6763_v18 }
 0x97c   : > { %v9233_v24 = vadd.f32 %v7171_v31, %v4480_v2  ;;  %v4554_v20 = vsel %vm523_vm0, %v9227_v0, 0.0  ;;  %5950 = vmatpush3.bf16.msra.mxu0 %v6763_v18  ;;  %v6764_v2 = vld [vmem:[%s9589_s10] sm:$0xff]  }
 0x97d   : > { %4555 = vadd.xlane.f32.xlu0 %v4554_v20  ;;  %v9241_v14 = vsub.f32 %v9154_v19, %v4557_v56  ;;  %5951 = vmatprep.subr.bf16.mxu0 %v6764_v2 }
 0x97e   : > { %v4514_v16 = vpop.xlane.xlu0 %4513  ;;  %v4517_v49 = vpop.xlane.xlu1 %4516  ;;  %v4548_v54 = vsel %vm523_vm0, %v9233_v24, 0.0 }
 0x97f   : > { %v4558_v50 = vmul.f32 0.03125, %v4514_v16  ;;  %v4559_v25 = vmul.f32 0.03125, %v4517_v49  ;;  %4549 = vadd.xlane.f32.xlu1 %v4548_v54  ;;  %v4589_v23 = vmul.f32 %v9241_v14, %v9241_v14 }
 0x980   : > { %5952 = vmatpush3.bf16.msra.mxu0 %v6764_v2 }
 0x981   : > { %v9246_v39 = vsub.f32 %v9164_v33, %v4558_v50  ;;  %v9249_v30 = vsub.f32 %v9151_v26, %v4559_v25  ;;  %v4605_v38 = vsel %vm523_vm0, %v4589_v23, 0.0 }
 0x982   : > { %v4520_v51 = vpop.xlane.xlu1 %4519 }
 0x983   : > { %v4560_v12 = vmul.f32 0.03125, %v4520_v51  ;;  %4552 = vadd.xlane.f32.xlu1 %v4551_v21  ;;  %v4590_v5 = vmul.f32 %v9246_v39, %v9246_v39  ;;  %v4591_v63 = vmul.f32 %v9249_v30, %v9249_v30 }
 0x985   : > { %v9258_v55 = vsub.f32 %v9161_v42, %v4560_v12  ;;  %v4608_v37 = vsel %vm523_vm0, %v4590_v5, 0.0  ;;  %v4611_v7 = vsel %vm523_vm0, %v4591_v63, 0.0 }
 0x986   : > { %4609 = vadd.xlane.f32.xlu0 %v4608_v37 }
 0x987   : > { %4606 = vadd.xlane.f32.xlu1 %v4605_v38  ;;  %v4592_v11 = vmul.f32 %v9258_v55, %v9258_v55 }
 0x988   : > { %v4529_v59 = vpop.xlane.xlu1 %4528 }
 0x989   : > { %v4614_v32 = vsel %vm523_vm0, %v4592_v11, 0.0  ;;  %v4563_v10 = vmul.f32 0.03125, %v4529_v59 }
 0x98a   : > { %4615 = vadd.xlane.f32.xlu0 %v4614_v32 }
 0x98b   : > { %4612 = vadd.xlane.f32.xlu1 %v4611_v7  ;;  %v9269_v1 = vsub.f32 %v9174_v46, %v4563_v10 }
 0x98c   : > { %v4523_v35 = vpop.xlane.xlu1 %4522 }
 0x98d   : > { %v4561_v61 = vmul.f32 0.03125, %v4523_v35  ;;  %v4595_v62 = vmul.f32 %v9269_v1, %v9269_v1 }
 0x98f   : > { %v9272_v41 = vsub.f32 %v9178_v48, %v4561_v61  ;;  %v4623_v43 = vsel %vm523_vm0, %v4595_v62, 0.0 }
 0x990   : > { %v4532_v27 = vpop.xlane.xlu1 %4531 }
 0x991   : > { %v4593_v17 = vmul.f32 %v9272_v41, %v9272_v41  ;;  %v4564_v57 = vmul.f32 0.03125, %v4532_v27 }
 0x993   : > { %v4617_v4 = vsel %vm523_vm0, %v4593_v17, 0.0  ;;  %v9280_v9 = vsub.f32 %v9184_v6, %v4564_v57 }
 0x994   : > { %4618 = vadd.xlane.f32.xlu1 %v4617_v4  ;;  %v4526_v47 = vpop.xlane.xlu1 %4525 }
 0x995   : > { %v4562_v36 = vmul.f32 0.03125, %v4526_v47  ;;  %v4596_v45 = vmul.f32 %v9280_v9, %v9280_v9 }
 0x997   : > { %v9283_v28 = vsub.f32 %v9190_v60, %v4562_v36  ;;  %v4626_v53 = vsel %vm523_vm0, %v4596_v45, 0.0 }
 0x998   : > { %4624 = vadd.xlane.f32.xlu1 %v4623_v43 }
 0x999   : > { %v4594_v52 = vmul.f32 %v9283_v28, %v9283_v28 }
 0x99b   : > { %v4620_v8 = vsel %vm523_vm0, %v4594_v52, 0.0 }
 0x99c   : > { %4621 = vadd.xlane.f32.xlu0 %v4620_v8 }
 0x9a0   : > { %4627 = vadd.xlane.f32.xlu0 %v4626_v53 }
 0x9f2   : > { %v4541_v44 = vpop.xlane.xlu1 %4540 }
 0x9f3   : > { %v4567_v15 = vmul.f32 0.03125, %v4541_v44 }
 0x9f5   : > { %v9299_v20 = vsub.f32 %v9198_v13, %v4567_v15 }
 0x9f6   : > { %v4535_v56 = vpop.xlane.xlu1 %4534 }
 0x9f7   : > { %v4565_v31 = vmul.f32 0.03125, %v4535_v56  ;;  %v4599_v25 = vmul.f32 %v9299_v20, %v9299_v20 }
 0x9f9   : > { %v9302_v58 = vsub.f32 %v9202_v3, %v4565_v31  ;;  %v4635_v5 = vsel %vm523_vm0, %v4599_v25, 0.0 }
 0x9fa   : > { %v4544_v16 = vpop.xlane.xlu1 %4543 }
 0x9fb   : > { %v4597_v49 = vmul.f32 %v9302_v58, %v9302_v58  ;;  %v4568_v54 = vmul.f32 0.03125, %v4544_v16 }
 0x9fd   : > { %v4629_v50 = vsel %vm523_vm0, %v4597_v49, 0.0  ;;  %v9310_v23 = vsub.f32 %v9208_v22, %v4568_v54 }
 0x9fe   : > { %4630 = vadd.xlane.f32.xlu1 %v4629_v50  ;;  %v4538_v51 = vpop.xlane.xlu1 %4537 }
 0x9ff   : > { %v4566_v21 = vmul.f32 0.03125, %v4538_v51  ;;  %v4600_v59 = vmul.f32 %v9310_v23, %v9310_v23 }
 0xa01   : > { %v9313_v12 = vsub.f32 %v9214_v29, %v4566_v21  ;;  %v4638_v27 = vsel %vm523_vm0, %v4600_v59, 0.0  ;;  %v9349_v59 = vld [vmem:[%s9587_s8] ss:$0 sm:$0xff] }
 0xa02   : > { %4636 = vadd.xlane.f32.xlu1 %v4635_v5 }
 0xa03   : > { %v4598_v37 = vmul.f32 %v9313_v12, %v9313_v12 }
 0xa04   : > { %v4547_v38 = vpop.xlane.xlu1 %4546 }
 0xa05   : > { %v4569_v63 = vmul.f32 0.03125, %v4547_v38  ;;  %v4632_v11 = vsel %vm523_vm0, %v4598_v37, 0.0 }
 0xa06   : > { %v4556_v32 = vpop.xlane.xlu0 %4555  ;;  %4633 = vadd.xlane.f32.xlu0 %v4632_v11 }
 0xa07   : > { %v9322_v7 = vsub.f32 %v9222_v40, %v4569_v63  ;;  %v4572_v10 = vmul.f32 0.03125, %v4556_v32 }
 0xa08   : > { %v4550_v35 = vpop.xlane.xlu1 %4549 }
 0xa09   : > { %v4570_v61 = vmul.f32 0.03125, %v4550_v35  ;;  %v4601_v17 = vmul.f32 %v9322_v7, %v9322_v7  ;;  %v9328_v57 = vsub.f32 %v9227_v0, %v4572_v10 }
 0xa0a   : > { %4639 = vadd.xlane.f32.xlu0 %v4638_v27  ;;  %v9355_v27 = vld [vmem:[%s9588_s9] ss:$0 sm:$0xff] }
 0xa0b   : > { %v9331_v4 = vsub.f32 %v9233_v24, %v4570_v61  ;;  %v4641_v62 = vsel %vm523_vm0, %v4601_v17, 0.0  ;;  %v4604_v53 = vmul.f32 %v9328_v57, %v9328_v57 }
 0xa0c   : > { %4642 = vadd.xlane.f32.xlu1 %v4641_v62  ;;  %v4553_v47 = vpop.xlane.xlu1 %4552 }
 0xa0d   : > { %v4571_v36 = vmul.f32 0.03125, %v4553_v47  ;;  %v4602_v43 = vmul.f32 %v9331_v4, %v9331_v4  ;;  %v4650_v49 = vsel %vm523_vm0, %v4604_v53, 0.0 }
 0xa0f   : > { %v9337_v52 = vsub.f32 %v9238_v34, %v4571_v36  ;;  %v4610_v8 = vpop.xlane.xlu0 %4609  ;;  %v4644_v45 = vsel %vm523_vm0, %v4602_v43, 0.0 }
 0xa10   : > { %v4654_v18 = vmul.f32 0.03125, %v4610_v8  ;;  %4645 = vadd.xlane.f32.xlu0 %v4644_v45  ;;  %v4607_v2 = vpop.xlane.xlu1 %4606 }
 0xa11   : > { %v4653_v44 = vmul.f32 0.03125, %v4607_v2  ;;  %v4603_v15 = vmul.f32 %v9337_v52, %v9337_v52 }
 0xa12   : > { %v4670_v56 = vadd.f32 1e-05, %v4654_v18 }
 0xa13   : > { %v4669_v31 = vadd.f32 1e-05, %v4653_v44  ;;  %v4616_v16 = vpop.xlane.xlu0 %4615  ;;  %v4647_v54 = vsel %vm523_vm0, %v4603_v15, 0.0 }
 0xa14   : > { %7061 = vrsqrt.f32 %v4670_v56  ;;  %v4656_v50 = vmul.f32 0.03125, %v4616_v16  ;;  %4651 = vadd.xlane.f32.xlu0 %v4650_v49  ;;  %4648 = vadd.xlane.f32.xlu1 %v4647_v54  ;;  %v4613_v25 = vpop.xlane.xlu1 %4612 }
 0xa15   : > { %7063 = vrsqrt.f32 %v4669_v31  ;;  %v4655_v51 = vmul.f32 0.03125, %v4613_v25 }
 0xa16   : > { %v4672_v21 = vadd.f32 1e-05, %v4656_v50 }
 0xa17   : > { %v4671_v5 = vadd.f32 1e-05, %v4655_v51 }
 0xa18   : > { %7065 = vrsqrt.f32 %v4672_v21 }
 0xa19   : > { %7067 = vrsqrt.f32 %v4671_v5 }
 0xa1d   : > { %v4619_v37 = vpop.xlane.xlu1 %4618 }
 0xa1e   : > { %v4657_v38 = vmul.f32 0.03125, %v4619_v37 }
 0xa20   : > { %v4673_v63 = vadd.f32 1e-05, %v4657_v38 }
 0xa21   : > { %v7062_v11 = vpop.eup %7061  ;;  %v4625_v32 = vpop.xlane.xlu1 %4624 }
 0xa22   : > { %v7064_v10 = vpop.eup %7063  ;;  %v4659_v35 = vmul.f32 0.03125, %v4625_v32  ;;  %v4702_v61 = vmul.f32 %v7062_v11, %v9246_v39  ;;  %7069 = vrsqrt.f32 %v4673_v63 }
 0xa23   : > { %v4701_v17 = vmul.f32 %v7064_v10, %v9241_v14 }
 0xa24   : > { %v4675_v62 = vadd.f32 1e-05, %v4659_v35  ;;  %v4724_v47 = vmul.f32 %v9349_v59, %v4702_v61 }
 0xa25   : > { %v7066_v36 = vpop.eup %7065  ;;  %v4622_v43 = vpop.xlane.xlu0 %4621  ;;  %v4723_v8 = vmul.f32 %v9349_v59, %v4701_v17 }
 0xa26   : > { %v7068_v45 = vpop.eup %7067  ;;  %v4704_v53 = vmul.f32 %v7066_v36, %v9258_v55  ;;  %v4658_v18 = vmul.f32 0.03125, %v4622_v43  ;;  %v4746_v39 = vadd.f32 %v9355_v27, %v4724_v47  ;;  %7071 = vrsqrt.f32 %v4675_v62  ;;  %v6765_v36 = vld [vmem:[%s9817_s21 + $0x38] sm:$0xff]   ;;  %v6767_v43 = vld [vmem:[%s9817_s21 + $0x28] sm:$0xff]  }
 0xa27   : > { %v4703_v2 = vmul.f32 %v7068_v45, %v9249_v30  ;;  %v4745_v44 = vadd.f32 %v9355_v27, %v4723_v8  ;;  %5969 = vmatprep.subr.bf16.mxu1 %v6765_v36 }
 0xa28   : > { %v4726_v14 = vmul.f32 %v9349_v59, %v4704_v53  ;;  %v4674_v15 = vadd.f32 1e-05, %v4658_v18  ;;  %5970 = vmatpush3.bf16.msra.mxu1 %v6765_v36  ;;  %v6768_v53 = vld [vmem:[%s9817_s21 + $0x20] sm:$0xff]  }
 0xa29   : > { %v4725_v56 = vmul.f32 %v9349_v59, %v4703_v2  ;;  %v4628_v31 = vpop.xlane.xlu0 %4627  ;;  %v4761_v16 = vpack.c.bf16 %v4746_v39, %v4745_v44  ;;  %v6769_v44 = vld [vmem:[%s9817_s21 + $0x18] sm:$0xff]  }
 0xa2a   : > { %7073 = vrsqrt.f32 %v4674_v15  ;;  %v4660_v49 = vmul.f32 0.03125, %v4628_v31  ;;  %v4748_v54 = vadd.f32 %v9355_v27, %v4726_v14  ;;  %v6770_v31 = vld [vmem:[%s9817_s21 + $0x10] sm:$0xff]  }
 0xa2b   : > { %5953 = vmatprep.mubr.msk.bf16.mxu0 %vm523_vm0, %v4761_v16  ;;  %v4747_v55 = vadd.f32 %v9355_v27, %v4725_v56 }
 0xa2c   : > { %v4676_v50 = vadd.f32 1e-05, %v4660_v49 }
 0xa2d   : > { %v4762_v30 = vpack.c.bf16 %v4748_v54, %v4747_v55 }
 0xa2e   : > { %7075 = vrsqrt.f32 %v4676_v50  ;;  %v6771_v50 = vld [vmem:[%s9817_s21 + $0x8] sm:$0xff]  }
 0xa2f   : > { %5954 = vmatmul.mubr.msk.bf16.vlgmr.msra.gmra.mxu0 %vm523_vm0, %v4762_v30  ;;  %v7070_v25 = vpop.eup %7069 }
 0xa30   : > { %v4705_v51 = vmul.f32 %v7070_v25, %v9272_v41 }
 0xa32   : > { %v4727_v38 = vmul.f32 %v9349_v59, %v4705_v51 }
 0xa33   : > { %v7072_v21 = vpop.eup %7071 }
 0xa34   : > { %v4707_v63 = vmul.f32 %v7072_v21, %v9269_v1  ;;  %v4749_v10 = vadd.f32 %v9355_v27, %v4727_v38 }
 0xa36   : > { %v4729_v17 = vmul.f32 %v9349_v59, %v4707_v63 }
 0xa37   : > { %v7074_v5 = vpop.eup %7073 }
 0xa38   : > { %v4706_v37 = vmul.f32 %v7074_v5, %v9283_v28  ;;  %v4751_v28 = vadd.f32 %v9355_v27, %v4729_v17  ;;  %v6772_v5 = vld [vmem:[%s9817_s21] sm:$0xff]  }
 0xa3a   : > { %v4728_v11 = vmul.f32 %v9349_v59, %v4706_v37 }
 0xa3b   : > { %v7076_v32 = vpop.eup %7075 }
 0xa3c   : > { %v4750_v35 = vadd.f32 %v9355_v27, %v4728_v11  ;;  %v4708_v61 = vmul.f32 %v7076_v32, %v9280_v9  ;;  %v6766_v9 = vld [vmem:[%s9817_s21 + $0x30] sm:$0xff]  }
 0xa3d   : > { %5971 = vmatprep.subr.bf16.mxu1 %v6766_v9 }
 0xa3e   : > { %v4763_v41 = vpack.c.bf16 %v4750_v35, %v4749_v10  ;;  %v4730_v62 = vmul.f32 %v9349_v59, %v4708_v61  ;;  %5972 = vmatpush3.bf16.msra.mxu1 %v6766_v9 }
 0xa3f   : > { %5973 = vmatprep.subr.bf16.mxu1 %v6767_v43 }
 0xa40   : > { %5957 = vmatprep.mubr.msk.bf16.mxu0 %vm523_vm0, %v4763_v41  ;;  %v4752_v1 = vadd.f32 %v9355_v27, %v4730_v62 }
 0xa42   : > { %v4764_v47 = vpack.c.bf16 %v4752_v1, %v4751_v28  ;;  %5974 = vmatpush3.bf16.msra.mxu1 %v6767_v43 }
 0xa43   : > { %5975 = vmatprep.subr.bf16.mxu1 %v6768_v53 }
 0xa44   : > { %5958 = vmatmul.mubr.msk.bf16.gmra.mxu0 %vm523_vm0, %v4764_v47 }
 0xa46   : > { %5976 = vmatpush3.bf16.msra.mxu1 %v6768_v53 }
 0xa47   : > { %5977 = vmatprep.subr.bf16.mxu1 %v6769_v44 }
 0xa4a   : > { %5978 = vmatpush3.bf16.msra.mxu1 %v6769_v44 }
 0xa4b   : > { %5979 = vmatprep.subr.bf16.mxu1 %v6770_v31 }
 0xa4e   : > { %5980 = vmatpush3.bf16.msra.mxu1 %v6770_v31 }
 0xa4f   : > { %5981 = vmatprep.subr.bf16.mxu1 %v6771_v50 }
 0xa52   : > { %5982 = vmatpush3.bf16.msra.mxu1 %v6771_v50 }
 0xa53   : > { %5983 = vmatprep.subr.bf16.mxu1 %v6772_v5 }
 0xa56   : > { %5984 = vmatpush3.bf16.msra.mxu1 %v6772_v5 }
 0xa87   : > { %v4631_v8 = vpop.xlane.xlu1 %4630 }
 0xa88   : > { %v4661_v45 = vmul.f32 0.03125, %v4631_v8 }
 0xa8a   : > { %v4677_v18 = vadd.f32 1e-05, %v4661_v45 }
 0xa8b   : > { %v4637_v39 = vpop.xlane.xlu1 %4636 }
 0xa8c   : > { %v4663_v2 = vmul.f32 0.03125, %v4637_v39  ;;  %7077 = vrsqrt.f32 %v4677_v18 }
 0xa8e   : > { %v4679_v14 = vadd.f32 1e-05, %v4663_v2 }
 0xa8f   : > { %v4634_v15 = vpop.xlane.xlu0 %4633 }
 0xa90   : > { %v4662_v56 = vmul.f32 0.03125, %v4634_v15  ;;  %7079 = vrsqrt.f32 %v4679_v14 }
 0xa92   : > { %v4678_v16 = vadd.f32 1e-05, %v4662_v56 }
 0xa93   : > { %v4640_v49 = vpop.xlane.xlu0 %4639 }
 0xa94   : > { %7081 = vrsqrt.f32 %v4678_v16  ;;  %v4664_v54 = vmul.f32 0.03125, %v4640_v49 }
 0xa95   : > { %v4643_v55 = vpop.xlane.xlu1 %4642 }
 0xa96   : > { %v4680_v30 = vadd.f32 1e-05, %v4664_v54  ;;  %v4665_v25 = vmul.f32 0.03125, %v4643_v55 }
 0xa98   : > { %7083 = vrsqrt.f32 %v4680_v30  ;;  %v4681_v51 = vadd.f32 1e-05, %v4665_v25 }
 0xa99   : > { %v4646_v21 = vpop.xlane.xlu0 %4645  ;;  %v7078_v38 = vpop.eup %7077 }
 0xa9a   : > { %7085 = vrsqrt.f32 %v4681_v51  ;;  %v4666_v37 = vmul.f32 0.03125, %v4646_v21  ;;  %v4709_v61 = vmul.f32 %v7078_v38, %v9302_v58 }
 0xa9c   : > { %v4682_v63 = vadd.f32 1e-05, %v4666_v37  ;;  %v4731_v47 = vmul.f32 %v9349_v59, %v4709_v61 }
 0xa9d   : > { %v4652_v11 = vpop.xlane.xlu0 %4651  ;;  %v4649_v32 = vpop.xlane.xlu1 %4648 }
 0xa9e   : > { %7087 = vrsqrt.f32 %v4682_v63  ;;  %v4668_v10 = vmul.f32 0.03125, %v4652_v11  ;;  %v4667_v35 = vmul.f32 0.03125, %v4649_v32  ;;  %v7080_v17 = vpop.eup %7079  ;;  %v4753_v8 = vadd.f32 %v9355_v27, %v4731_v47 }
 0xa9f   : > { %v4711_v36 = vmul.f32 %v7080_v17, %v9299_v20 }
 0xaa0   : > { %v4684_v41 = vadd.f32 1e-05, %v4668_v10  ;;  %v4683_v62 = vadd.f32 1e-05, %v4667_v35 }
 0xaa1   : > { %v7082_v28 = vpop.eup %7081  ;;  %v4733_v53 = vmul.f32 %v9349_v59, %v4711_v36 }
 0xaa2   : > { %7089 = vrsqrt.f32 %v4684_v41  ;;  %v4710_v1 = vmul.f32 %v7082_v28, %v9313_v12 }
 0xaa3   : > { %7091 = vrsqrt.f32 %v4683_v62  ;;  %v4755_v20 = vadd.f32 %v9355_v27, %v4733_v53 }
 0xaa4   : > { %v4732_v9 = vmul.f32 %v9349_v59, %v4710_v1 }
 0xaa5   : > { %v7084_v43 = vpop.eup %7083 }
 0xaa6   : > { %v4754_v45 = vadd.f32 %v9355_v27, %v4732_v9  ;;  %v4712_v58 = vmul.f32 %v7084_v43, %v9310_v23 }
 0xaa7   : > { %v7086_v18 = vpop.eup %7085 }
 0xaa8   : > { %v4765_v39 = vpack.c.bf16 %v4754_v45, %v4753_v8  ;;  %v4734_v12 = vmul.f32 %v9349_v59, %v4712_v58  ;;  %v4713_v2 = vmul.f32 %v7086_v18, %v9322_v7 }
 0xaaa   : > { %5961 = vmatprep.mubr.msk.bf16.mxu0 %vm523_vm0, %v4765_v39  ;;  %v4756_v44 = vadd.f32 %v9355_v27, %v4734_v12  ;;  %v4735_v23 = vmul.f32 %v9349_v59, %v4713_v2 }
 0xaab   : > { %v7088_v14 = vpop.eup %7087 }
 0xaac   : > { %v4766_v15 = vpack.c.bf16 %v4756_v44, %v4755_v20  ;;  %v4714_v56 = vmul.f32 %v7088_v14, %v9331_v4  ;;  %v4757_v7 = vadd.f32 %v9355_v27, %v4735_v23 }
 0xaae   : > { %5962 = vmatmul.mubr.msk.bf16.gmra.mxu0 %vm523_vm0, %v4766_v15  ;;  %v4736_v31 = vmul.f32 %v9349_v59, %v4714_v56 }
 0xaaf   : > { %v7090_v16 = vpop.eup %7089 }
 0xab0   : > { %v7092_v49 = vpop.eup %7091  ;;  %v4758_v54 = vadd.f32 %v9355_v27, %v4736_v31  ;;  %v4716_v55 = vmul.f32 %v7090_v16, %v9328_v57  ;;  %v9439_v57 = vld [vmem:[%s9818_s14] ss:$0 sm:$0xff]  ;;  %s7231_s14 = sshll.u32 %s7301_s28, 4  ;;  %s7232_s14 = int_to_ptr.vmem [resolvable:$false] %s7231_s14 }
 0xab1   : > { %v4715_v50 = vmul.f32 %v7092_v49, %v9337_v52  ;;  %s7233_s23 = scalar_lea.vmem %s7232_s14, 4096  ;;  %p7234_p11 = scmp.lt.s32.totalorder %s9532_s12, %s7232_s14 }
 0xab2   : > { %v4767_v30 = vpack.c.bf16 %v4758_v54, %v4757_v7  ;;  %v4738_v25 = vmul.f32 %v9349_v59, %v4716_v55  ;;  %p7235_p12 = scmp.lt.s32.totalorder %s7233_s23, %s7227_s27 }
 0xab3   : > { %v4737_v4 = vmul.f32 %v9349_v59, %v4715_v50 }
 0xab4   : > { %5965 = vmatprep.mubr.msk.bf16.mxu0 %vm523_vm0, %v4767_v30  ;;  %v4760_v51 = vadd.f32 %v9355_v27, %v4738_v25  ;;  %p7236_p13 = por %p7235_p12, %p7234_p11 }
 0xab5   : > { %v4759_v21 = vadd.f32 %v9355_v27, %v4737_v4 }
 0xab6   : > { %p7237_p0 = pnand %p7236_p13, %p7230_p9 }
 0xab7   : > { %v4768_v5 = vpack.c.bf16 %v4760_v51, %v4759_v21 }
 0xab9   : > { %5966 = vmatmul.mubr.msk.bf16.gmra.mxu0 %vm523_vm0, %v4768_v5 }
 0xaef   : > { %v5955_v52 = vpop.f32.mrf.mxu0 }
 0xaf0   : > { %v4859_v37 = vadd.f32 %v5955_v52, %v9439_v57 }
 0xaf1   : > { %v4850_v38 = vpop.f32.mrf.mxu0 }
 0xaf2   : > { %v5446_v63 = vmul.f32 -1.442695, %v4859_v37  ;;  %v4851_v59 = vadd.f32 %v9439_v57, %v4850_v38 }
 0xaf3   : > { %v5956_v11 = vpop.f32.mrf.mxu0 }
 0xaf4   : > { %7093 = vpow2.f32 %v5446_v63  ;;  %v5444_v32 = vmul.f32 -1.442695, %v4851_v59  ;;  %v4862_v27 = vadd.f32 %v5956_v11, %v9439_v57 }
 0xaf5   : > { %v4853_v10 = vpop.f32.mrf.mxu0 }
 0xaf6   : > { %7095 = vpow2.f32 %v5444_v32  ;;  %v5447_v35 = vmul.f32 -1.442695, %v4862_v27  ;;  %v4854_v61 = vadd.f32 %v9439_v57, %v4853_v10 }
 0xaf8   : > { %7097 = vpow2.f32 %v5447_v35  ;;  %v5445_v17 = vmul.f32 -1.442695, %v4854_v61 }
 0xafa   : > { %7099 = vpow2.f32 %v5445_v17 }
 0xb01   : > { %v7094_v41 = vpop.eup %7093 }
 0xb02   : > { %v4963_v62 = vadd.f32 1.0, %v7094_v41 }
 0xb03   : > { %v7096_v28 = vpop.eup %7095 }
 0xb04   : > { %v4961_v1 = vadd.f32 1.0, %v7096_v28  ;;  %v5959_v47 = vpop.f32.mrf.mxu0  ;;  %7101 = vrcp.f32 %v4963_v62 }
 0xb05   : > { %v7098_v36 = vpop.eup %7097  ;;  %v4875_v9 = vadd.f32 %v5959_v47, %v9439_v57 }
 0xb06   : > { %v4964_v43 = vadd.f32 1.0, %v7098_v36  ;;  %v4866_v8 = vpop.f32.mrf.mxu0  ;;  %7103 = vrcp.f32 %v4961_v1 }
 0xb07   : > { %v7100_v45 = vpop.eup %7099  ;;  %v5450_v58 = vmul.f32 -1.442695, %v4875_v9  ;;  %v4867_v53 = vadd.f32 %v9439_v57, %v4866_v8 }
 0xb08   : > { %7105 = vrcp.f32 %v4964_v43  ;;  %v4962_v18 = vadd.f32 1.0, %v7100_v45  ;;  %v5960_v39 = vpop.f32.mrf.mxu0 }
 0xb09   : > { %7107 = vpow2.f32 %v5450_v58  ;;  %v5448_v12 = vmul.f32 -1.442695, %v4867_v53  ;;  %v4878_v2 = vadd.f32 %v5960_v39, %v9439_v57 }
 0xb0a   : > { %7109 = vrcp.f32 %v4962_v18  ;;  %v4869_v20 = vpop.f32.mrf.mxu0 }
 0xb0b   : > { %7111 = vpow2.f32 %v5448_v12  ;;  %v5451_v44 = vmul.f32 -1.442695, %v4878_v2  ;;  %v4870_v14 = vadd.f32 %v9439_v57, %v4869_v20 }
 0xb0d   : > { %7113 = vpow2.f32 %v5451_v44  ;;  %v5449_v15 = vmul.f32 -1.442695, %v4870_v14 }
 0xb0f   : > { %7115 = vpow2.f32 %v5449_v15 }
 0xb11   : > { %v7102_v56 = vpop.eup %7101 }
 0xb12   : > { %v5011_v30 = vmul.f32 %v7102_v56, %v4859_v37 }
 0xb13   : > { %v7104_v23 = vpop.eup %7103 }
 0xb14   : > { %v5009_v55 = vmul.f32 %v7104_v23, %v4851_v59 }
 0xb15   : > { %v7106_v31 = vpop.eup %7105 }
 0xb16   : > { %v7108_v16 = vpop.eup %7107  ;;  %v5012_v7 = vmul.f32 %v7106_v31, %v4862_v27 }
 0xb17   : > { %v7110_v49 = vpop.eup %7109  ;;  %v4967_v51 = vadd.f32 1.0, %v7108_v16 }
 0xb18   : > { %v7112_v54 = vpop.eup %7111  ;;  %v5010_v50 = vmul.f32 %v7110_v49, %v4854_v61  ;;  %v5026_v5 = vpack.c.bf16 %v5012_v7, %v5011_v30 }
 0xb19   : > { %v4965_v25 = vadd.f32 1.0, %v7112_v54 }
 0xb1a   : > { %v7114_v4 = vpop.eup %7113  ;;  %v5025_v21 = vpack.c.bf16 %v5010_v50, %v5009_v55 }
 0xb1b   : > { %v4968_v52 = vadd.f32 1.0, %v7114_v4  ;;  %7117 = vrcp.f32 %v4965_v25 }
 0xb1c   : > { %v7116_v38 = vpop.eup %7115  ;;  %5985 = vmatprep.mubr.bf16.mxu1 %v5025_v21 }
 0xb1d   : > { %7119 = vrcp.f32 %v4968_v52  ;;  %v4966_v63 = vadd.f32 1.0, %v7116_v38  ;;  %5986 = vmatmul.mubr.bf16.vlgmr.msra.gmra.mxu1 %v5026_v5 }
 0xb1e   : > { %7121 = vrcp.f32 %v4967_v51 }
 0xb1f   : > { %7123 = vrcp.f32 %v4966_v63 }
 0xb28   : > { %v7118_v11 = vpop.eup %7117 }
 0xb29   : > { %v5013_v37 = vmul.f32 %v7118_v11, %v4867_v53 }
 0xb2a   : > { %v7120_v32 = vpop.eup %7119 }
 0xb2b   : > { %v7122_v27 = vpop.eup %7121  ;;  %v5016_v10 = vmul.f32 %v7120_v32, %v4878_v2 }
 0xb2c   : > { %v7124_v59 = vpop.eup %7123  ;;  %v5015_v61 = vmul.f32 %v7122_v27, %v4875_v9 }
 0xb2d   : > { %v5014_v35 = vmul.f32 %v7124_v59, %v4870_v14 }
 0xb2e   : > { %v5028_v41 = vpack.c.bf16 %v5016_v10, %v5015_v61 }
 0xb2f   : > { %v5027_v17 = vpack.c.bf16 %v5014_v35, %v5013_v37 }
 0xb31   : > { %5989 = vmatprep.mubr.bf16.mxu1 %v5027_v17 }
 0xb32   : > { %5990 = vmatmul.mubr.bf16.gmra.mxu1 %v5028_v41 }
 0xb6e   : > { %v5963_v62 = vpop.f32.mrf.mxu0 }
 0xb6f   : > { %v4891_v28 = vadd.f32 %v5963_v62, %v9439_v57 }
 0xb70   : > { %v4882_v1 = vpop.f32.mrf.mxu0 }
 0xb71   : > { %v5454_v47 = vmul.f32 -1.442695, %v4891_v28  ;;  %v4883_v36 = vadd.f32 %v9439_v57, %v4882_v1 }
 0xb72   : > { %v5964_v43 = vpop.f32.mrf.mxu0 }
 0xb73   : > { %v5452_v8 = vmul.f32 -1.442695, %v4883_v36  ;;  %v4894_v45 = vadd.f32 %v5964_v43, %v9439_v57  ;;  %7125 = vpow2.f32 %v5454_v47 }
 0xb74   : > { %v4885_v58 = vpop.f32.mrf.mxu0 }
 0xb75   : > { %7127 = vpow2.f32 %v5452_v8  ;;  %v5455_v53 = vmul.f32 -1.442695, %v4894_v45  ;;  %v4886_v9 = vadd.f32 %v9439_v57, %v4885_v58 }
 0xb77   : > { %7129 = vpow2.f32 %v5455_v53  ;;  %v5453_v18 = vmul.f32 -1.442695, %v4886_v9 }
 0xb79   : > { %7131 = vpow2.f32 %v5453_v18  ;;  %v5967_v39 = vpop.f32.mrf.mxu0 }
 0xb7a   : > { %v4907_v12 = vadd.f32 %v5967_v39, %v9439_v57 }
 0xb7b   : > { %v4898_v2 = vpop.f32.mrf.mxu0 }
 0xb7c   : > { %v5458_v20 = vmul.f32 -1.442695, %v4907_v12  ;;  %v4899_v44 = vadd.f32 %v9439_v57, %v4898_v2 }
 0xb7d   : > { %v5968_v14 = vpop.f32.mrf.mxu0 }
 0xb7e   : > { %v5456_v15 = vmul.f32 -1.442695, %v4899_v44  ;;  %v4910_v56 = vadd.f32 %v5968_v14, %v9439_v57  ;;  %7133 = vpow2.f32 %v5458_v20 }
 0xb7f   : > { %v4901_v23 = vpop.f32.mrf.mxu0 }
 0xb80   : > { %7135 = vpow2.f32 %v5456_v15  ;;  %v5459_v31 = vmul.f32 -1.442695, %v4910_v56  ;;  %v4902_v16 = vadd.f32 %v9439_v57, %v4901_v23  ;;  %v7126_v49 = vpop.eup %7125 }
 0xb81   : > { %v4971_v30 = vadd.f32 1.0, %v7126_v49 }
 0xb82   : > { %v7128_v7 = vpop.eup %7127  ;;  %7137 = vpow2.f32 %v5459_v31  ;;  %v5457_v54 = vmul.f32 -1.442695, %v4902_v16 }
 0xb83   : > { %v4969_v55 = vadd.f32 1.0, %v7128_v7 }
 0xb84   : > { %v7130_v50 = vpop.eup %7129  ;;  %7139 = vpow2.f32 %v5457_v54 }
 0xb85   : > { %v4972_v25 = vadd.f32 1.0, %v7130_v50  ;;  %7141 = vrcp.f32 %v4969_v55 }
 0xb86   : > { %v7132_v4 = vpop.eup %7131 }
 0xb87   : > { %7143 = vrcp.f32 %v4972_v25  ;;  %v4970_v51 = vadd.f32 1.0, %v7132_v4 }
 0xb88   : > { %7145 = vrcp.f32 %v4971_v30 }
 0xb89   : > { %7147 = vrcp.f32 %v4970_v51 }
 0xb8b   : > { %v7134_v21 = vpop.eup %7133 }
 0xb8c   : > { %v4975_v57 = vadd.f32 1.0, %v7134_v21 }
 0xb8d   : > { %v7136_v5 = vpop.eup %7135 }
 0xb8e   : > { %v4973_v52 = vadd.f32 1.0, %v7136_v5 }
 0xb8f   : > { %v7138_v38 = vpop.eup %7137 }
 0xb90   : > { %v4976_v63 = vadd.f32 1.0, %v7138_v38  ;;  %7149 = vrcp.f32 %v4973_v52 }
 0xb91   : > { %v7140_v11 = vpop.eup %7139 }
 0xb92   : > { %7151 = vrcp.f32 %v4976_v63  ;;  %v4974_v32 = vadd.f32 1.0, %v7140_v11  ;;  %v7142_v27 = vpop.eup %7141 }
 0xb93   : > { %7153 = vrcp.f32 %v4975_v57  ;;  %v5017_v61 = vmul.f32 %v7142_v27, %v4883_v36 }
 0xb94   : > { %v7144_v59 = vpop.eup %7143  ;;  %7155 = vrcp.f32 %v4974_v32 }
 0xb95   : > { %v7146_v10 = vpop.eup %7145  ;;  %v5020_v35 = vmul.f32 %v7144_v59, %v4894_v45 }
 0xb96   : > { %v7148_v37 = vpop.eup %7147  ;;  %v5019_v41 = vmul.f32 %v7146_v10, %v4891_v28  ;;  %v9460_v28 = vld [vmem:[%s9819_s11] ss:$0 sm:$0xff] }
 0xb97   : > { %v5018_v17 = vmul.f32 %v7148_v37, %v4886_v9 }
 0xb98   : > { %v5030_v1 = vpack.c.bf16 %v5020_v35, %v5019_v41 }
 0xb99   : > { %v5029_v62 = vpack.c.bf16 %v5018_v17, %v5017_v61 }
 0xb9b   : > { %5993 = vmatprep.mubr.bf16.mxu1 %v5029_v62 }
 0xb9c   : > { %5994 = vmatmul.mubr.bf16.gmra.mxu1 %v5030_v1 }
 0xb9d   : > { %v7150_v47 = vpop.eup %7149 }
 0xb9e   : > { %v5021_v18 = vmul.f32 %v7150_v47, %v4899_v44 }
 0xb9f   : > { %v7152_v43 = vpop.eup %7151 }
 0xba0   : > { %v7154_v8 = vpop.eup %7153  ;;  %v5024_v53 = vmul.f32 %v7152_v43, %v4910_v56 }
 0xba1   : > { %v7156_v58 = vpop.eup %7155  ;;  %v5023_v2 = vmul.f32 %v7154_v8, %v4907_v12 }
 0xba2   : > { %v5022_v39 = vmul.f32 %v7156_v58, %v4902_v16 }
 0xba3   : > { %v5032_v14 = vpack.c.bf16 %v5024_v53, %v5023_v2 }
 0xba4   : > { %v5031_v20 = vpack.c.bf16 %v5022_v39, %v5021_v18 }
 0xba6   : > { %5997 = vmatprep.mubr.bf16.mxu1 %v5031_v20 }
 0xba7   : > { %5998 = vmatmul.mubr.bf16.gmra.mxu1 %v5032_v14 }
 0xbdd   : > { %v5987_v36 = vpop.f32.mrf.mxu1 }
 0xbde   : > { %v5147_v45 = vadd.f32 %v5987_v36, %v9460_v28 }
 0xbdf   : > { %v5138_v9 = vpop.f32.mrf.mxu1 }
 0xbe0   : > { %v5203_v15 = vadd.f32 %v5147_v45, %v9151_v26  ;;  %v5139_v56 = vadd.f32 %v9460_v28, %v5138_v9 }
 0xbe1   : > { %v5988_v44 = vpop.f32.mrf.mxu1 }
 0xbe2   : > { %5221 = vst.msk [vmem:[%s9467_s18 + $0x20] sm:$0xff] %vm523_vm0, %v5203_v15  ;;  %v5201_v12 = vadd.f32 %v5139_v56, %v9154_v19  ;;  %v5150_v23 = vadd.f32 %v5988_v44, %v9460_v28 }
 0xbe3   : > { %v5141_v31 = vpop.f32.mrf.mxu1 }
 0xbe4   : > { %5217 = vst.msk [vmem:[%s9467_s18] sm:$0xff] %vm523_vm0, %v5201_v12  ;;  %v5204_v26 = vadd.f32 %v5150_v23, %v9161_v42  ;;  %v5142_v16 = vadd.f32 %v9460_v28, %v5141_v31 }
 0xbe6   : > { %5223 = vst.msk [vmem:[%s9467_s18 + $0x30] sm:$0xff] %vm523_vm0, %v5204_v26  ;;  %v5202_v49 = vadd.f32 %v5142_v16, %v9164_v33 }
 0xbe8   : > { %5219 = vst.msk [vmem:[%s9467_s18 + $0x10] sm:$0xff] %vm523_vm0, %v5202_v49 }
 0xbf2   : > { %v5991_v7 = vpop.f32.mrf.mxu1 }
 0xbf3   : > { %v5163_v19 = vadd.f32 %v5991_v7, %v9460_v28 }
 0xbf4   : > { %v5154_v54 = vpop.f32.mrf.mxu1 }
 0xbf5   : > { %v5207_v55 = vadd.f32 %v5163_v19, %v9174_v46  ;;  %v5155_v50 = vadd.f32 %v9460_v28, %v5154_v54 }
 0xbf6   : > { %v5992_v30 = vpop.f32.mrf.mxu1 }
 0xbf7   : > { %5229 = vst.msk [vmem:[%s9467_s18 + $0x60] sm:$0xff] %vm523_vm0, %v5207_v55  ;;  %v5205_v42 = vadd.f32 %v5155_v50, %v9178_v48  ;;  %v5166_v25 = vadd.f32 %v5992_v30, %v9460_v28 }
 0xbf8   : > { %v5157_v33 = vpop.f32.mrf.mxu1 }
 0xbf9   : > { %5225 = vst.msk [vmem:[%s9467_s18 + $0x40] sm:$0xff] %vm523_vm0, %v5205_v42  ;;  %v5208_v4 = vadd.f32 %v5166_v25, %v9184_v6  ;;  %v5158_v51 = vadd.f32 %v9460_v28, %v5157_v33 }
 0xbfb   : > { %5231 = vst.msk [vmem:[%s9467_s18 + $0x70] sm:$0xff] %vm523_vm0, %v5208_v4  ;;  %v5206_v46 = vadd.f32 %v5158_v51, %v9190_v60 }
 0xbfd   : > { %5227 = vst.msk [vmem:[%s9467_s18 + $0x50] sm:$0xff] %vm523_vm0, %v5206_v46 }
 0xc5c   : > { %v5995_v21 = vpop.f32.mrf.mxu1 }
 0xc5d   : > { %v5179_v48 = vadd.f32 %v5995_v21, %v9460_v28 }
 0xc5e   : > { %v5170_v5 = vpop.f32.mrf.mxu1 }
 0xc5f   : > { %v5211_v52 = vadd.f32 %v5179_v48, %v9198_v13  ;;  %v5171_v38 = vadd.f32 %v9460_v28, %v5170_v5 }
 0xc60   : > { %v5996_v57 = vpop.f32.mrf.mxu1 }
 0xc61   : > { %5222 = vst.msk [vmem:[%s9467_s18 + $0x28] sm:$0xff] %vm523_vm0, %v5211_v52  ;;  %v5209_v6 = vadd.f32 %v5171_v38, %v9202_v3  ;;  %v5182_v63 = vadd.f32 %v5996_v57, %v9460_v28 }
 0xc62   : > { %v5173_v60 = vpop.f32.mrf.mxu1 }
 0xc63   : > { %5218 = vst.msk [vmem:[%s9467_s18 + $0x8] sm:$0xff] %vm523_vm0, %v5209_v6  ;;  %v5212_v11 = vadd.f32 %v5182_v63, %v9208_v22  ;;  %v5174_v32 = vadd.f32 %v9460_v28, %v5173_v60 }
 0xc65   : > { %5224 = vst.msk [vmem:[%s9467_s18 + $0x38] sm:$0xff] %vm523_vm0, %v5212_v11  ;;  %v5210_v13 = vadd.f32 %v5174_v32, %v9214_v29 }
 0xc67   : > { %5220 = vst.msk [vmem:[%s9467_s18 + $0x18] sm:$0xff] %vm523_vm0, %v5210_v13  ;;  %v5999_v27 = vpop.f32.mrf.mxu1 }
 0xc68   : > { %v5195_v3 = vadd.f32 %v5999_v27, %v9460_v28 }
 0xc69   : > { %v5186_v59 = vpop.f32.mrf.mxu1 }
 0xc6a   : > { %v5215_v10 = vadd.f32 %v5195_v3, %v9238_v34  ;;  %v5187_v37 = vadd.f32 %v9460_v28, %v5186_v59 }
 0xc6b   : > { %v6000_v22 = vpop.f32.mrf.mxu1 }
 0xc6c   : > { %5230 = vst.msk [vmem:[%s9467_s18 + $0x68] sm:$0xff] %vm523_vm0, %v5215_v10  ;;  %v5213_v35 = vadd.f32 %v5187_v37, %v9222_v40  ;;  %v5198_v29 = vadd.f32 %v6000_v22, %v9460_v28 }
 0xc6d   : > { %v5189_v61 = vpop.f32.mrf.mxu1 }
 0xc6e   : > { %5226 = vst.msk [vmem:[%s9467_s18 + $0x48] sm:$0xff] %vm523_vm0, %v5213_v35  ;;  %v5216_v17 = vadd.f32 %v5198_v29, %v9227_v0  ;;  %v5190_v34 = vadd.f32 %v9460_v28, %v5189_v61 }
 0xc70   : > { %5232 = vst.msk [vmem:[%s9467_s18 + $0x78] sm:$0xff] %vm523_vm0, %v5216_v17  ;;  %v5214_v40 = vadd.f32 %v5190_v34, %v9233_v24 }
 0xc72   : > { %5228 = vst.msk [vmem:[%s9467_s18 + $0x58] sm:$0xff] %vm523_vm0, %v5214_v40 }
 0xc73   : > { %7240 = shalt.err (!%p7237_p0)
}
 0xc74   : > { %s7241_s24 = scalar_lea.hbm %s9530_s26, 2048  ;;  %s7245_s1 = scalar_lea.hbm %s9820_s25, 8192 }
 0xc75   : > { %p7242_p5 = scmp.ne.s32.totalorder %s9530_s26, %s7241_s24  ;;  %p7246_p4 = scmp.lt.s32.totalorder %s9530_s26, %s9820_s25 }
 0xc76   : > { %p7247_p6 = scmp.lt.s32.totalorder %s7245_s1, %s7241_s24 }
 0xc77   : > { %p7243_p2 = pnand %p7242_p5, %p9821_p10 }
 0xc78   : > { %p7248_p8 = por %p7247_p6, %p7246_p4 }
 0xc79   : > { %p7244_p1 = pneg %p7243_p2 }
 0xc7b   : > { %p7249_p3 = pnand %p7248_p8, %p7244_p1 }
 0xc7d   : > { %7252 = shalt.err (!%p7249_p3)
}
 0xc7e   : > { %s7302_s27 = smov 128   ;;  %s7303_s28 = smov 8  }
 0xc7f   : > { %6039 = dma.vmem_to_hbm [thread:$0]  (%p9821_p10), %s9532_s12, 2048, %s9530_s26, %s5234_s17, %s7302_s27, %s7302_s27, %s7303_s28  }
 0xc80 PF: > { %s9822_s14 = sld [smem:[#allocation11_spill]]  ;;  %p6056_p7 = scmp.ge.s32.totalorder %s7295_s16, 2 }
 0xc81   : > { %s9823_s23 = sld [smem:[#allocation12_spill]] }
 0xc86   : > { %s5263_s11 = sand.u32 1, %s9822_s14  }
 0xc87   : > { %p9824_p9 = scmp.ne.s32.totalorder %s9823_s23, 0  ;;  %s5264_s24 = scalar_lea.sflag [#allocation4], %s5263_s11 }
 0xc89   : > { %p6050_p11 = pnand %p6056_p7, %p9824_p9 }
 0xc8b   : > { %p6051_p12 = pneg %p6050_p11 }
 0xc8d   : > { %7278 = dma.done.wait (%p6051_p12), %s5264_s24, 2048  }
 0xc8e   : > { %7280 = vsyncadd (%p6051_p12), %s5264_s24, 4294965248  ;;  %s9825_s16 = sld [smem:[#allocation13_spill]]  ;;  %s9826_s29 = smov %s7287_s30 }
 0xc8f   : > { %s9827_s30 = smov %s7291_s15  ;;  %s9828_s15 = smov %s7452_s20 }
 0xc94   : > { %p28_p13 = scmp.ge.s32.totalorder %s9825_s16, 6  }
 0xc96   :  { %30 = sbr.rel (!%p28_p13) target bundleno = 12 (0xc), region = 125 }
 0xc9b   :  { %5269 = vsyncpa [#allocation3], 1 }
 0xc9c   :  { %5271 = vsyncpa [#allocation3 + $0x1], 1 }
 0xc9d   :  { %5272 = vsyncpa [#allocation6], 1 }
 0xc9e   :  { %5273 = vsyncpa [#allocation4], 1 }
 0xc9f   :  { %5275 = vsyncpa [#allocation4 + $0x1], 1 }

</bundles_post_ra>
